<compile_context>
chip_gen: v6e
topology: v6e:2x2x1
jax: 0.10.0
libtpu: 0.0.40
codegen_flags: <defaults>
</compile_context>

<pallas_src>
import jax
import jax.numpy as jnp
from jax.experimental import pallas as pl
from jax.experimental.pallas import tpu as pltpu


def _convT2x2_tanh_kernel(x_ref, w_ref, e_ref, b_ref, o_ref):
    # x_ref: (Cin, th, W)     input rows for this tile, W on lanes
    # w_ref: (4, Cout, Cin)   per-(kh,kw) weight matrices, k = 2*kh + kw; resident
    # e_ref: (4, W, 4W)       scatter matrices; e_ref[k, w, kh*2W + 2w + kw] = 1
    # b_ref: (Cout, 1)        bias column, broadcasts over lanes
    # o_ref: (Cout, th, 4W)   final NCHW layout: lane c = kh*2W + 2w + kw
    th = o_ref.shape[1]
    bias = b_ref[...]
    for hh in range(th):  # static unroll; th is capped by the wrapper
        x_h = x_ref[:, hh, :]                                                # (Cin, W)
        row = None
        for k in range(4):                                                   # k = 2*kh + kw
            acc_k = jnp.dot(w_ref[k], x_h,
                            preferred_element_type=jnp.float32)             # (Cout, W)
            part = jnp.dot(acc_k, e_ref[k],
                           preferred_element_type=jnp.float32)              # (Cout, 4W)
            row = part if row is None else row + part
        # Every output lane gets exactly one non-zero contribution + bias.
        o_ref[:, hh, :] = jnp.tanh(row + bias).astype(o_ref.dtype)


def _pick_row_tile(H, N, bytes_per_row, *, max_block_bytes=8 << 20, max_unroll_rows=32):
    """Rows per grid step: must divide H and be a multiple of 8 (or equal H)."""
    cands = [d for d in range(8, min(H, max_unroll_rows) + 1, 8) if H % d == 0]
    if not cands:
        # Awkward / small H: a full-height block is always layout-legal.
        return H
    if N == 1 and len(cands) > 1:
        # Keep >= 2 grid programs so both v7x TensorCores get work.
        cands = [d for d in cands if d < H] or cands
    fitting = [d for d in cands if d * bytes_per_row <= max_block_bytes]
    return max(fitting) if fitting else min(cands)


def conv_transpose2d_tanh(x, weight, bias=None):
    """ConvTranspose2d(kernel_size=2, stride=2, padding=0) + Tanh.

    x: (N, Cin, H, W) NCHW; weight: (Cin, Cout, 2, 2) (PyTorch layout);
    bias: (Cout,) or None.  Returns (N, Cout, 2H, 2W) NCHW.
    """
    N, Cin, H, W = x.shape
    Cin_w, Cout, kH, kW = weight.shape
    assert Cin == Cin_w and kH == 2 and kW == 2
    L = 4 * W  # output lanes produced per input row

    # Weights regrouped as (k=2*kh+kw, Cout, Cin).
    w4 = jnp.transpose(weight, (2, 3, 1, 0)).reshape(4, Cout, Cin).astype(jnp.float32)

    # Scatter matrices E[k][w, kh*2W + 2w + kw] = 1 (0/1 constants, resident).
    w_idx = jnp.arange(W)
    c_idx = jnp.arange(L)
    e_list = []
    for kh in range(2):
        for kw in range(2):
            tgt = kh * 2 * W + 2 * w_idx + kw
            e_list.append((c_idx[None, :] == tgt[:, None]).astype(jnp.float32))
    e_mats = jnp.stack(e_list, axis=0)                                   # (4, W, 4W)

    if bias is None:
        b_col = jnp.zeros((Cout, 1), jnp.float32)
    else:
        b_col = bias.astype(jnp.float32).reshape(Cout, 1)

    # Row tile over H (double-buffered in+out bytes per row of the tile).
    bytes_per_row = 2 * (Cin * W + Cout * L) * 4
    th = _pick_row_tile(H, N, bytes_per_row)
    n_h = H // th

    blk_bytes = th * bytes_per_row
    resident_bytes = 2 * (4 * Cout * Cin + 4 * W * L + Cout) * 4
    vmem_limit = int(min(max(3 * (blk_bytes + resident_bytes), 16 << 20), 48 << 20))

    out_elems = N * Cout * H * L
    cost = pl.CostEstimate(
        flops=2 * N * H * W * 4 * Cout * Cin + 2 * N * H * 4 * Cout * W * L,
        transcendentals=out_elems,
        bytes_accessed=4 * (x.size + w4.size + e_mats.size + b_col.size + out_elems),
    )

    out4 = pl.pallas_call(
        _convT2x2_tanh_kernel,
        out_shape=jax.ShapeDtypeStruct((N, Cout, H, L), x.dtype),
        grid_spec=pltpu.PrefetchScalarGridSpec(
            num_scalar_prefetch=0,
            grid=(n_h, N),  # row-tile axis first (usually the larger one) for megacore
            in_specs=[
                pl.BlockSpec((None, Cin, th, W), lambda i, n: (n, 0, i, 0)),  # input rows
                pl.BlockSpec((4, Cout, Cin), lambda i, n: (0, 0, 0)),         # weights, resident
                pl.BlockSpec((4, W, L), lambda i, n: (0, 0, 0)),              # scatter mats, resident
                pl.BlockSpec((Cout, 1), lambda i, n: (0, 0)),                 # bias, resident
            ],
            out_specs=pl.BlockSpec((None, Cout, th, L), lambda i, n: (n, 0, i, 0)),
        ),
        compiler_params=pltpu.CompilerParams(
            dimension_semantics=("parallel", "parallel"),
            vmem_limit_bytes=vmem_limit,
        ),
        cost_estimate=cost,
    )(x, w4, e_mats, b_col)

    # (N, Cout, H, 4W) is byte-identical to (N, Cout, 2H, 2W) NCHW: free reshape.
    return out4.reshape(N, Cout, 2 * H, 2 * W)


def _reference(x, weight, bias):
    # Pure-JAX reference of ConvTranspose2d(k=2, s=2, p=0) + Tanh.
    N, Cin, H, W = x.shape
    Cout = weight.shape[1]
    y = jnp.einsum('nihw,iojk->nohjwk', x, weight)      # (N, Cout, H, 2, W, 2)
    y = y.reshape(N, Cout, 2 * H, 2 * W)
    if bias is not None:
        y = y + bias[None, :, None, None]
    return jnp.tanh(y)


if __name__ == "__main__":
    key = jax.random.PRNGKey(0)
    k_x, k_w, k_b = jax.random.split(key, 3)

    N, Cin, Cout, H, W = 2, 4, 8, 16, 16
    x = jax.random.normal(k_x, (N, Cin, H, W), dtype=jnp.float32)
    # Deterministic synthetic params (shapes match nn.ConvTranspose2d(Cin, Cout, 2, 2)).
    fan = Cin * 2 * 2
    weight = jax.random.normal(k_w, (Cin, Cout, 2, 2), dtype=jnp.float32) / jnp.sqrt(fan)
    bias = jax.random.normal(k_b, (Cout,), dtype=jnp.float32) * 0.1

    out = jax.block_until_ready(conv_transpose2d_tanh(x, weight, bias))
    ref = _reference(x, weight, bias)

    assert out.shape == (N, Cout, 2 * H, 2 * W), out.shape
    err = float(jnp.max(jnp.abs(out - ref)))
    assert jnp.allclose(out, ref, atol=1e-4, rtol=1e-4), err
    print("KERNEL_OK")
</pallas_src>

<mosaic_0001>
module attributes {stable_mosaic.version = 11 : i64} {
  func.func @_convT2x2_tanh_kernel(%arg0: i32, %arg1: i32, %arg2: memref<1x4x16x16xf32, #tpu.memory_space<vmem>>, %arg3: memref<4x8x4xf32, #tpu.memory_space<vmem>>, %arg4: memref<4x16x64xf32, #tpu.memory_space<vmem>>, %arg5: memref<8x1xf32, #tpu.memory_space<vmem>>, %arg6: memref<1x8x16x64xf32, #tpu.memory_space<vmem>>) attributes {dimension_semantics = [#tpu.dimension_semantics<parallel>, #tpu.dimension_semantics<parallel>], iteration_bounds = array<i64: 1, 2>, scalar_prefetch = 0 : i64, scratch_operands = 0 : i64, tpu.core_type = #tpu.core_type<tc>, window_params = [{transform_indices = @transform_0, window_bounds = array<i64: 1, 4, 16, 16>}, {pipeline_mode = #tpu.pipeline_mode<synchronous>, transform_indices = @transform_1, window_bounds = array<i64: 4, 8, 4>}, {pipeline_mode = #tpu.pipeline_mode<synchronous>, transform_indices = @transform_2, window_bounds = array<i64: 4, 16, 64>}, {pipeline_mode = #tpu.pipeline_mode<synchronous>, transform_indices = @transform_3, window_bounds = array<i64: 8, 1>}, {transform_indices = @transform_4, window_bounds = array<i64: 1, 8, 16, 64>}]} {
    %c0 = arith.constant 0 : index
    %c0_0 = arith.constant 0 : index
    %0 = vector.load %arg5[%c0, %c0_0] : memref<8x1xf32, #tpu.memory_space<vmem>>, vector<8x1xf32>
    %c0_1 = arith.constant 0 : index
    %c0_2 = arith.constant 0 : index
    %c0_3 = arith.constant 0 : index
    %c0_4 = arith.constant 0 : index
    %1 = vector.load %arg2[%c0_1, %c0_2, %c0_3, %c0_4] : memref<1x4x16x16xf32, #tpu.memory_space<vmem>>, vector<1x4x1x16xf32>
    %2 = vector.shape_cast %1 : vector<1x4x1x16xf32> to vector<4x16xf32>
    %c0_5 = arith.constant 0 : index
    %c0_6 = arith.constant 0 : index
    %c0_7 = arith.constant 0 : index
    %3 = vector.load %arg3[%c0_5, %c0_6, %c0_7] : memref<4x8x4xf32, #tpu.memory_space<vmem>>, vector<1x8x4xf32>
    %4 = vector.shape_cast %3 : vector<1x8x4xf32> to vector<8x4xf32>
    %cst = arith.constant dense<0.000000e+00> : vector<8x16xf32>
    %5 = tpu.matmul %4, %2, %cst {dimension_numbers = #tpu.dot_dimension_numbers<[1], [0], [0], [1], [0, 0, 1, 1], [], []>} : vector<8x4xf32>, vector<4x16xf32>, vector<8x16xf32> -> vector<8x16xf32>
    %c0_8 = arith.constant 0 : index
    %c0_9 = arith.constant 0 : index
    %c0_10 = arith.constant 0 : index
    %6 = vector.load %arg4[%c0_8, %c0_9, %c0_10] : memref<4x16x64xf32, #tpu.memory_space<vmem>>, vector<1x16x64xf32>
    %7 = vector.shape_cast %6 : vector<1x16x64xf32> to vector<16x64xf32>
    %cst_11 = arith.constant dense<0.000000e+00> : vector<8x64xf32>
    %8 = tpu.matmul %5, %7, %cst_11 {dimension_numbers = #tpu.dot_dimension_numbers<[1], [0], [0], [1], [0, 0, 1, 1], [], []>} : vector<8x16xf32>, vector<16x64xf32>, vector<8x64xf32> -> vector<8x64xf32>
    %c1 = arith.constant 1 : index
    %c0_12 = arith.constant 0 : index
    %c0_13 = arith.constant 0 : index
    %9 = vector.load %arg3[%c1, %c0_12, %c0_13] : memref<4x8x4xf32, #tpu.memory_space<vmem>>, vector<1x8x4xf32>
    %10 = vector.shape_cast %9 : vector<1x8x4xf32> to vector<8x4xf32>
    %cst_14 = arith.constant dense<0.000000e+00> : vector<8x16xf32>
    %11 = tpu.matmul %10, %2, %cst_14 {dimension_numbers = #tpu.dot_dimension_numbers<[1], [0], [0], [1], [0, 0, 1, 1], [], []>} : vector<8x4xf32>, vector<4x16xf32>, vector<8x16xf32> -> vector<8x16xf32>
    %c1_15 = arith.constant 1 : index
    %c0_16 = arith.constant 0 : index
    %c0_17 = arith.constant 0 : index
    %12 = vector.load %arg4[%c1_15, %c0_16, %c0_17] : memref<4x16x64xf32, #tpu.memory_space<vmem>>, vector<1x16x64xf32>
    %13 = vector.shape_cast %12 : vector<1x16x64xf32> to vector<16x64xf32>
    %cst_18 = arith.constant dense<0.000000e+00> : vector<8x64xf32>
    %14 = tpu.matmul %11, %13, %cst_18 {dimension_numbers = #tpu.dot_dimension_numbers<[1], [0], [0], [1], [0, 0, 1, 1], [], []>} : vector<8x16xf32>, vector<16x64xf32>, vector<8x64xf32> -> vector<8x64xf32>
    %15 = arith.addf %8, %14 : vector<8x64xf32>
    %c2 = arith.constant 2 : index
    %c0_19 = arith.constant 0 : index
    %c0_20 = arith.constant 0 : index
    %16 = vector.load %arg3[%c2, %c0_19, %c0_20] : memref<4x8x4xf32, #tpu.memory_space<vmem>>, vector<1x8x4xf32>
    %17 = vector.shape_cast %16 : vector<1x8x4xf32> to vector<8x4xf32>
    %cst_21 = arith.constant dense<0.000000e+00> : vector<8x16xf32>
    %18 = tpu.matmul %17, %2, %cst_21 {dimension_numbers = #tpu.dot_dimension_numbers<[1], [0], [0], [1], [0, 0, 1, 1], [], []>} : vector<8x4xf32>, vector<4x16xf32>, vector<8x16xf32> -> vector<8x16xf32>
    %c2_22 = arith.constant 2 : index
    %c0_23 = arith.constant 0 : index
    %c0_24 = arith.constant 0 : index
    %19 = vector.load %arg4[%c2_22, %c0_23, %c0_24] : memref<4x16x64xf32, #tpu.memory_space<vmem>>, vector<1x16x64xf32>
    %20 = vector.shape_cast %19 : vector<1x16x64xf32> to vector<16x64xf32>
    %cst_25 = arith.constant dense<0.000000e+00> : vector<8x64xf32>
    %21 = tpu.matmul %18, %20, %cst_25 {dimension_numbers = #tpu.dot_dimension_numbers<[1], [0], [0], [1], [0, 0, 1, 1], [], []>} : vector<8x16xf32>, vector<16x64xf32>, vector<8x64xf32> -> vector<8x64xf32>
    %22 = arith.addf %15, %21 : vector<8x64xf32>
    %c3 = arith.constant 3 : index
    %c0_26 = arith.constant 0 : index
    %c0_27 = arith.constant 0 : index
    %23 = vector.load %arg3[%c3, %c0_26, %c0_27] : memref<4x8x4xf32, #tpu.memory_space<vmem>>, vector<1x8x4xf32>
    %24 = vector.shape_cast %23 : vector<1x8x4xf32> to vector<8x4xf32>
    %cst_28 = arith.constant dense<0.000000e+00> : vector<8x16xf32>
    %25 = tpu.matmul %24, %2, %cst_28 {dimension_numbers = #tpu.dot_dimension_numbers<[1], [0], [0], [1], [0, 0, 1, 1], [], []>} : vector<8x4xf32>, vector<4x16xf32>, vector<8x16xf32> -> vector<8x16xf32>
    %c3_29 = arith.constant 3 : index
    %c0_30 = arith.constant 0 : index
    %c0_31 = arith.constant 0 : index
    %26 = vector.load %arg4[%c3_29, %c0_30, %c0_31] : memref<4x16x64xf32, #tpu.memory_space<vmem>>, vector<1x16x64xf32>
    %27 = vector.shape_cast %26 : vector<1x16x64xf32> to vector<16x64xf32>
    %cst_32 = arith.constant dense<0.000000e+00> : vector<8x64xf32>
    %28 = tpu.matmul %25, %27, %cst_32 {dimension_numbers = #tpu.dot_dimension_numbers<[1], [0], [0], [1], [0, 0, 1, 1], [], []>} : vector<8x16xf32>, vector<16x64xf32>, vector<8x64xf32> -> vector<8x64xf32>
    %29 = arith.addf %22, %28 : vector<8x64xf32>
    %30 = vector.broadcast %0 : vector<8x1xf32> to vector<8x64xf32>
    %31 = arith.addf %29, %30 : vector<8x64xf32>
    %32 = math.tanh %31 : vector<8x64xf32>
    %c0_33 = arith.constant 0 : index
    %c0_34 = arith.constant 0 : index
    %c0_35 = arith.constant 0 : index
    %c0_36 = arith.constant 0 : index
    %33 = vector.load %arg6[%c0_33, %c0_34, %c0_35, %c0_36] : memref<1x8x16x64xf32, #tpu.memory_space<vmem>>, vector<1x8x1x64xf32>
    %34 = vector.shape_cast %33 : vector<1x8x1x64xf32> to vector<8x64xf32>
    %35 = vector.shape_cast %32 : vector<8x64xf32> to vector<1x8x1x64xf32>
    tpu.vector_store %arg6[%c0_33, %c0_34, %c0_35, %c0_36], %35 {strides = array<i32>} : memref<1x8x16x64xf32, #tpu.memory_space<vmem>>, vector<1x8x1x64xf32>,
    %c0_37 = arith.constant 0 : index
    %c0_38 = arith.constant 0 : index
    %c1_39 = arith.constant 1 : index
    %c0_40 = arith.constant 0 : index
    %36 = vector.load %arg2[%c0_37, %c0_38, %c1_39, %c0_40] : memref<1x4x16x16xf32, #tpu.memory_space<vmem>>, vector<1x4x1x16xf32>
    %37 = vector.shape_cast %36 : vector<1x4x1x16xf32> to vector<4x16xf32>
    %c0_41 = arith.constant 0 : index
    %c0_42 = arith.constant 0 : index
    %c0_43 = arith.constant 0 : index
    %38 = vector.load %arg3[%c0_41, %c0_42, %c0_43] : memref<4x8x4xf32, #tpu.memory_space<vmem>>, vector<1x8x4xf32>
    %39 = vector.shape_cast %38 : vector<1x8x4xf32> to vector<8x4xf32>
    %cst_44 = arith.constant dense<0.000000e+00> : vector<8x16xf32>
    %40 = tpu.matmul %39, %37, %cst_44 {dimension_numbers = #tpu.dot_dimension_numbers<[1], [0], [0], [1], [0, 0, 1, 1], [], []>} : vector<8x4xf32>, vector<4x16xf32>, vector<8x16xf32> -> vector<8x16xf32>
    %c0_45 = arith.constant 0 : index
    %c0_46 = arith.constant 0 : index
    %c0_47 = arith.constant 0 : index
    %41 = vector.load %arg4[%c0_45, %c0_46, %c0_47] : memref<4x16x64xf32, #tpu.memory_space<vmem>>, vector<1x16x64xf32>
    %42 = vector.shape_cast %41 : vector<1x16x64xf32> to vector<16x64xf32>
    %cst_48 = arith.constant dense<0.000000e+00> : vector<8x64xf32>
    %43 = tpu.matmul %40, %42, %cst_48 {dimension_numbers = #tpu.dot_dimension_numbers<[1], [0], [0], [1], [0, 0, 1, 1], [], []>} : vector<8x16xf32>, vector<16x64xf32>, vector<8x64xf32> -> vector<8x64xf32>
    %c1_49 = arith.constant 1 : index
    %c0_50 = arith.constant 0 : index
    %c0_51 = arith.constant 0 : index
    %44 = vector.load %arg3[%c1_49, %c0_50, %c0_51] : memref<4x8x4xf32, #tpu.memory_space<vmem>>, vector<1x8x4xf32>
    %45 = vector.shape_cast %44 : vector<1x8x4xf32> to vector<8x4xf32>
    %cst_52 = arith.constant dense<0.000000e+00> : vector<8x16xf32>
    %46 = tpu.matmul %45, %37, %cst_52 {dimension_numbers = #tpu.dot_dimension_numbers<[1], [0], [0], [1], [0, 0, 1, 1], [], []>} : vector<8x4xf32>, vector<4x16xf32>, vector<8x16xf32> -> vector<8x16xf32>
    %c1_53 = arith.constant 1 : index
    %c0_54 = arith.constant 0 : index
    %c0_55 = arith.constant 0 : index
    %47 = vector.load %arg4[%c1_53, %c0_54, %c0_55] : memref<4x16x64xf32, #tpu.memory_space<vmem>>, vector<1x16x64xf32>
    %48 = vector.shape_cast %47 : vector<1x16x64xf32> to vector<16x64xf32>
    %cst_56 = arith.constant dense<0.000000e+00> : vector<8x64xf32>
    %49 = tpu.matmul %46, %48, %cst_56 {dimension_numbers = #tpu.dot_dimension_numbers<[1], [0], [0], [1], [0, 0, 1, 1], [], []>} : vector<8x16xf32>, vector<16x64xf32>, vector<8x64xf32> -> vector<8x64xf32>
    %50 = arith.addf %43, %49 : vector<8x64xf32>
    %c2_57 = arith.constant 2 : index
    %c0_58 = arith.constant 0 : index
    %c0_59 = arith.constant 0 : index
    %51 = vector.load %arg3[%c2_57, %c0_58, %c0_59] : memref<4x8x4xf32, #tpu.memory_space<vmem>>, vector<1x8x4xf32>
    %52 = vector.shape_cast %51 : vector<1x8x4xf32> to vector<8x4xf32>
    %cst_60 = arith.constant dense<0.000000e+00> : vector<8x16xf32>
    %53 = tpu.matmul %52, %37, %cst_60 {dimension_numbers = #tpu.dot_dimension_numbers<[1], [0], [0], [1], [0, 0, 1, 1], [], []>} : vector<8x4xf32>, vector<4x16xf32>, vector<8x16xf32> -> vector<8x16xf32>
    %c2_61 = arith.constant 2 : index
    %c0_62 = arith.constant 0 : index
    %c0_63 = arith.constant 0 : index
    %54 = vector.load %arg4[%c2_61, %c0_62, %c0_63] : memref<4x16x64xf32, #tpu.memory_space<vmem>>, vector<1x16x64xf32>
    %55 = vector.shape_cast %54 : vector<1x16x64xf32> to vector<16x64xf32>
    %cst_64 = arith.constant dense<0.000000e+00> : vector<8x64xf32>
    %56 = tpu.matmul %53, %55, %cst_64 {dimension_numbers = #tpu.dot_dimension_numbers<[1], [0], [0], [1], [0, 0, 1, 1], [], []>} : vector<8x16xf32>, vector<16x64xf32>, vector<8x64xf32> -> vector<8x64xf32>
    %57 = arith.addf %50, %56 : vector<8x64xf32>
    %c3_65 = arith.constant 3 : index
    %c0_66 = arith.constant 0 : index
    %c0_67 = arith.constant 0 : index
    %58 = vector.load %arg3[%c3_65, %c0_66, %c0_67] : memref<4x8x4xf32, #tpu.memory_space<vmem>>, vector<1x8x4xf32>
    %59 = vector.shape_cast %58 : vector<1x8x4xf32> to vector<8x4xf32>
    %cst_68 = arith.constant dense<0.000000e+00> : vector<8x16xf32>
    %60 = tpu.matmul %59, %37, %cst_68 {dimension_numbers = #tpu.dot_dimension_numbers<[1], [0], [0], [1], [0, 0, 1, 1], [], []>} : vector<8x4xf32>, vector<4x16xf32>, vector<8x16xf32> -> vector<8x16xf32>
    %c3_69 = arith.constant 3 : index
    %c0_70 = arith.constant 0 : index
    %c0_71 = arith.constant 0 : index
    %61 = vector.load %arg4[%c3_69, %c0_70, %c0_71] : memref<4x16x64xf32, #tpu.memory_space<vmem>>, vector<1x16x64xf32>
    %62 = vector.shape_cast %61 : vector<1x16x64xf32> to vector<16x64xf32>
    %cst_72 = arith.constant dense<0.000000e+00> : vector<8x64xf32>
    %63 = tpu.matmul %60, %62, %cst_72 {dimension_numbers = #tpu.dot_dimension_numbers<[1], [0], [0], [1], [0, 0, 1, 1], [], []>} : vector<8x16xf32>, vector<16x64xf32>, vector<8x64xf32> -> vector<8x64xf32>
    %64 = arith.addf %57, %63 : vector<8x64xf32>
    %65 = vector.broadcast %0 : vector<8x1xf32> to vector<8x64xf32>
    %66 = arith.addf %64, %65 : vector<8x64xf32>
    %67 = math.tanh %66 : vector<8x64xf32>
    %c0_73 = arith.constant 0 : index
    %c0_74 = arith.constant 0 : index
    %c1_75 = arith.constant 1 : index
    %c0_76 = arith.constant 0 : index
    %68 = vector.load %arg6[%c0_73, %c0_74, %c1_75, %c0_76] : memref<1x8x16x64xf32, #tpu.memory_space<vmem>>, vector<1x8x1x64xf32>
    %69 = vector.shape_cast %68 : vector<1x8x1x64xf32> to vector<8x64xf32>
    %70 = vector.shape_cast %67 : vector<8x64xf32> to vector<1x8x1x64xf32>
    tpu.vector_store %arg6[%c0_73, %c0_74, %c1_75, %c0_76], %70 {strides = array<i32>} : memref<1x8x16x64xf32, #tpu.memory_space<vmem>>, vector<1x8x1x64xf32>,
    %c0_77 = arith.constant 0 : index
    %c0_78 = arith.constant 0 : index
    %c2_79 = arith.constant 2 : index
    %c0_80 = arith.constant 0 : index
    %71 = vector.load %arg2[%c0_77, %c0_78, %c2_79, %c0_80] : memref<1x4x16x16xf32, #tpu.memory_space<vmem>>, vector<1x4x1x16xf32>
    %72 = vector.shape_cast %71 : vector<1x4x1x16xf32> to vector<4x16xf32>
    %c0_81 = arith.constant 0 : index
    %c0_82 = arith.constant 0 : index
    %c0_83 = arith.constant 0 : index
    %73 = vector.load %arg3[%c0_81, %c0_82, %c0_83] : memref<4x8x4xf32, #tpu.memory_space<vmem>>, vector<1x8x4xf32>
    %74 = vector.shape_cast %73 : vector<1x8x4xf32> to vector<8x4xf32>
    %cst_84 = arith.constant dense<0.000000e+00> : vector<8x16xf32>
    %75 = tpu.matmul %74, %72, %cst_84 {dimension_numbers = #tpu.dot_dimension_numbers<[1], [0], [0], [1], [0, 0, 1, 1], [], []>} : vector<8x4xf32>, vector<4x16xf32>, vector<8x16xf32> -> vector<8x16xf32>
    %c0_85 = arith.constant 0 : index
    %c0_86 = arith.constant 0 : index
    %c0_87 = arith.constant 0 : index
    %76 = vector.load %arg4[%c0_85, %c0_86, %c0_87] : memref<4x16x64xf32, #tpu.memory_space<vmem>>, vector<1x16x64xf32>
    %77 = vector.shape_cast %76 : vector<1x16x64xf32> to vector<16x64xf32>
    %cst_88 = arith.constant dense<0.000000e+00> : vector<8x64xf32>
    %78 = tpu.matmul %75, %77, %cst_88 {dimension_numbers = #tpu.dot_dimension_numbers<[1], [0], [0], [1], [0, 0, 1, 1], [], []>} : vector<8x16xf32>, vector<16x64xf32>, vector<8x64xf32> -> vector<8x64xf32>
    %c1_89 = arith.constant 1 : index
    %c0_90 = arith.constant 0 : index
    %c0_91 = arith.constant 0 : index
    %79 = vector.load %arg3[%c1_89, %c0_90, %c0_91] : memref<4x8x4xf32, #tpu.memory_space<vmem>>, vector<1x8x4xf32>
    %80 = vector.shape_cast %79 : vector<1x8x4xf32> to vector<8x4xf32>
    %cst_92 = arith.constant dense<0.000000e+00> : vector<8x16xf32>
    %81 = tpu.matmul %80, %72, %cst_92 {dimension_numbers = #tpu.dot_dimension_numbers<[1], [0], [0], [1], [0, 0, 1, 1], [], []>} : vector<8x4xf32>, vector<4x16xf32>, vector<8x16xf32> -> vector<8x16xf32>
    %c1_93 = arith.constant 1 : index
    %c0_94 = arith.constant 0 : index
    %c0_95 = arith.constant 0 : index
    %82 = vector.load %arg4[%c1_93, %c0_94, %c0_95] : memref<4x16x64xf32, #tpu.memory_space<vmem>>, vector<1x16x64xf32>
    %83 = vector.shape_cast %82 : vector<1x16x64xf32> to vector<16x64xf32>
    %cst_96 = arith.constant dense<0.000000e+00> : vector<8x64xf32>
    %84 = tpu.matmul %81, %83, %cst_96 {dimension_numbers = #tpu.dot_dimension_numbers<[1], [0], [0], [1], [0, 0, 1, 1], [], []>} : vector<8x16xf32>, vector<16x64xf32>, vector<8x64xf32> -> vector<8x64xf32>
    %85 = arith.addf %78, %84 : vector<8x64xf32>
    %c2_97 = arith.constant 2 : index
    %c0_98 = arith.constant 0 : index
    %c0_99 = arith.constant 0 : index
    %86 = vector.load %arg3[%c2_97, %c0_98, %c0_99] : memref<4x8x4xf32, #tpu.memory_space<vmem>>, vector<1x8x4xf32>
    %87 = vector.shape_cast %86 : vector<1x8x4xf32> to vector<8x4xf32>
    %cst_100 = arith.constant dense<0.000000e+00> : vector<8x16xf32>
    %88 = tpu.matmul %87, %72, %cst_100 {dimension_numbers = #tpu.dot_dimension_numbers<[1], [0], [0], [1], [0, 0, 1, 1], [], []>} : vector<8x4xf32>, vector<4x16xf32>, vector<8x16xf32> -> vector<8x16xf32>
    %c2_101 = arith.constant 2 : index
    %c0_102 = arith.constant 0 : index
    %c0_103 = arith.constant 0 : index
    %89 = vector.load %arg4[%c2_101, %c0_102, %c0_103] : memref<4x16x64xf32, #tpu.memory_space<vmem>>, vector<1x16x64xf32>
    %90 = vector.shape_cast %89 : vector<1x16x64xf32> to vector<16x64xf32>
    %cst_104 = arith.constant dense<0.000000e+00> : vector<8x64xf32>
    %91 = tpu.matmul %88, %90, %cst_104 {dimension_numbers = #tpu.dot_dimension_numbers<[1], [0], [0], [1], [0, 0, 1, 1], [], []>} : vector<8x16xf32>, vector<16x64xf32>, vector<8x64xf32> -> vector<8x64xf32>
    %92 = arith.addf %85, %91 : vector<8x64xf32>
    %c3_105 = arith.constant 3 : index
    %c0_106 = arith.constant 0 : index
    %c0_107 = arith.constant 0 : index
    %93 = vector.load %arg3[%c3_105, %c0_106, %c0_107] : memref<4x8x4xf32, #tpu.memory_space<vmem>>, vector<1x8x4xf32>
    %94 = vector.shape_cast %93 : vector<1x8x4xf32> to vector<8x4xf32>
    %cst_108 = arith.constant dense<0.000000e+00> : vector<8x16xf32>
    %95 = tpu.matmul %94, %72, %cst_108 {dimension_numbers = #tpu.dot_dimension_numbers<[1], [0], [0], [1], [0, 0, 1, 1], [], []>} : vector<8x4xf32>, vector<4x16xf32>, vector<8x16xf32> -> vector<8x16xf32>
    %c3_109 = arith.constant 3 : index
    %c0_110 = arith.constant 0 : index
    %c0_111 = arith.constant 0 : index
    %96 = vector.load %arg4[%c3_109, %c0_110, %c0_111] : memref<4x16x64xf32, #tpu.memory_space<vmem>>, vector<1x16x64xf32>
    %97 = vector.shape_cast %96 : vector<1x16x64xf32> to vector<16x64xf32>
    %cst_112 = arith.constant dense<0.000000e+00> : vector<8x64xf32>
    %98 = tpu.matmul %95, %97, %cst_112 {dimension_numbers = #tpu.dot_dimension_numbers<[1], [0], [0], [1], [0, 0, 1, 1], [], []>} : vector<8x16xf32>, vector<16x64xf32>, vector<8x64xf32> -> vector<8x64xf32>
    %99 = arith.addf %92, %98 : vector<8x64xf32>
    %100 = vector.broadcast %0 : vector<8x1xf32> to vector<8x64xf32>
    %101 = arith.addf %99, %100 : vector<8x64xf32>
    %102 = math.tanh %101 : vector<8x64xf32>
    %c0_113 = arith.constant 0 : index
    %c0_114 = arith.constant 0 : index
    %c2_115 = arith.constant 2 : index
    %c0_116 = arith.constant 0 : index
    %103 = vector.load %arg6[%c0_113, %c0_114, %c2_115, %c0_116] : memref<1x8x16x64xf32, #tpu.memory_space<vmem>>, vector<1x8x1x64xf32>
    %104 = vector.shape_cast %103 : vector<1x8x1x64xf32> to vector<8x64xf32>
    %105 = vector.shape_cast %102 : vector<8x64xf32> to vector<1x8x1x64xf32>
    tpu.vector_store %arg6[%c0_113, %c0_114, %c2_115, %c0_116], %105 {strides = array<i32>} : memref<1x8x16x64xf32, #tpu.memory_space<vmem>>, vector<1x8x1x64xf32>,
    %c0_117 = arith.constant 0 : index
    %c0_118 = arith.constant 0 : index
    %c3_119 = arith.constant 3 : index
    %c0_120 = arith.constant 0 : index
    %106 = vector.load %arg2[%c0_117, %c0_118, %c3_119, %c0_120] : memref<1x4x16x16xf32, #tpu.memory_space<vmem>>, vector<1x4x1x16xf32>
    %107 = vector.shape_cast %106 : vector<1x4x1x16xf32> to vector<4x16xf32>
    %c0_121 = arith.constant 0 : index
    %c0_122 = arith.constant 0 : index
    %c0_123 = arith.constant 0 : index
    %108 = vector.load %arg3[%c0_121, %c0_122, %c0_123] : memref<4x8x4xf32, #tpu.memory_space<vmem>>, vector<1x8x4xf32>
    %109 = vector.shape_cast %108 : vector<1x8x4xf32> to vector<8x4xf32>
    %cst_124 = arith.constant dense<0.000000e+00> : vector<8x16xf32>
    %110 = tpu.matmul %109, %107, %cst_124 {dimension_numbers = #tpu.dot_dimension_numbers<[1], [0], [0], [1], [0, 0, 1, 1], [], []>} : vector<8x4xf32>, vector<4x16xf32>, vector<8x16xf32> -> vector<8x16xf32>
    %c0_125 = arith.constant 0 : index
    %c0_126 = arith.constant 0 : index
    %c0_127 = arith.constant 0 : index
    %111 = vector.load %arg4[%c0_125, %c0_126, %c0_127] : memref<4x16x64xf32, #tpu.memory_space<vmem>>, vector<1x16x64xf32>
    %112 = vector.shape_cast %111 : vector<1x16x64xf32> to vector<16x64xf32>
    %cst_128 = arith.constant dense<0.000000e+00> : vector<8x64xf32>
    %113 = tpu.matmul %110, %112, %cst_128 {dimension_numbers = #tpu.dot_dimension_numbers<[1], [0], [0], [1], [0, 0, 1, 1], [], []>} : vector<8x16xf32>, vector<16x64xf32>, vector<8x64xf32> -> vector<8x64xf32>
    %c1_129 = arith.constant 1 : index
    %c0_130 = arith.constant 0 : index
    %c0_131 = arith.constant 0 : index
    %114 = vector.load %arg3[%c1_129, %c0_130, %c0_131] : memref<4x8x4xf32, #tpu.memory_space<vmem>>, vector<1x8x4xf32>
    %115 = vector.shape_cast %114 : vector<1x8x4xf32> to vector<8x4xf32>
    %cst_132 = arith.constant dense<0.000000e+00> : vector<8x16xf32>
    %116 = tpu.matmul %115, %107, %cst_132 {dimension_numbers = #tpu.dot_dimension_numbers<[1], [0], [0], [1], [0, 0, 1, 1], [], []>} : vector<8x4xf32>, vector<4x16xf32>, vector<8x16xf32> -> vector<8x16xf32>
    %c1_133 = arith.constant 1 : index
    %c0_134 = arith.constant 0 : index
    %c0_135 = arith.constant 0 : index
    %117 = vector.load %arg4[%c1_133, %c0_134, %c0_135] : memref<4x16x64xf32, #tpu.memory_space<vmem>>, vector<1x16x64xf32>
    %118 = vector.shape_cast %117 : vector<1x16x64xf32> to vector<16x64xf32>
    %cst_136 = arith.constant dense<0.000000e+00> : vector<8x64xf32>
    %119 = tpu.matmul %116, %118, %cst_136 {dimension_numbers = #tpu.dot_dimension_numbers<[1], [0], [0], [1], [0, 0, 1, 1], [], []>} : vector<8x16xf32>, vector<16x64xf32>, vector<8x64xf32> -> vector<8x64xf32>
    %120 = arith.addf %113, %119 : vector<8x64xf32>
    %c2_137 = arith.constant 2 : index
    %c0_138 = arith.constant 0 : index
    %c0_139 = arith.constant 0 : index
    %121 = vector.load %arg3[%c2_137, %c0_138, %c0_139] : memref<4x8x4xf32, #tpu.memory_space<vmem>>, vector<1x8x4xf32>
    %122 = vector.shape_cast %121 : vector<1x8x4xf32> to vector<8x4xf32>
    %cst_140 = arith.constant dense<0.000000e+00> : vector<8x16xf32>
    %123 = tpu.matmul %122, %107, %cst_140 {dimension_numbers = #tpu.dot_dimension_numbers<[1], [0], [0], [1], [0, 0, 1, 1], [], []>} : vector<8x4xf32>, vector<4x16xf32>, vector<8x16xf32> -> vector<8x16xf32>
    %c2_141 = arith.constant 2 : index
    %c0_142 = arith.constant 0 : index
    %c0_143 = arith.constant 0 : index
    %124 = vector.load %arg4[%c2_141, %c0_142, %c0_143] : memref<4x16x64xf32, #tpu.memory_space<vmem>>, vector<1x16x64xf32>
    %125 = vector.shape_cast %124 : vector<1x16x64xf32> to vector<16x64xf32>
    %cst_144 = arith.constant dense<0.000000e+00> : vector<8x64xf32>
    %126 = tpu.matmul %123, %125, %cst_144 {dimension_numbers = #tpu.dot_dimension_numbers<[1], [0], [0], [1], [0, 0, 1, 1], [], []>} : vector<8x16xf32>, vector<16x64xf32>, vector<8x64xf32> -> vector<8x64xf32>
    %127 = arith.addf %120, %126 : vector<8x64xf32>
    %c3_145 = arith.constant 3 : index
    %c0_146 = arith.constant 0 : index
    %c0_147 = arith.constant 0 : index
    %128 = vector.load %arg3[%c3_145, %c0_146, %c0_147] : memref<4x8x4xf32, #tpu.memory_space<vmem>>, vector<1x8x4xf32>
    %129 = vector.shape_cast %128 : vector<1x8x4xf32> to vector<8x4xf32>
    %cst_148 = arith.constant dense<0.000000e+00> : vector<8x16xf32>
    %130 = tpu.matmul %129, %107, %cst_148 {dimension_numbers = #tpu.dot_dimension_numbers<[1], [0], [0], [1], [0, 0, 1, 1], [], []>} : vector<8x4xf32>, vector<4x16xf32>, vector<8x16xf32> -> vector<8x16xf32>
    %c3_149 = arith.constant 3 : index
    %c0_150 = arith.constant 0 : index
    %c0_151 = arith.constant 0 : index
    %131 = vector.load %arg4[%c3_149, %c0_150, %c0_151] : memref<4x16x64xf32, #tpu.memory_space<vmem>>, vector<1x16x64xf32>
    %132 = vector.shape_cast %131 : vector<1x16x64xf32> to vector<16x64xf32>
    %cst_152 = arith.constant dense<0.000000e+00> : vector<8x64xf32>
    %133 = tpu.matmul %130, %132, %cst_152 {dimension_numbers = #tpu.dot_dimension_numbers<[1], [0], [0], [1], [0, 0, 1, 1], [], []>} : vector<8x16xf32>, vector<16x64xf32>, vector<8x64xf32> -> vector<8x64xf32>
    %134 = arith.addf %127, %133 : vector<8x64xf32>
    %135 = vector.broadcast %0 : vector<8x1xf32> to vector<8x64xf32>
    %136 = arith.addf %134, %135 : vector<8x64xf32>
    %137 = math.tanh %136 : vector<8x64xf32>
    %c0_153 = arith.constant 0 : index
    %c0_154 = arith.constant 0 : index
    %c3_155 = arith.constant 3 : index
    %c0_156 = arith.constant 0 : index
    %138 = vector.load %arg6[%c0_153, %c0_154, %c3_155, %c0_156] : memref<1x8x16x64xf32, #tpu.memory_space<vmem>>, vector<1x8x1x64xf32>
    %139 = vector.shape_cast %138 : vector<1x8x1x64xf32> to vector<8x64xf32>
    %140 = vector.shape_cast %137 : vector<8x64xf32> to vector<1x8x1x64xf32>
    tpu.vector_store %arg6[%c0_153, %c0_154, %c3_155, %c0_156], %140 {strides = array<i32>} : memref<1x8x16x64xf32, #tpu.memory_space<vmem>>, vector<1x8x1x64xf32>,
    %c0_157 = arith.constant 0 : index
    %c0_158 = arith.constant 0 : index
    %c4 = arith.constant 4 : index
    %c0_159 = arith.constant 0 : index
    %141 = vector.load %arg2[%c0_157, %c0_158, %c4, %c0_159] : memref<1x4x16x16xf32, #tpu.memory_space<vmem>>, vector<1x4x1x16xf32>
    %142 = vector.shape_cast %141 : vector<1x4x1x16xf32> to vector<4x16xf32>
    %c0_160 = arith.constant 0 : index
    %c0_161 = arith.constant 0 : index
    %c0_162 = arith.constant 0 : index
    %143 = vector.load %arg3[%c0_160, %c0_161, %c0_162] : memref<4x8x4xf32, #tpu.memory_space<vmem>>, vector<1x8x4xf32>
    %144 = vector.shape_cast %143 : vector<1x8x4xf32> to vector<8x4xf32>
    %cst_163 = arith.constant dense<0.000000e+00> : vector<8x16xf32>
    %145 = tpu.matmul %144, %142, %cst_163 {dimension_numbers = #tpu.dot_dimension_numbers<[1], [0], [0], [1], [0, 0, 1, 1], [], []>} : vector<8x4xf32>, vector<4x16xf32>, vector<8x16xf32> -> vector<8x16xf32>
    %c0_164 = arith.constant 0 : index
    %c0_165 = arith.constant 0 : index
    %c0_166 = arith.constant 0 : index
    %146 = vector.load %arg4[%c0_164, %c0_165, %c0_166] : memref<4x16x64xf32, #tpu.memory_space<vmem>>, vector<1x16x64xf32>
    %147 = vector.shape_cast %146 : vector<1x16x64xf32> to vector<16x64xf32>
    %cst_167 = arith.constant dense<0.000000e+00> : vector<8x64xf32>
    %148 = tpu.matmul %145, %147, %cst_167 {dimension_numbers = #tpu.dot_dimension_numbers<[1], [0], [0], [1], [0, 0, 1, 1], [], []>} : vector<8x16xf32>, vector<16x64xf32>, vector<8x64xf32> -> vector<8x64xf32>
    %c1_168 = arith.constant 1 : index
    %c0_169 = arith.constant 0 : index
    %c0_170 = arith.constant 0 : index
    %149 = vector.load %arg3[%c1_168, %c0_169, %c0_170] : memref<4x8x4xf32, #tpu.memory_space<vmem>>, vector<1x8x4xf32>
    %150 = vector.shape_cast %149 : vector<1x8x4xf32> to vector<8x4xf32>
    %cst_171 = arith.constant dense<0.000000e+00> : vector<8x16xf32>
    %151 = tpu.matmul %150, %142, %cst_171 {dimension_numbers = #tpu.dot_dimension_numbers<[1], [0], [0], [1], [0, 0, 1, 1], [], []>} : vector<8x4xf32>, vector<4x16xf32>, vector<8x16xf32> -> vector<8x16xf32>
    %c1_172 = arith.constant 1 : index
    %c0_173 = arith.constant 0 : index
    %c0_174 = arith.constant 0 : index
    %152 = vector.load %arg4[%c1_172, %c0_173, %c0_174] : memref<4x16x64xf32, #tpu.memory_space<vmem>>, vector<1x16x64xf32>
    %153 = vector.shape_cast %152 : vector<1x16x64xf32> to vector<16x64xf32>
    %cst_175 = arith.constant dense<0.000000e+00> : vector<8x64xf32>
    %154 = tpu.matmul %151, %153, %cst_175 {dimension_numbers = #tpu.dot_dimension_numbers<[1], [0], [0], [1], [0, 0, 1, 1], [], []>} : vector<8x16xf32>, vector<16x64xf32>, vector<8x64xf32> -> vector<8x64xf32>
    %155 = arith.addf %148, %154 : vector<8x64xf32>
    %c2_176 = arith.constant 2 : index
    %c0_177 = arith.constant 0 : index
    %c0_178 = arith.constant 0 : index
    %156 = vector.load %arg3[%c2_176, %c0_177, %c0_178] : memref<4x8x4xf32, #tpu.memory_space<vmem>>, vector<1x8x4xf32>
    %157 = vector.shape_cast %156 : vector<1x8x4xf32> to vector<8x4xf32>
    %cst_179 = arith.constant dense<0.000000e+00> : vector<8x16xf32>
    %158 = tpu.matmul %157, %142, %cst_179 {dimension_numbers = #tpu.dot_dimension_numbers<[1], [0], [0], [1], [0, 0, 1, 1], [], []>} : vector<8x4xf32>, vector<4x16xf32>, vector<8x16xf32> -> vector<8x16xf32>
    %c2_180 = arith.constant 2 : index
    %c0_181 = arith.constant 0 : index
    %c0_182 = arith.constant 0 : index
    %159 = vector.load %arg4[%c2_180, %c0_181, %c0_182] : memref<4x16x64xf32, #tpu.memory_space<vmem>>, vector<1x16x64xf32>
    %160 = vector.shape_cast %159 : vector<1x16x64xf32> to vector<16x64xf32>
    %cst_183 = arith.constant dense<0.000000e+00> : vector<8x64xf32>
    %161 = tpu.matmul %158, %160, %cst_183 {dimension_numbers = #tpu.dot_dimension_numbers<[1], [0], [0], [1], [0, 0, 1, 1], [], []>} : vector<8x16xf32>, vector<16x64xf32>, vector<8x64xf32> -> vector<8x64xf32>
    %162 = arith.addf %155, %161 : vector<8x64xf32>
    %c3_184 = arith.constant 3 : index
    %c0_185 = arith.constant 0 : index
    %c0_186 = arith.constant 0 : index
    %163 = vector.load %arg3[%c3_184, %c0_185, %c0_186] : memref<4x8x4xf32, #tpu.memory_space<vmem>>, vector<1x8x4xf32>
    %164 = vector.shape_cast %163 : vector<1x8x4xf32> to vector<8x4xf32>
    %cst_187 = arith.constant dense<0.000000e+00> : vector<8x16xf32>
    %165 = tpu.matmul %164, %142, %cst_187 {dimension_numbers = #tpu.dot_dimension_numbers<[1], [0], [0], [1], [0, 0, 1, 1], [], []>} : vector<8x4xf32>, vector<4x16xf32>, vector<8x16xf32> -> vector<8x16xf32>
    %c3_188 = arith.constant 3 : index
    %c0_189 = arith.constant 0 : index
    %c0_190 = arith.constant 0 : index
    %166 = vector.load %arg4[%c3_188, %c0_189, %c0_190] : memref<4x16x64xf32, #tpu.memory_space<vmem>>, vector<1x16x64xf32>
    %167 = vector.shape_cast %166 : vector<1x16x64xf32> to vector<16x64xf32>
    %cst_191 = arith.constant dense<0.000000e+00> : vector<8x64xf32>
    %168 = tpu.matmul %165, %167, %cst_191 {dimension_numbers = #tpu.dot_dimension_numbers<[1], [0], [0], [1], [0, 0, 1, 1], [], []>} : vector<8x16xf32>, vector<16x64xf32>, vector<8x64xf32> -> vector<8x64xf32>
    %169 = arith.addf %162, %168 : vector<8x64xf32>
    %170 = vector.broadcast %0 : vector<8x1xf32> to vector<8x64xf32>
    %171 = arith.addf %169, %170 : vector<8x64xf32>
    %172 = math.tanh %171 : vector<8x64xf32>
    %c0_192 = arith.constant 0 : index
    %c0_193 = arith.constant 0 : index
    %c4_194 = arith.constant 4 : index
    %c0_195 = arith.constant 0 : index
    %173 = vector.load %arg6[%c0_192, %c0_193, %c4_194, %c0_195] : memref<1x8x16x64xf32, #tpu.memory_space<vmem>>, vector<1x8x1x64xf32>
    %174 = vector.shape_cast %173 : vector<1x8x1x64xf32> to vector<8x64xf32>
    %175 = vector.shape_cast %172 : vector<8x64xf32> to vector<1x8x1x64xf32>
    tpu.vector_store %arg6[%c0_192, %c0_193, %c4_194, %c0_195], %175 {strides = array<i32>} : memref<1x8x16x64xf32, #tpu.memory_space<vmem>>, vector<1x8x1x64xf32>,
    %c0_196 = arith.constant 0 : index
    %c0_197 = arith.constant 0 : index
    %c5 = arith.constant 5 : index
    %c0_198 = arith.constant 0 : index
    %176 = vector.load %arg2[%c0_196, %c0_197, %c5, %c0_198] : memref<1x4x16x16xf32, #tpu.memory_space<vmem>>, vector<1x4x1x16xf32>
    %177 = vector.shape_cast %176 : vector<1x4x1x16xf32> to vector<4x16xf32>
    %c0_199 = arith.constant 0 : index
    %c0_200 = arith.constant 0 : index
    %c0_201 = arith.constant 0 : index
    %178 = vector.load %arg3[%c0_199, %c0_200, %c0_201] : memref<4x8x4xf32, #tpu.memory_space<vmem>>, vector<1x8x4xf32>
    %179 = vector.shape_cast %178 : vector<1x8x4xf32> to vector<8x4xf32>
    %cst_202 = arith.constant dense<0.000000e+00> : vector<8x16xf32>
    %180 = tpu.matmul %179, %177, %cst_202 {dimension_numbers = #tpu.dot_dimension_numbers<[1], [0], [0], [1], [0, 0, 1, 1], [], []>} : vector<8x4xf32>, vector<4x16xf32>, vector<8x16xf32> -> vector<8x16xf32>
    %c0_203 = arith.constant 0 : index
    %c0_204 = arith.constant 0 : index
    %c0_205 = arith.constant 0 : index
    %181 = vector.load %arg4[%c0_203, %c0_204, %c0_205] : memref<4x16x64xf32, #tpu.memory_space<vmem>>, vector<1x16x64xf32>
    %182 = vector.shape_cast %181 : vector<1x16x64xf32> to vector<16x64xf32>
    %cst_206 = arith.constant dense<0.000000e+00> : vector<8x64xf32>
    %183 = tpu.matmul %180, %182, %cst_206 {dimension_numbers = #tpu.dot_dimension_numbers<[1], [0], [0], [1], [0, 0, 1, 1], [], []>} : vector<8x16xf32>, vector<16x64xf32>, vector<8x64xf32> -> vector<8x64xf32>
    %c1_207 = arith.constant 1 : index
    %c0_208 = arith.constant 0 : index
    %c0_209 = arith.constant 0 : index
    %184 = vector.load %arg3[%c1_207, %c0_208, %c0_209] : memref<4x8x4xf32, #tpu.memory_space<vmem>>, vector<1x8x4xf32>
    %185 = vector.shape_cast %184 : vector<1x8x4xf32> to vector<8x4xf32>
    %cst_210 = arith.constant dense<0.000000e+00> : vector<8x16xf32>
    %186 = tpu.matmul %185, %177, %cst_210 {dimension_numbers = #tpu.dot_dimension_numbers<[1], [0], [0], [1], [0, 0, 1, 1], [], []>} : vector<8x4xf32>, vector<4x16xf32>, vector<8x16xf32> -> vector<8x16xf32>
    %c1_211 = arith.constant 1 : index
    %c0_212 = arith.constant 0 : index
    %c0_213 = arith.constant 0 : index
    %187 = vector.load %arg4[%c1_211, %c0_212, %c0_213] : memref<4x16x64xf32, #tpu.memory_space<vmem>>, vector<1x16x64xf32>
    %188 = vector.shape_cast %187 : vector<1x16x64xf32> to vector<16x64xf32>
    %cst_214 = arith.constant dense<0.000000e+00> : vector<8x64xf32>
    %189 = tpu.matmul %186, %188, %cst_214 {dimension_numbers = #tpu.dot_dimension_numbers<[1], [0], [0], [1], [0, 0, 1, 1], [], []>} : vector<8x16xf32>, vector<16x64xf32>, vector<8x64xf32> -> vector<8x64xf32>
    %190 = arith.addf %183, %189 : vector<8x64xf32>
    %c2_215 = arith.constant 2 : index
    %c0_216 = arith.constant 0 : index
    %c0_217 = arith.constant 0 : index
    %191 = vector.load %arg3[%c2_215, %c0_216, %c0_217] : memref<4x8x4xf32, #tpu.memory_space<vmem>>, vector<1x8x4xf32>
    %192 = vector.shape_cast %191 : vector<1x8x4xf32> to vector<8x4xf32>
    %cst_218 = arith.constant dense<0.000000e+00> : vector<8x16xf32>
    %193 = tpu.matmul %192, %177, %cst_218 {dimension_numbers = #tpu.dot_dimension_numbers<[1], [0], [0], [1], [0, 0, 1, 1], [], []>} : vector<8x4xf32>, vector<4x16xf32>, vector<8x16xf32> -> vector<8x16xf32>
    %c2_219 = arith.constant 2 : index
    %c0_220 = arith.constant 0 : index
    %c0_221 = arith.constant 0 : index
    %194 = vector.load %arg4[%c2_219, %c0_220, %c0_221] : memref<4x16x64xf32, #tpu.memory_space<vmem>>, vector<1x16x64xf32>
    %195 = vector.shape_cast %194 : vector<1x16x64xf32> to vector<16x64xf32>
    %cst_222 = arith.constant dense<0.000000e+00> : vector<8x64xf32>
    %196 = tpu.matmul %193, %195, %cst_222 {dimension_numbers = #tpu.dot_dimension_numbers<[1], [0], [0], [1], [0, 0, 1, 1], [], []>} : vector<8x16xf32>, vector<16x64xf32>, vector<8x64xf32> -> vector<8x64xf32>
    %197 = arith.addf %190, %196 : vector<8x64xf32>
    %c3_223 = arith.constant 3 : index
    %c0_224 = arith.constant 0 : index
    %c0_225 = arith.constant 0 : index
    %198 = vector.load %arg3[%c3_223, %c0_224, %c0_225] : memref<4x8x4xf32, #tpu.memory_space<vmem>>, vector<1x8x4xf32>
    %199 = vector.shape_cast %198 : vector<1x8x4xf32> to vector<8x4xf32>
    %cst_226 = arith.constant dense<0.000000e+00> : vector<8x16xf32>
    %200 = tpu.matmul %199, %177, %cst_226 {dimension_numbers = #tpu.dot_dimension_numbers<[1], [0], [0], [1], [0, 0, 1, 1], [], []>} : vector<8x4xf32>, vector<4x16xf32>, vector<8x16xf32> -> vector<8x16xf32>
    %c3_227 = arith.constant 3 : index
    %c0_228 = arith.constant 0 : index
    %c0_229 = arith.constant 0 : index
    %201 = vector.load %arg4[%c3_227, %c0_228, %c0_229] : memref<4x16x64xf32, #tpu.memory_space<vmem>>, vector<1x16x64xf32>
    %202 = vector.shape_cast %201 : vector<1x16x64xf32> to vector<16x64xf32>
    %cst_230 = arith.constant dense<0.000000e+00> : vector<8x64xf32>
    %203 = tpu.matmul %200, %202, %cst_230 {dimension_numbers = #tpu.dot_dimension_numbers<[1], [0], [0], [1], [0, 0, 1, 1], [], []>} : vector<8x16xf32>, vector<16x64xf32>, vector<8x64xf32> -> vector<8x64xf32>
    %204 = arith.addf %197, %203 : vector<8x64xf32>
    %205 = vector.broadcast %0 : vector<8x1xf32> to vector<8x64xf32>
    %206 = arith.addf %204, %205 : vector<8x64xf32>
    %207 = math.tanh %206 : vector<8x64xf32>
    %c0_231 = arith.constant 0 : index
    %c0_232 = arith.constant 0 : index
    %c5_233 = arith.constant 5 : index
    %c0_234 = arith.constant 0 : index
    %208 = vector.load %arg6[%c0_231, %c0_232, %c5_233, %c0_234] : memref<1x8x16x64xf32, #tpu.memory_space<vmem>>, vector<1x8x1x64xf32>
    %209 = vector.shape_cast %208 : vector<1x8x1x64xf32> to vector<8x64xf32>
    %210 = vector.shape_cast %207 : vector<8x64xf32> to vector<1x8x1x64xf32>
    tpu.vector_store %arg6[%c0_231, %c0_232, %c5_233, %c0_234], %210 {strides = array<i32>} : memref<1x8x16x64xf32, #tpu.memory_space<vmem>>, vector<1x8x1x64xf32>,
    %c0_235 = arith.constant 0 : index
    %c0_236 = arith.constant 0 : index
    %c6 = arith.constant 6 : index
    %c0_237 = arith.constant 0 : index
    %211 = vector.load %arg2[%c0_235, %c0_236, %c6, %c0_237] : memref<1x4x16x16xf32, #tpu.memory_space<vmem>>, vector<1x4x1x16xf32>
    %212 = vector.shape_cast %211 : vector<1x4x1x16xf32> to vector<4x16xf32>
    %c0_238 = arith.constant 0 : index
    %c0_239 = arith.constant 0 : index
    %c0_240 = arith.constant 0 : index
    %213 = vector.load %arg3[%c0_238, %c0_239, %c0_240] : memref<4x8x4xf32, #tpu.memory_space<vmem>>, vector<1x8x4xf32>
    %214 = vector.shape_cast %213 : vector<1x8x4xf32> to vector<8x4xf32>
    %cst_241 = arith.constant dense<0.000000e+00> : vector<8x16xf32>
    %215 = tpu.matmul %214, %212, %cst_241 {dimension_numbers = #tpu.dot_dimension_numbers<[1], [0], [0], [1], [0, 0, 1, 1], [], []>} : vector<8x4xf32>, vector<4x16xf32>, vector<8x16xf32> -> vector<8x16xf32>
    %c0_242 = arith.constant 0 : index
    %c0_243 = arith.constant 0 : index
    %c0_244 = arith.constant 0 : index
    %216 = vector.load %arg4[%c0_242, %c0_243, %c0_244] : memref<4x16x64xf32, #tpu.memory_space<vmem>>, vector<1x16x64xf32>
    %217 = vector.shape_cast %216 : vector<1x16x64xf32> to vector<16x64xf32>
    %cst_245 = arith.constant dense<0.000000e+00> : vector<8x64xf32>
    %218 = tpu.matmul %215, %217, %cst_245 {dimension_numbers = #tpu.dot_dimension_numbers<[1], [0], [0], [1], [0, 0, 1, 1], [], []>} : vector<8x16xf32>, vector<16x64xf32>, vector<8x64xf32> -> vector<8x64xf32>
    %c1_246 = arith.constant 1 : index
    %c0_247 = arith.constant 0 : index
    %c0_248 = arith.constant 0 : index
    %219 = vector.load %arg3[%c1_246, %c0_247, %c0_248] : memref<4x8x4xf32, #tpu.memory_space<vmem>>, vector<1x8x4xf32>
    %220 = vector.shape_cast %219 : vector<1x8x4xf32> to vector<8x4xf32>
    %cst_249 = arith.constant dense<0.000000e+00> : vector<8x16xf32>
    %221 = tpu.matmul %220, %212, %cst_249 {dimension_numbers = #tpu.dot_dimension_numbers<[1], [0], [0], [1], [0, 0, 1, 1], [], []>} : vector<8x4xf32>, vector<4x16xf32>, vector<8x16xf32> -> vector<8x16xf32>
    %c1_250 = arith.constant 1 : index
    %c0_251 = arith.constant 0 : index
    %c0_252 = arith.constant 0 : index
    %222 = vector.load %arg4[%c1_250, %c0_251, %c0_252] : memref<4x16x64xf32, #tpu.memory_space<vmem>>, vector<1x16x64xf32>
    %223 = vector.shape_cast %222 : vector<1x16x64xf32> to vector<16x64xf32>
    %cst_253 = arith.constant dense<0.000000e+00> : vector<8x64xf32>
    %224 = tpu.matmul %221, %223, %cst_253 {dimension_numbers = #tpu.dot_dimension_numbers<[1], [0], [0], [1], [0, 0, 1, 1], [], []>} : vector<8x16xf32>, vector<16x64xf32>, vector<8x64xf32> -> vector<8x64xf32>
    %225 = arith.addf %218, %224 : vector<8x64xf32>
    %c2_254 = arith.constant 2 : index
    %c0_255 = arith.constant 0 : index
    %c0_256 = arith.constant 0 : index
    %226 = vector.load %arg3[%c2_254, %c0_255, %c0_256] : memref<4x8x4xf32, #tpu.memory_space<vmem>>, vector<1x8x4xf32>
    %227 = vector.shape_cast %226 : vector<1x8x4xf32> to vector<8x4xf32>
    %cst_257 = arith.constant dense<0.000000e+00> : vector<8x16xf32>
    %228 = tpu.matmul %227, %212, %cst_257 {dimension_numbers = #tpu.dot_dimension_numbers<[1], [0], [0], [1], [0, 0, 1, 1], [], []>} : vector<8x4xf32>, vector<4x16xf32>, vector<8x16xf32> -> vector<8x16xf32>
    %c2_258 = arith.constant 2 : index
    %c0_259 = arith.constant 0 : index
    %c0_260 = arith.constant 0 : index
    %229 = vector.load %arg4[%c2_258, %c0_259, %c0_260] : memref<4x16x64xf32, #tpu.memory_space<vmem>>, vector<1x16x64xf32>
    %230 = vector.shape_cast %229 : vector<1x16x64xf32> to vector<16x64xf32>
    %cst_261 = arith.constant dense<0.000000e+00> : vector<8x64xf32>
    %231 = tpu.matmul %228, %230, %cst_261 {dimension_numbers = #tpu.dot_dimension_numbers<[1], [0], [0], [1], [0, 0, 1, 1], [], []>} : vector<8x16xf32>, vector<16x64xf32>, vector<8x64xf32> -> vector<8x64xf32>
    %232 = arith.addf %225, %231 : vector<8x64xf32>
    %c3_262 = arith.constant 3 : index
    %c0_263 = arith.constant 0 : index
    %c0_264 = arith.constant 0 : index
    %233 = vector.load %arg3[%c3_262, %c0_263, %c0_264] : memref<4x8x4xf32, #tpu.memory_space<vmem>>, vector<1x8x4xf32>
    %234 = vector.shape_cast %233 : vector<1x8x4xf32> to vector<8x4xf32>
    %cst_265 = arith.constant dense<0.000000e+00> : vector<8x16xf32>
    %235 = tpu.matmul %234, %212, %cst_265 {dimension_numbers = #tpu.dot_dimension_numbers<[1], [0], [0], [1], [0, 0, 1, 1], [], []>} : vector<8x4xf32>, vector<4x16xf32>, vector<8x16xf32> -> vector<8x16xf32>
    %c3_266 = arith.constant 3 : index
    %c0_267 = arith.constant 0 : index
    %c0_268 = arith.constant 0 : index
    %236 = vector.load %arg4[%c3_266, %c0_267, %c0_268] : memref<4x16x64xf32, #tpu.memory_space<vmem>>, vector<1x16x64xf32>
    %237 = vector.shape_cast %236 : vector<1x16x64xf32> to vector<16x64xf32>
    %cst_269 = arith.constant dense<0.000000e+00> : vector<8x64xf32>
    %238 = tpu.matmul %235, %237, %cst_269 {dimension_numbers = #tpu.dot_dimension_numbers<[1], [0], [0], [1], [0, 0, 1, 1], [], []>} : vector<8x16xf32>, vector<16x64xf32>, vector<8x64xf32> -> vector<8x64xf32>
    %239 = arith.addf %232, %238 : vector<8x64xf32>
    %240 = vector.broadcast %0 : vector<8x1xf32> to vector<8x64xf32>
    %241 = arith.addf %239, %240 : vector<8x64xf32>
    %242 = math.tanh %241 : vector<8x64xf32>
    %c0_270 = arith.constant 0 : index
    %c0_271 = arith.constant 0 : index
    %c6_272 = arith.constant 6 : index
    %c0_273 = arith.constant 0 : index
    %243 = vector.load %arg6[%c0_270, %c0_271, %c6_272, %c0_273] : memref<1x8x16x64xf32, #tpu.memory_space<vmem>>, vector<1x8x1x64xf32>
    %244 = vector.shape_cast %243 : vector<1x8x1x64xf32> to vector<8x64xf32>
    %245 = vector.shape_cast %242 : vector<8x64xf32> to vector<1x8x1x64xf32>
    tpu.vector_store %arg6[%c0_270, %c0_271, %c6_272, %c0_273], %245 {strides = array<i32>} : memref<1x8x16x64xf32, #tpu.memory_space<vmem>>, vector<1x8x1x64xf32>,
    %c0_274 = arith.constant 0 : index
    %c0_275 = arith.constant 0 : index
    %c7 = arith.constant 7 : index
    %c0_276 = arith.constant 0 : index
    %246 = vector.load %arg2[%c0_274, %c0_275, %c7, %c0_276] : memref<1x4x16x16xf32, #tpu.memory_space<vmem>>, vector<1x4x1x16xf32>
    %247 = vector.shape_cast %246 : vector<1x4x1x16xf32> to vector<4x16xf32>
    %c0_277 = arith.constant 0 : index
    %c0_278 = arith.constant 0 : index
    %c0_279 = arith.constant 0 : index
    %248 = vector.load %arg3[%c0_277, %c0_278, %c0_279] : memref<4x8x4xf32, #tpu.memory_space<vmem>>, vector<1x8x4xf32>
    %249 = vector.shape_cast %248 : vector<1x8x4xf32> to vector<8x4xf32>
    %cst_280 = arith.constant dense<0.000000e+00> : vector<8x16xf32>
    %250 = tpu.matmul %249, %247, %cst_280 {dimension_numbers = #tpu.dot_dimension_numbers<[1], [0], [0], [1], [0, 0, 1, 1], [], []>} : vector<8x4xf32>, vector<4x16xf32>, vector<8x16xf32> -> vector<8x16xf32>
    %c0_281 = arith.constant 0 : index
    %c0_282 = arith.constant 0 : index
    %c0_283 = arith.constant 0 : index
    %251 = vector.load %arg4[%c0_281, %c0_282, %c0_283] : memref<4x16x64xf32, #tpu.memory_space<vmem>>, vector<1x16x64xf32>
    %252 = vector.shape_cast %251 : vector<1x16x64xf32> to vector<16x64xf32>
    %cst_284 = arith.constant dense<0.000000e+00> : vector<8x64xf32>
    %253 = tpu.matmul %250, %252, %cst_284 {dimension_numbers = #tpu.dot_dimension_numbers<[1], [0], [0], [1], [0, 0, 1, 1], [], []>} : vector<8x16xf32>, vector<16x64xf32>, vector<8x64xf32> -> vector<8x64xf32>
    %c1_285 = arith.constant 1 : index
    %c0_286 = arith.constant 0 : index
    %c0_287 = arith.constant 0 : index
    %254 = vector.load %arg3[%c1_285, %c0_286, %c0_287] : memref<4x8x4xf32, #tpu.memory_space<vmem>>, vector<1x8x4xf32>
    %255 = vector.shape_cast %254 : vector<1x8x4xf32> to vector<8x4xf32>
    %cst_288 = arith.constant dense<0.000000e+00> : vector<8x16xf32>
    %256 = tpu.matmul %255, %247, %cst_288 {dimension_numbers = #tpu.dot_dimension_numbers<[1], [0], [0], [1], [0, 0, 1, 1], [], []>} : vector<8x4xf32>, vector<4x16xf32>, vector<8x16xf32> -> vector<8x16xf32>
    %c1_289 = arith.constant 1 : index
    %c0_290 = arith.constant 0 : index
    %c0_291 = arith.constant 0 : index
    %257 = vector.load %arg4[%c1_289, %c0_290, %c0_291] : memref<4x16x64xf32, #tpu.memory_space<vmem>>, vector<1x16x64xf32>
    %258 = vector.shape_cast %257 : vector<1x16x64xf32> to vector<16x64xf32>
    %cst_292 = arith.constant dense<0.000000e+00> : vector<8x64xf32>
    %259 = tpu.matmul %256, %258, %cst_292 {dimension_numbers = #tpu.dot_dimension_numbers<[1], [0], [0], [1], [0, 0, 1, 1], [], []>} : vector<8x16xf32>, vector<16x64xf32>, vector<8x64xf32> -> vector<8x64xf32>
    %260 = arith.addf %253, %259 : vector<8x64xf32>
    %c2_293 = arith.constant 2 : index
    %c0_294 = arith.constant 0 : index
    %c0_295 = arith.constant 0 : index
    %261 = vector.load %arg3[%c2_293, %c0_294, %c0_295] : memref<4x8x4xf32, #tpu.memory_space<vmem>>, vector<1x8x4xf32>
    %262 = vector.shape_cast %261 : vector<1x8x4xf32> to vector<8x4xf32>
    %cst_296 = arith.constant dense<0.000000e+00> : vector<8x16xf32>
    %263 = tpu.matmul %262, %247, %cst_296 {dimension_numbers = #tpu.dot_dimension_numbers<[1], [0], [0], [1], [0, 0, 1, 1], [], []>} : vector<8x4xf32>, vector<4x16xf32>, vector<8x16xf32> -> vector<8x16xf32>
    %c2_297 = arith.constant 2 : index
    %c0_298 = arith.constant 0 : index
    %c0_299 = arith.constant 0 : index
    %264 = vector.load %arg4[%c2_297, %c0_298, %c0_299] : memref<4x16x64xf32, #tpu.memory_space<vmem>>, vector<1x16x64xf32>
    %265 = vector.shape_cast %264 : vector<1x16x64xf32> to vector<16x64xf32>
    %cst_300 = arith.constant dense<0.000000e+00> : vector<8x64xf32>
    %266 = tpu.matmul %263, %265, %cst_300 {dimension_numbers = #tpu.dot_dimension_numbers<[1], [0], [0], [1], [0, 0, 1, 1], [], []>} : vector<8x16xf32>, vector<16x64xf32>, vector<8x64xf32> -> vector<8x64xf32>
    %267 = arith.addf %260, %266 : vector<8x64xf32>
    %c3_301 = arith.constant 3 : index
    %c0_302 = arith.constant 0 : index
    %c0_303 = arith.constant 0 : index
    %268 = vector.load %arg3[%c3_301, %c0_302, %c0_303] : memref<4x8x4xf32, #tpu.memory_space<vmem>>, vector<1x8x4xf32>
    %269 = vector.shape_cast %268 : vector<1x8x4xf32> to vector<8x4xf32>
    %cst_304 = arith.constant dense<0.000000e+00> : vector<8x16xf32>
    %270 = tpu.matmul %269, %247, %cst_304 {dimension_numbers = #tpu.dot_dimension_numbers<[1], [0], [0], [1], [0, 0, 1, 1], [], []>} : vector<8x4xf32>, vector<4x16xf32>, vector<8x16xf32> -> vector<8x16xf32>
    %c3_305 = arith.constant 3 : index
    %c0_306 = arith.constant 0 : index
    %c0_307 = arith.constant 0 : index
    %271 = vector.load %arg4[%c3_305, %c0_306, %c0_307] : memref<4x16x64xf32, #tpu.memory_space<vmem>>, vector<1x16x64xf32>
    %272 = vector.shape_cast %271 : vector<1x16x64xf32> to vector<16x64xf32>
    %cst_308 = arith.constant dense<0.000000e+00> : vector<8x64xf32>
    %273 = tpu.matmul %270, %272, %cst_308 {dimension_numbers = #tpu.dot_dimension_numbers<[1], [0], [0], [1], [0, 0, 1, 1], [], []>} : vector<8x16xf32>, vector<16x64xf32>, vector<8x64xf32> -> vector<8x64xf32>
    %274 = arith.addf %267, %273 : vector<8x64xf32>
    %275 = vector.broadcast %0 : vector<8x1xf32> to vector<8x64xf32>
    %276 = arith.addf %274, %275 : vector<8x64xf32>
    %277 = math.tanh %276 : vector<8x64xf32>
    %c0_309 = arith.constant 0 : index
    %c0_310 = arith.constant 0 : index
    %c7_311 = arith.constant 7 : index
    %c0_312 = arith.constant 0 : index
    %278 = vector.load %arg6[%c0_309, %c0_310, %c7_311, %c0_312] : memref<1x8x16x64xf32, #tpu.memory_space<vmem>>, vector<1x8x1x64xf32>
    %279 = vector.shape_cast %278 : vector<1x8x1x64xf32> to vector<8x64xf32>
    %280 = vector.shape_cast %277 : vector<8x64xf32> to vector<1x8x1x64xf32>
    tpu.vector_store %arg6[%c0_309, %c0_310, %c7_311, %c0_312], %280 {strides = array<i32>} : memref<1x8x16x64xf32, #tpu.memory_space<vmem>>, vector<1x8x1x64xf32>,
    %c0_313 = arith.constant 0 : index
    %c0_314 = arith.constant 0 : index
    %c8 = arith.constant 8 : index
    %c0_315 = arith.constant 0 : index
    %281 = vector.load %arg2[%c0_313, %c0_314, %c8, %c0_315] : memref<1x4x16x16xf32, #tpu.memory_space<vmem>>, vector<1x4x1x16xf32>
    %282 = vector.shape_cast %281 : vector<1x4x1x16xf32> to vector<4x16xf32>
    %c0_316 = arith.constant 0 : index
    %c0_317 = arith.constant 0 : index
    %c0_318 = arith.constant 0 : index
    %283 = vector.load %arg3[%c0_316, %c0_317, %c0_318] : memref<4x8x4xf32, #tpu.memory_space<vmem>>, vector<1x8x4xf32>
    %284 = vector.shape_cast %283 : vector<1x8x4xf32> to vector<8x4xf32>
    %cst_319 = arith.constant dense<0.000000e+00> : vector<8x16xf32>
    %285 = tpu.matmul %284, %282, %cst_319 {dimension_numbers = #tpu.dot_dimension_numbers<[1], [0], [0], [1], [0, 0, 1, 1], [], []>} : vector<8x4xf32>, vector<4x16xf32>, vector<8x16xf32> -> vector<8x16xf32>
    %c0_320 = arith.constant 0 : index
    %c0_321 = arith.constant 0 : index
    %c0_322 = arith.constant 0 : index
    %286 = vector.load %arg4[%c0_320, %c0_321, %c0_322] : memref<4x16x64xf32, #tpu.memory_space<vmem>>, vector<1x16x64xf32>
    %287 = vector.shape_cast %286 : vector<1x16x64xf32> to vector<16x64xf32>
    %cst_323 = arith.constant dense<0.000000e+00> : vector<8x64xf32>
    %288 = tpu.matmul %285, %287, %cst_323 {dimension_numbers = #tpu.dot_dimension_numbers<[1], [0], [0], [1], [0, 0, 1, 1], [], []>} : vector<8x16xf32>, vector<16x64xf32>, vector<8x64xf32> -> vector<8x64xf32>
    %c1_324 = arith.constant 1 : index
    %c0_325 = arith.constant 0 : index
    %c0_326 = arith.constant 0 : index
    %289 = vector.load %arg3[%c1_324, %c0_325, %c0_326] : memref<4x8x4xf32, #tpu.memory_space<vmem>>, vector<1x8x4xf32>
    %290 = vector.shape_cast %289 : vector<1x8x4xf32> to vector<8x4xf32>
    %cst_327 = arith.constant dense<0.000000e+00> : vector<8x16xf32>
    %291 = tpu.matmul %290, %282, %cst_327 {dimension_numbers = #tpu.dot_dimension_numbers<[1], [0], [0], [1], [0, 0, 1, 1], [], []>} : vector<8x4xf32>, vector<4x16xf32>, vector<8x16xf32> -> vector<8x16xf32>
    %c1_328 = arith.constant 1 : index
    %c0_329 = arith.constant 0 : index
    %c0_330 = arith.constant 0 : index
    %292 = vector.load %arg4[%c1_328, %c0_329, %c0_330] : memref<4x16x64xf32, #tpu.memory_space<vmem>>, vector<1x16x64xf32>
    %293 = vector.shape_cast %292 : vector<1x16x64xf32> to vector<16x64xf32>
    %cst_331 = arith.constant dense<0.000000e+00> : vector<8x64xf32>
    %294 = tpu.matmul %291, %293, %cst_331 {dimension_numbers = #tpu.dot_dimension_numbers<[1], [0], [0], [1], [0, 0, 1, 1], [], []>} : vector<8x16xf32>, vector<16x64xf32>, vector<8x64xf32> -> vector<8x64xf32>
    %295 = arith.addf %288, %294 : vector<8x64xf32>
    %c2_332 = arith.constant 2 : index
    %c0_333 = arith.constant 0 : index
    %c0_334 = arith.constant 0 : index
    %296 = vector.load %arg3[%c2_332, %c0_333, %c0_334] : memref<4x8x4xf32, #tpu.memory_space<vmem>>, vector<1x8x4xf32>
    %297 = vector.shape_cast %296 : vector<1x8x4xf32> to vector<8x4xf32>
    %cst_335 = arith.constant dense<0.000000e+00> : vector<8x16xf32>
    %298 = tpu.matmul %297, %282, %cst_335 {dimension_numbers = #tpu.dot_dimension_numbers<[1], [0], [0], [1], [0, 0, 1, 1], [], []>} : vector<8x4xf32>, vector<4x16xf32>, vector<8x16xf32> -> vector<8x16xf32>
    %c2_336 = arith.constant 2 : index
    %c0_337 = arith.constant 0 : index
    %c0_338 = arith.constant 0 : index
    %299 = vector.load %arg4[%c2_336, %c0_337, %c0_338] : memref<4x16x64xf32, #tpu.memory_space<vmem>>, vector<1x16x64xf32>
    %300 = vector.shape_cast %299 : vector<1x16x64xf32> to vector<16x64xf32>
    %cst_339 = arith.constant dense<0.000000e+00> : vector<8x64xf32>
    %301 = tpu.matmul %298, %300, %cst_339 {dimension_numbers = #tpu.dot_dimension_numbers<[1], [0], [0], [1], [0, 0, 1, 1], [], []>} : vector<8x16xf32>, vector<16x64xf32>, vector<8x64xf32> -> vector<8x64xf32>
    %302 = arith.addf %295, %301 : vector<8x64xf32>
    %c3_340 = arith.constant 3 : index
    %c0_341 = arith.constant 0 : index
    %c0_342 = arith.constant 0 : index
    %303 = vector.load %arg3[%c3_340, %c0_341, %c0_342] : memref<4x8x4xf32, #tpu.memory_space<vmem>>, vector<1x8x4xf32>
    %304 = vector.shape_cast %303 : vector<1x8x4xf32> to vector<8x4xf32>
    %cst_343 = arith.constant dense<0.000000e+00> : vector<8x16xf32>
    %305 = tpu.matmul %304, %282, %cst_343 {dimension_numbers = #tpu.dot_dimension_numbers<[1], [0], [0], [1], [0, 0, 1, 1], [], []>} : vector<8x4xf32>, vector<4x16xf32>, vector<8x16xf32> -> vector<8x16xf32>
    %c3_344 = arith.constant 3 : index
    %c0_345 = arith.constant 0 : index
    %c0_346 = arith.constant 0 : index
    %306 = vector.load %arg4[%c3_344, %c0_345, %c0_346] : memref<4x16x64xf32, #tpu.memory_space<vmem>>, vector<1x16x64xf32>
    %307 = vector.shape_cast %306 : vector<1x16x64xf32> to vector<16x64xf32>
    %cst_347 = arith.constant dense<0.000000e+00> : vector<8x64xf32>
    %308 = tpu.matmul %305, %307, %cst_347 {dimension_numbers = #tpu.dot_dimension_numbers<[1], [0], [0], [1], [0, 0, 1, 1], [], []>} : vector<8x16xf32>, vector<16x64xf32>, vector<8x64xf32> -> vector<8x64xf32>
    %309 = arith.addf %302, %308 : vector<8x64xf32>
    %310 = vector.broadcast %0 : vector<8x1xf32> to vector<8x64xf32>
    %311 = arith.addf %309, %310 : vector<8x64xf32>
    %312 = math.tanh %311 : vector<8x64xf32>
    %c0_348 = arith.constant 0 : index
    %c0_349 = arith.constant 0 : index
    %c8_350 = arith.constant 8 : index
    %c0_351 = arith.constant 0 : index
    %313 = vector.load %arg6[%c0_348, %c0_349, %c8_350, %c0_351] : memref<1x8x16x64xf32, #tpu.memory_space<vmem>>, vector<1x8x1x64xf32>
    %314 = vector.shape_cast %313 : vector<1x8x1x64xf32> to vector<8x64xf32>
    %315 = vector.shape_cast %312 : vector<8x64xf32> to vector<1x8x1x64xf32>
    tpu.vector_store %arg6[%c0_348, %c0_349, %c8_350, %c0_351], %315 {strides = array<i32>} : memref<1x8x16x64xf32, #tpu.memory_space<vmem>>, vector<1x8x1x64xf32>,
    %c0_352 = arith.constant 0 : index
    %c0_353 = arith.constant 0 : index
    %c9 = arith.constant 9 : index
    %c0_354 = arith.constant 0 : index
    %316 = vector.load %arg2[%c0_352, %c0_353, %c9, %c0_354] : memref<1x4x16x16xf32, #tpu.memory_space<vmem>>, vector<1x4x1x16xf32>
    %317 = vector.shape_cast %316 : vector<1x4x1x16xf32> to vector<4x16xf32>
    %c0_355 = arith.constant 0 : index
    %c0_356 = arith.constant 0 : index
    %c0_357 = arith.constant 0 : index
    %318 = vector.load %arg3[%c0_355, %c0_356, %c0_357] : memref<4x8x4xf32, #tpu.memory_space<vmem>>, vector<1x8x4xf32>
    %319 = vector.shape_cast %318 : vector<1x8x4xf32> to vector<8x4xf32>
    %cst_358 = arith.constant dense<0.000000e+00> : vector<8x16xf32>
    %320 = tpu.matmul %319, %317, %cst_358 {dimension_numbers = #tpu.dot_dimension_numbers<[1], [0], [0], [1], [0, 0, 1, 1], [], []>} : vector<8x4xf32>, vector<4x16xf32>, vector<8x16xf32> -> vector<8x16xf32>
    %c0_359 = arith.constant 0 : index
    %c0_360 = arith.constant 0 : index
    %c0_361 = arith.constant 0 : index
    %321 = vector.load %arg4[%c0_359, %c0_360, %c0_361] : memref<4x16x64xf32, #tpu.memory_space<vmem>>, vector<1x16x64xf32>
    %322 = vector.shape_cast %321 : vector<1x16x64xf32> to vector<16x64xf32>
    %cst_362 = arith.constant dense<0.000000e+00> : vector<8x64xf32>
    %323 = tpu.matmul %320, %322, %cst_362 {dimension_numbers = #tpu.dot_dimension_numbers<[1], [0], [0], [1], [0, 0, 1, 1], [], []>} : vector<8x16xf32>, vector<16x64xf32>, vector<8x64xf32> -> vector<8x64xf32>
    %c1_363 = arith.constant 1 : index
    %c0_364 = arith.constant 0 : index
    %c0_365 = arith.constant 0 : index
    %324 = vector.load %arg3[%c1_363, %c0_364, %c0_365] : memref<4x8x4xf32, #tpu.memory_space<vmem>>, vector<1x8x4xf32>
    %325 = vector.shape_cast %324 : vector<1x8x4xf32> to vector<8x4xf32>
    %cst_366 = arith.constant dense<0.000000e+00> : vector<8x16xf32>
    %326 = tpu.matmul %325, %317, %cst_366 {dimension_numbers = #tpu.dot_dimension_numbers<[1], [0], [0], [1], [0, 0, 1, 1], [], []>} : vector<8x4xf32>, vector<4x16xf32>, vector<8x16xf32> -> vector<8x16xf32>
    %c1_367 = arith.constant 1 : index
    %c0_368 = arith.constant 0 : index
    %c0_369 = arith.constant 0 : index
    %327 = vector.load %arg4[%c1_367, %c0_368, %c0_369] : memref<4x16x64xf32, #tpu.memory_space<vmem>>, vector<1x16x64xf32>
    %328 = vector.shape_cast %327 : vector<1x16x64xf32> to vector<16x64xf32>
    %cst_370 = arith.constant dense<0.000000e+00> : vector<8x64xf32>
    %329 = tpu.matmul %326, %328, %cst_370 {dimension_numbers = #tpu.dot_dimension_numbers<[1], [0], [0], [1], [0, 0, 1, 1], [], []>} : vector<8x16xf32>, vector<16x64xf32>, vector<8x64xf32> -> vector<8x64xf32>
    %330 = arith.addf %323, %329 : vector<8x64xf32>
    %c2_371 = arith.constant 2 : index
    %c0_372 = arith.constant 0 : index
    %c0_373 = arith.constant 0 : index
    %331 = vector.load %arg3[%c2_371, %c0_372, %c0_373] : memref<4x8x4xf32, #tpu.memory_space<vmem>>, vector<1x8x4xf32>
    %332 = vector.shape_cast %331 : vector<1x8x4xf32> to vector<8x4xf32>
    %cst_374 = arith.constant dense<0.000000e+00> : vector<8x16xf32>
    %333 = tpu.matmul %332, %317, %cst_374 {dimension_numbers = #tpu.dot_dimension_numbers<[1], [0], [0], [1], [0, 0, 1, 1], [], []>} : vector<8x4xf32>, vector<4x16xf32>, vector<8x16xf32> -> vector<8x16xf32>
    %c2_375 = arith.constant 2 : index
    %c0_376 = arith.constant 0 : index
    %c0_377 = arith.constant 0 : index
    %334 = vector.load %arg4[%c2_375, %c0_376, %c0_377] : memref<4x16x64xf32, #tpu.memory_space<vmem>>, vector<1x16x64xf32>
    %335 = vector.shape_cast %334 : vector<1x16x64xf32> to vector<16x64xf32>
    %cst_378 = arith.constant dense<0.000000e+00> : vector<8x64xf32>
    %336 = tpu.matmul %333, %335, %cst_378 {dimension_numbers = #tpu.dot_dimension_numbers<[1], [0], [0], [1], [0, 0, 1, 1], [], []>} : vector<8x16xf32>, vector<16x64xf32>, vector<8x64xf32> -> vector<8x64xf32>
    %337 = arith.addf %330, %336 : vector<8x64xf32>
    %c3_379 = arith.constant 3 : index
    %c0_380 = arith.constant 0 : index
    %c0_381 = arith.constant 0 : index
    %338 = vector.load %arg3[%c3_379, %c0_380, %c0_381] : memref<4x8x4xf32, #tpu.memory_space<vmem>>, vector<1x8x4xf32>
    %339 = vector.shape_cast %338 : vector<1x8x4xf32> to vector<8x4xf32>
    %cst_382 = arith.constant dense<0.000000e+00> : vector<8x16xf32>
    %340 = tpu.matmul %339, %317, %cst_382 {dimension_numbers = #tpu.dot_dimension_numbers<[1], [0], [0], [1], [0, 0, 1, 1], [], []>} : vector<8x4xf32>, vector<4x16xf32>, vector<8x16xf32> -> vector<8x16xf32>
    %c3_383 = arith.constant 3 : index
    %c0_384 = arith.constant 0 : index
    %c0_385 = arith.constant 0 : index
    %341 = vector.load %arg4[%c3_383, %c0_384, %c0_385] : memref<4x16x64xf32, #tpu.memory_space<vmem>>, vector<1x16x64xf32>
    %342 = vector.shape_cast %341 : vector<1x16x64xf32> to vector<16x64xf32>
    %cst_386 = arith.constant dense<0.000000e+00> : vector<8x64xf32>
    %343 = tpu.matmul %340, %342, %cst_386 {dimension_numbers = #tpu.dot_dimension_numbers<[1], [0], [0], [1], [0, 0, 1, 1], [], []>} : vector<8x16xf32>, vector<16x64xf32>, vector<8x64xf32> -> vector<8x64xf32>
    %344 = arith.addf %337, %343 : vector<8x64xf32>
    %345 = vector.broadcast %0 : vector<8x1xf32> to vector<8x64xf32>
    %346 = arith.addf %344, %345 : vector<8x64xf32>
    %347 = math.tanh %346 : vector<8x64xf32>
    %c0_387 = arith.constant 0 : index
    %c0_388 = arith.constant 0 : index
    %c9_389 = arith.constant 9 : index
    %c0_390 = arith.constant 0 : index
    %348 = vector.load %arg6[%c0_387, %c0_388, %c9_389, %c0_390] : memref<1x8x16x64xf32, #tpu.memory_space<vmem>>, vector<1x8x1x64xf32>
    %349 = vector.shape_cast %348 : vector<1x8x1x64xf32> to vector<8x64xf32>
    %350 = vector.shape_cast %347 : vector<8x64xf32> to vector<1x8x1x64xf32>
    tpu.vector_store %arg6[%c0_387, %c0_388, %c9_389, %c0_390], %350 {strides = array<i32>} : memref<1x8x16x64xf32, #tpu.memory_space<vmem>>, vector<1x8x1x64xf32>,
    %c0_391 = arith.constant 0 : index
    %c0_392 = arith.constant 0 : index
    %c10 = arith.constant 10 : index
    %c0_393 = arith.constant 0 : index
    %351 = vector.load %arg2[%c0_391, %c0_392, %c10, %c0_393] : memref<1x4x16x16xf32, #tpu.memory_space<vmem>>, vector<1x4x1x16xf32>
    %352 = vector.shape_cast %351 : vector<1x4x1x16xf32> to vector<4x16xf32>
    %c0_394 = arith.constant 0 : index
    %c0_395 = arith.constant 0 : index
    %c0_396 = arith.constant 0 : index
    %353 = vector.load %arg3[%c0_394, %c0_395, %c0_396] : memref<4x8x4xf32, #tpu.memory_space<vmem>>, vector<1x8x4xf32>
    %354 = vector.shape_cast %353 : vector<1x8x4xf32> to vector<8x4xf32>
    %cst_397 = arith.constant dense<0.000000e+00> : vector<8x16xf32>
    %355 = tpu.matmul %354, %352, %cst_397 {dimension_numbers = #tpu.dot_dimension_numbers<[1], [0], [0], [1], [0, 0, 1, 1], [], []>} : vector<8x4xf32>, vector<4x16xf32>, vector<8x16xf32> -> vector<8x16xf32>
    %c0_398 = arith.constant 0 : index
    %c0_399 = arith.constant 0 : index
    %c0_400 = arith.constant 0 : index
    %356 = vector.load %arg4[%c0_398, %c0_399, %c0_400] : memref<4x16x64xf32, #tpu.memory_space<vmem>>, vector<1x16x64xf32>
    %357 = vector.shape_cast %356 : vector<1x16x64xf32> to vector<16x64xf32>
    %cst_401 = arith.constant dense<0.000000e+00> : vector<8x64xf32>
    %358 = tpu.matmul %355, %357, %cst_401 {dimension_numbers = #tpu.dot_dimension_numbers<[1], [0], [0], [1], [0, 0, 1, 1], [], []>} : vector<8x16xf32>, vector<16x64xf32>, vector<8x64xf32> -> vector<8x64xf32>
    %c1_402 = arith.constant 1 : index
    %c0_403 = arith.constant 0 : index
    %c0_404 = arith.constant 0 : index
    %359 = vector.load %arg3[%c1_402, %c0_403, %c0_404] : memref<4x8x4xf32, #tpu.memory_space<vmem>>, vector<1x8x4xf32>
    %360 = vector.shape_cast %359 : vector<1x8x4xf32> to vector<8x4xf32>
    %cst_405 = arith.constant dense<0.000000e+00> : vector<8x16xf32>
    %361 = tpu.matmul %360, %352, %cst_405 {dimension_numbers = #tpu.dot_dimension_numbers<[1], [0], [0], [1], [0, 0, 1, 1], [], []>} : vector<8x4xf32>, vector<4x16xf32>, vector<8x16xf32> -> vector<8x16xf32>
    %c1_406 = arith.constant 1 : index
    %c0_407 = arith.constant 0 : index
    %c0_408 = arith.constant 0 : index
    %362 = vector.load %arg4[%c1_406, %c0_407, %c0_408] : memref<4x16x64xf32, #tpu.memory_space<vmem>>, vector<1x16x64xf32>
    %363 = vector.shape_cast %362 : vector<1x16x64xf32> to vector<16x64xf32>
    %cst_409 = arith.constant dense<0.000000e+00> : vector<8x64xf32>
    %364 = tpu.matmul %361, %363, %cst_409 {dimension_numbers = #tpu.dot_dimension_numbers<[1], [0], [0], [1], [0, 0, 1, 1], [], []>} : vector<8x16xf32>, vector<16x64xf32>, vector<8x64xf32> -> vector<8x64xf32>
    %365 = arith.addf %358, %364 : vector<8x64xf32>
    %c2_410 = arith.constant 2 : index
    %c0_411 = arith.constant 0 : index
    %c0_412 = arith.constant 0 : index
    %366 = vector.load %arg3[%c2_410, %c0_411, %c0_412] : memref<4x8x4xf32, #tpu.memory_space<vmem>>, vector<1x8x4xf32>
    %367 = vector.shape_cast %366 : vector<1x8x4xf32> to vector<8x4xf32>
    %cst_413 = arith.constant dense<0.000000e+00> : vector<8x16xf32>
    %368 = tpu.matmul %367, %352, %cst_413 {dimension_numbers = #tpu.dot_dimension_numbers<[1], [0], [0], [1], [0, 0, 1, 1], [], []>} : vector<8x4xf32>, vector<4x16xf32>, vector<8x16xf32> -> vector<8x16xf32>
    %c2_414 = arith.constant 2 : index
    %c0_415 = arith.constant 0 : index
    %c0_416 = arith.constant 0 : index
    %369 = vector.load %arg4[%c2_414, %c0_415, %c0_416] : memref<4x16x64xf32, #tpu.memory_space<vmem>>, vector<1x16x64xf32>
    %370 = vector.shape_cast %369 : vector<1x16x64xf32> to vector<16x64xf32>
    %cst_417 = arith.constant dense<0.000000e+00> : vector<8x64xf32>
    %371 = tpu.matmul %368, %370, %cst_417 {dimension_numbers = #tpu.dot_dimension_numbers<[1], [0], [0], [1], [0, 0, 1, 1], [], []>} : vector<8x16xf32>, vector<16x64xf32>, vector<8x64xf32> -> vector<8x64xf32>
    %372 = arith.addf %365, %371 : vector<8x64xf32>
    %c3_418 = arith.constant 3 : index
    %c0_419 = arith.constant 0 : index
    %c0_420 = arith.constant 0 : index
    %373 = vector.load %arg3[%c3_418, %c0_419, %c0_420] : memref<4x8x4xf32, #tpu.memory_space<vmem>>, vector<1x8x4xf32>
    %374 = vector.shape_cast %373 : vector<1x8x4xf32> to vector<8x4xf32>
    %cst_421 = arith.constant dense<0.000000e+00> : vector<8x16xf32>
    %375 = tpu.matmul %374, %352, %cst_421 {dimension_numbers = #tpu.dot_dimension_numbers<[1], [0], [0], [1], [0, 0, 1, 1], [], []>} : vector<8x4xf32>, vector<4x16xf32>, vector<8x16xf32> -> vector<8x16xf32>
    %c3_422 = arith.constant 3 : index
    %c0_423 = arith.constant 0 : index
    %c0_424 = arith.constant 0 : index
    %376 = vector.load %arg4[%c3_422, %c0_423, %c0_424] : memref<4x16x64xf32, #tpu.memory_space<vmem>>, vector<1x16x64xf32>
    %377 = vector.shape_cast %376 : vector<1x16x64xf32> to vector<16x64xf32>
    %cst_425 = arith.constant dense<0.000000e+00> : vector<8x64xf32>
    %378 = tpu.matmul %375, %377, %cst_425 {dimension_numbers = #tpu.dot_dimension_numbers<[1], [0], [0], [1], [0, 0, 1, 1], [], []>} : vector<8x16xf32>, vector<16x64xf32>, vector<8x64xf32> -> vector<8x64xf32>
    %379 = arith.addf %372, %378 : vector<8x64xf32>
    %380 = vector.broadcast %0 : vector<8x1xf32> to vector<8x64xf32>
    %381 = arith.addf %379, %380 : vector<8x64xf32>
    %382 = math.tanh %381 : vector<8x64xf32>
    %c0_426 = arith.constant 0 : index
    %c0_427 = arith.constant 0 : index
    %c10_428 = arith.constant 10 : index
    %c0_429 = arith.constant 0 : index
    %383 = vector.load %arg6[%c0_426, %c0_427, %c10_428, %c0_429] : memref<1x8x16x64xf32, #tpu.memory_space<vmem>>, vector<1x8x1x64xf32>
    %384 = vector.shape_cast %383 : vector<1x8x1x64xf32> to vector<8x64xf32>
    %385 = vector.shape_cast %382 : vector<8x64xf32> to vector<1x8x1x64xf32>
    tpu.vector_store %arg6[%c0_426, %c0_427, %c10_428, %c0_429], %385 {strides = array<i32>} : memref<1x8x16x64xf32, #tpu.memory_space<vmem>>, vector<1x8x1x64xf32>,
    %c0_430 = arith.constant 0 : index
    %c0_431 = arith.constant 0 : index
    %c11 = arith.constant 11 : index
    %c0_432 = arith.constant 0 : index
    %386 = vector.load %arg2[%c0_430, %c0_431, %c11, %c0_432] : memref<1x4x16x16xf32, #tpu.memory_space<vmem>>, vector<1x4x1x16xf32>
    %387 = vector.shape_cast %386 : vector<1x4x1x16xf32> to vector<4x16xf32>
    %c0_433 = arith.constant 0 : index
    %c0_434 = arith.constant 0 : index
    %c0_435 = arith.constant 0 : index
    %388 = vector.load %arg3[%c0_433, %c0_434, %c0_435] : memref<4x8x4xf32, #tpu.memory_space<vmem>>, vector<1x8x4xf32>
    %389 = vector.shape_cast %388 : vector<1x8x4xf32> to vector<8x4xf32>
    %cst_436 = arith.constant dense<0.000000e+00> : vector<8x16xf32>
    %390 = tpu.matmul %389, %387, %cst_436 {dimension_numbers = #tpu.dot_dimension_numbers<[1], [0], [0], [1], [0, 0, 1, 1], [], []>} : vector<8x4xf32>, vector<4x16xf32>, vector<8x16xf32> -> vector<8x16xf32>
    %c0_437 = arith.constant 0 : index
    %c0_438 = arith.constant 0 : index
    %c0_439 = arith.constant 0 : index
    %391 = vector.load %arg4[%c0_437, %c0_438, %c0_439] : memref<4x16x64xf32, #tpu.memory_space<vmem>>, vector<1x16x64xf32>
    %392 = vector.shape_cast %391 : vector<1x16x64xf32> to vector<16x64xf32>
    %cst_440 = arith.constant dense<0.000000e+00> : vector<8x64xf32>
    %393 = tpu.matmul %390, %392, %cst_440 {dimension_numbers = #tpu.dot_dimension_numbers<[1], [0], [0], [1], [0, 0, 1, 1], [], []>} : vector<8x16xf32>, vector<16x64xf32>, vector<8x64xf32> -> vector<8x64xf32>
    %c1_441 = arith.constant 1 : index
    %c0_442 = arith.constant 0 : index
    %c0_443 = arith.constant 0 : index
    %394 = vector.load %arg3[%c1_441, %c0_442, %c0_443] : memref<4x8x4xf32, #tpu.memory_space<vmem>>, vector<1x8x4xf32>
    %395 = vector.shape_cast %394 : vector<1x8x4xf32> to vector<8x4xf32>
    %cst_444 = arith.constant dense<0.000000e+00> : vector<8x16xf32>
    %396 = tpu.matmul %395, %387, %cst_444 {dimension_numbers = #tpu.dot_dimension_numbers<[1], [0], [0], [1], [0, 0, 1, 1], [], []>} : vector<8x4xf32>, vector<4x16xf32>, vector<8x16xf32> -> vector<8x16xf32>
    %c1_445 = arith.constant 1 : index
    %c0_446 = arith.constant 0 : index
    %c0_447 = arith.constant 0 : index
    %397 = vector.load %arg4[%c1_445, %c0_446, %c0_447] : memref<4x16x64xf32, #tpu.memory_space<vmem>>, vector<1x16x64xf32>
    %398 = vector.shape_cast %397 : vector<1x16x64xf32> to vector<16x64xf32>
    %cst_448 = arith.constant dense<0.000000e+00> : vector<8x64xf32>
    %399 = tpu.matmul %396, %398, %cst_448 {dimension_numbers = #tpu.dot_dimension_numbers<[1], [0], [0], [1], [0, 0, 1, 1], [], []>} : vector<8x16xf32>, vector<16x64xf32>, vector<8x64xf32> -> vector<8x64xf32>
    %400 = arith.addf %393, %399 : vector<8x64xf32>
    %c2_449 = arith.constant 2 : index
    %c0_450 = arith.constant 0 : index
    %c0_451 = arith.constant 0 : index
    %401 = vector.load %arg3[%c2_449, %c0_450, %c0_451] : memref<4x8x4xf32, #tpu.memory_space<vmem>>, vector<1x8x4xf32>
    %402 = vector.shape_cast %401 : vector<1x8x4xf32> to vector<8x4xf32>
    %cst_452 = arith.constant dense<0.000000e+00> : vector<8x16xf32>
    %403 = tpu.matmul %402, %387, %cst_452 {dimension_numbers = #tpu.dot_dimension_numbers<[1], [0], [0], [1], [0, 0, 1, 1], [], []>} : vector<8x4xf32>, vector<4x16xf32>, vector<8x16xf32> -> vector<8x16xf32>
    %c2_453 = arith.constant 2 : index
    %c0_454 = arith.constant 0 : index
    %c0_455 = arith.constant 0 : index
    %404 = vector.load %arg4[%c2_453, %c0_454, %c0_455] : memref<4x16x64xf32, #tpu.memory_space<vmem>>, vector<1x16x64xf32>
    %405 = vector.shape_cast %404 : vector<1x16x64xf32> to vector<16x64xf32>
    %cst_456 = arith.constant dense<0.000000e+00> : vector<8x64xf32>
    %406 = tpu.matmul %403, %405, %cst_456 {dimension_numbers = #tpu.dot_dimension_numbers<[1], [0], [0], [1], [0, 0, 1, 1], [], []>} : vector<8x16xf32>, vector<16x64xf32>, vector<8x64xf32> -> vector<8x64xf32>
    %407 = arith.addf %400, %406 : vector<8x64xf32>
    %c3_457 = arith.constant 3 : index
    %c0_458 = arith.constant 0 : index
    %c0_459 = arith.constant 0 : index
    %408 = vector.load %arg3[%c3_457, %c0_458, %c0_459] : memref<4x8x4xf32, #tpu.memory_space<vmem>>, vector<1x8x4xf32>
    %409 = vector.shape_cast %408 : vector<1x8x4xf32> to vector<8x4xf32>
    %cst_460 = arith.constant dense<0.000000e+00> : vector<8x16xf32>
    %410 = tpu.matmul %409, %387, %cst_460 {dimension_numbers = #tpu.dot_dimension_numbers<[1], [0], [0], [1], [0, 0, 1, 1], [], []>} : vector<8x4xf32>, vector<4x16xf32>, vector<8x16xf32> -> vector<8x16xf32>
    %c3_461 = arith.constant 3 : index
    %c0_462 = arith.constant 0 : index
    %c0_463 = arith.constant 0 : index
    %411 = vector.load %arg4[%c3_461, %c0_462, %c0_463] : memref<4x16x64xf32, #tpu.memory_space<vmem>>, vector<1x16x64xf32>
    %412 = vector.shape_cast %411 : vector<1x16x64xf32> to vector<16x64xf32>
    %cst_464 = arith.constant dense<0.000000e+00> : vector<8x64xf32>
    %413 = tpu.matmul %410, %412, %cst_464 {dimension_numbers = #tpu.dot_dimension_numbers<[1], [0], [0], [1], [0, 0, 1, 1], [], []>} : vector<8x16xf32>, vector<16x64xf32>, vector<8x64xf32> -> vector<8x64xf32>
    %414 = arith.addf %407, %413 : vector<8x64xf32>
    %415 = vector.broadcast %0 : vector<8x1xf32> to vector<8x64xf32>
    %416 = arith.addf %414, %415 : vector<8x64xf32>
    %417 = math.tanh %416 : vector<8x64xf32>
    %c0_465 = arith.constant 0 : index
    %c0_466 = arith.constant 0 : index
    %c11_467 = arith.constant 11 : index
    %c0_468 = arith.constant 0 : index
    %418 = vector.load %arg6[%c0_465, %c0_466, %c11_467, %c0_468] : memref<1x8x16x64xf32, #tpu.memory_space<vmem>>, vector<1x8x1x64xf32>
    %419 = vector.shape_cast %418 : vector<1x8x1x64xf32> to vector<8x64xf32>
    %420 = vector.shape_cast %417 : vector<8x64xf32> to vector<1x8x1x64xf32>
    tpu.vector_store %arg6[%c0_465, %c0_466, %c11_467, %c0_468], %420 {strides = array<i32>} : memref<1x8x16x64xf32, #tpu.memory_space<vmem>>, vector<1x8x1x64xf32>,
    %c0_469 = arith.constant 0 : index
    %c0_470 = arith.constant 0 : index
    %c12 = arith.constant 12 : index
    %c0_471 = arith.constant 0 : index
    %421 = vector.load %arg2[%c0_469, %c0_470, %c12, %c0_471] : memref<1x4x16x16xf32, #tpu.memory_space<vmem>>, vector<1x4x1x16xf32>
    %422 = vector.shape_cast %421 : vector<1x4x1x16xf32> to vector<4x16xf32>
    %c0_472 = arith.constant 0 : index
    %c0_473 = arith.constant 0 : index
    %c0_474 = arith.constant 0 : index
    %423 = vector.load %arg3[%c0_472, %c0_473, %c0_474] : memref<4x8x4xf32, #tpu.memory_space<vmem>>, vector<1x8x4xf32>
    %424 = vector.shape_cast %423 : vector<1x8x4xf32> to vector<8x4xf32>
    %cst_475 = arith.constant dense<0.000000e+00> : vector<8x16xf32>
    %425 = tpu.matmul %424, %422, %cst_475 {dimension_numbers = #tpu.dot_dimension_numbers<[1], [0], [0], [1], [0, 0, 1, 1], [], []>} : vector<8x4xf32>, vector<4x16xf32>, vector<8x16xf32> -> vector<8x16xf32>
    %c0_476 = arith.constant 0 : index
    %c0_477 = arith.constant 0 : index
    %c0_478 = arith.constant 0 : index
    %426 = vector.load %arg4[%c0_476, %c0_477, %c0_478] : memref<4x16x64xf32, #tpu.memory_space<vmem>>, vector<1x16x64xf32>
    %427 = vector.shape_cast %426 : vector<1x16x64xf32> to vector<16x64xf32>
    %cst_479 = arith.constant dense<0.000000e+00> : vector<8x64xf32>
    %428 = tpu.matmul %425, %427, %cst_479 {dimension_numbers = #tpu.dot_dimension_numbers<[1], [0], [0], [1], [0, 0, 1, 1], [], []>} : vector<8x16xf32>, vector<16x64xf32>, vector<8x64xf32> -> vector<8x64xf32>
    %c1_480 = arith.constant 1 : index
    %c0_481 = arith.constant 0 : index
    %c0_482 = arith.constant 0 : index
    %429 = vector.load %arg3[%c1_480, %c0_481, %c0_482] : memref<4x8x4xf32, #tpu.memory_space<vmem>>, vector<1x8x4xf32>
    %430 = vector.shape_cast %429 : vector<1x8x4xf32> to vector<8x4xf32>
    %cst_483 = arith.constant dense<0.000000e+00> : vector<8x16xf32>
    %431 = tpu.matmul %430, %422, %cst_483 {dimension_numbers = #tpu.dot_dimension_numbers<[1], [0], [0], [1], [0, 0, 1, 1], [], []>} : vector<8x4xf32>, vector<4x16xf32>, vector<8x16xf32> -> vector<8x16xf32>
    %c1_484 = arith.constant 1 : index
    %c0_485 = arith.constant 0 : index
    %c0_486 = arith.constant 0 : index
    %432 = vector.load %arg4[%c1_484, %c0_485, %c0_486] : memref<4x16x64xf32, #tpu.memory_space<vmem>>, vector<1x16x64xf32>
    %433 = vector.shape_cast %432 : vector<1x16x64xf32> to vector<16x64xf32>
    %cst_487 = arith.constant dense<0.000000e+00> : vector<8x64xf32>
    %434 = tpu.matmul %431, %433, %cst_487 {dimension_numbers = #tpu.dot_dimension_numbers<[1], [0], [0], [1], [0, 0, 1, 1], [], []>} : vector<8x16xf32>, vector<16x64xf32>, vector<8x64xf32> -> vector<8x64xf32>
    %435 = arith.addf %428, %434 : vector<8x64xf32>
    %c2_488 = arith.constant 2 : index
    %c0_489 = arith.constant 0 : index
    %c0_490 = arith.constant 0 : index
    %436 = vector.load %arg3[%c2_488, %c0_489, %c0_490] : memref<4x8x4xf32, #tpu.memory_space<vmem>>, vector<1x8x4xf32>
    %437 = vector.shape_cast %436 : vector<1x8x4xf32> to vector<8x4xf32>
    %cst_491 = arith.constant dense<0.000000e+00> : vector<8x16xf32>
    %438 = tpu.matmul %437, %422, %cst_491 {dimension_numbers = #tpu.dot_dimension_numbers<[1], [0], [0], [1], [0, 0, 1, 1], [], []>} : vector<8x4xf32>, vector<4x16xf32>, vector<8x16xf32> -> vector<8x16xf32>
    %c2_492 = arith.constant 2 : index
    %c0_493 = arith.constant 0 : index
    %c0_494 = arith.constant 0 : index
    %439 = vector.load %arg4[%c2_492, %c0_493, %c0_494] : memref<4x16x64xf32, #tpu.memory_space<vmem>>, vector<1x16x64xf32>
    %440 = vector.shape_cast %439 : vector<1x16x64xf32> to vector<16x64xf32>
    %cst_495 = arith.constant dense<0.000000e+00> : vector<8x64xf32>
    %441 = tpu.matmul %438, %440, %cst_495 {dimension_numbers = #tpu.dot_dimension_numbers<[1], [0], [0], [1], [0, 0, 1, 1], [], []>} : vector<8x16xf32>, vector<16x64xf32>, vector<8x64xf32> -> vector<8x64xf32>
    %442 = arith.addf %435, %441 : vector<8x64xf32>
    %c3_496 = arith.constant 3 : index
    %c0_497 = arith.constant 0 : index
    %c0_498 = arith.constant 0 : index
    %443 = vector.load %arg3[%c3_496, %c0_497, %c0_498] : memref<4x8x4xf32, #tpu.memory_space<vmem>>, vector<1x8x4xf32>
    %444 = vector.shape_cast %443 : vector<1x8x4xf32> to vector<8x4xf32>
    %cst_499 = arith.constant dense<0.000000e+00> : vector<8x16xf32>
    %445 = tpu.matmul %444, %422, %cst_499 {dimension_numbers = #tpu.dot_dimension_numbers<[1], [0], [0], [1], [0, 0, 1, 1], [], []>} : vector<8x4xf32>, vector<4x16xf32>, vector<8x16xf32> -> vector<8x16xf32>
    %c3_500 = arith.constant 3 : index
    %c0_501 = arith.constant 0 : index
    %c0_502 = arith.constant 0 : index
    %446 = vector.load %arg4[%c3_500, %c0_501, %c0_502] : memref<4x16x64xf32, #tpu.memory_space<vmem>>, vector<1x16x64xf32>
    %447 = vector.shape_cast %446 : vector<1x16x64xf32> to vector<16x64xf32>
    %cst_503 = arith.constant dense<0.000000e+00> : vector<8x64xf32>
    %448 = tpu.matmul %445, %447, %cst_503 {dimension_numbers = #tpu.dot_dimension_numbers<[1], [0], [0], [1], [0, 0, 1, 1], [], []>} : vector<8x16xf32>, vector<16x64xf32>, vector<8x64xf32> -> vector<8x64xf32>
    %449 = arith.addf %442, %448 : vector<8x64xf32>
    %450 = vector.broadcast %0 : vector<8x1xf32> to vector<8x64xf32>
    %451 = arith.addf %449, %450 : vector<8x64xf32>
    %452 = math.tanh %451 : vector<8x64xf32>
    %c0_504 = arith.constant 0 : index
    %c0_505 = arith.constant 0 : index
    %c12_506 = arith.constant 12 : index
    %c0_507 = arith.constant 0 : index
    %453 = vector.load %arg6[%c0_504, %c0_505, %c12_506, %c0_507] : memref<1x8x16x64xf32, #tpu.memory_space<vmem>>, vector<1x8x1x64xf32>
    %454 = vector.shape_cast %453 : vector<1x8x1x64xf32> to vector<8x64xf32>
    %455 = vector.shape_cast %452 : vector<8x64xf32> to vector<1x8x1x64xf32>
    tpu.vector_store %arg6[%c0_504, %c0_505, %c12_506, %c0_507], %455 {strides = array<i32>} : memref<1x8x16x64xf32, #tpu.memory_space<vmem>>, vector<1x8x1x64xf32>,
    %c0_508 = arith.constant 0 : index
    %c0_509 = arith.constant 0 : index
    %c13 = arith.constant 13 : index
    %c0_510 = arith.constant 0 : index
    %456 = vector.load %arg2[%c0_508, %c0_509, %c13, %c0_510] : memref<1x4x16x16xf32, #tpu.memory_space<vmem>>, vector<1x4x1x16xf32>
    %457 = vector.shape_cast %456 : vector<1x4x1x16xf32> to vector<4x16xf32>
    %c0_511 = arith.constant 0 : index
    %c0_512 = arith.constant 0 : index
    %c0_513 = arith.constant 0 : index
    %458 = vector.load %arg3[%c0_511, %c0_512, %c0_513] : memref<4x8x4xf32, #tpu.memory_space<vmem>>, vector<1x8x4xf32>
    %459 = vector.shape_cast %458 : vector<1x8x4xf32> to vector<8x4xf32>
    %cst_514 = arith.constant dense<0.000000e+00> : vector<8x16xf32>
    %460 = tpu.matmul %459, %457, %cst_514 {dimension_numbers = #tpu.dot_dimension_numbers<[1], [0], [0], [1], [0, 0, 1, 1], [], []>} : vector<8x4xf32>, vector<4x16xf32>, vector<8x16xf32> -> vector<8x16xf32>
    %c0_515 = arith.constant 0 : index
    %c0_516 = arith.constant 0 : index
    %c0_517 = arith.constant 0 : index
    %461 = vector.load %arg4[%c0_515, %c0_516, %c0_517] : memref<4x16x64xf32, #tpu.memory_space<vmem>>, vector<1x16x64xf32>
    %462 = vector.shape_cast %461 : vector<1x16x64xf32> to vector<16x64xf32>
    %cst_518 = arith.constant dense<0.000000e+00> : vector<8x64xf32>
    %463 = tpu.matmul %460, %462, %cst_518 {dimension_numbers = #tpu.dot_dimension_numbers<[1], [0], [0], [1], [0, 0, 1, 1], [], []>} : vector<8x16xf32>, vector<16x64xf32>, vector<8x64xf32> -> vector<8x64xf32>
    %c1_519 = arith.constant 1 : index
    %c0_520 = arith.constant 0 : index
    %c0_521 = arith.constant 0 : index
    %464 = vector.load %arg3[%c1_519, %c0_520, %c0_521] : memref<4x8x4xf32, #tpu.memory_space<vmem>>, vector<1x8x4xf32>
    %465 = vector.shape_cast %464 : vector<1x8x4xf32> to vector<8x4xf32>
    %cst_522 = arith.constant dense<0.000000e+00> : vector<8x16xf32>
    %466 = tpu.matmul %465, %457, %cst_522 {dimension_numbers = #tpu.dot_dimension_numbers<[1], [0], [0], [1], [0, 0, 1, 1], [], []>} : vector<8x4xf32>, vector<4x16xf32>, vector<8x16xf32> -> vector<8x16xf32>
    %c1_523 = arith.constant 1 : index
    %c0_524 = arith.constant 0 : index
    %c0_525 = arith.constant 0 : index
    %467 = vector.load %arg4[%c1_523, %c0_524, %c0_525] : memref<4x16x64xf32, #tpu.memory_space<vmem>>, vector<1x16x64xf32>
    %468 = vector.shape_cast %467 : vector<1x16x64xf32> to vector<16x64xf32>
    %cst_526 = arith.constant dense<0.000000e+00> : vector<8x64xf32>
    %469 = tpu.matmul %466, %468, %cst_526 {dimension_numbers = #tpu.dot_dimension_numbers<[1], [0], [0], [1], [0, 0, 1, 1], [], []>} : vector<8x16xf32>, vector<16x64xf32>, vector<8x64xf32> -> vector<8x64xf32>
    %470 = arith.addf %463, %469 : vector<8x64xf32>
    %c2_527 = arith.constant 2 : index
    %c0_528 = arith.constant 0 : index
    %c0_529 = arith.constant 0 : index
    %471 = vector.load %arg3[%c2_527, %c0_528, %c0_529] : memref<4x8x4xf32, #tpu.memory_space<vmem>>, vector<1x8x4xf32>
    %472 = vector.shape_cast %471 : vector<1x8x4xf32> to vector<8x4xf32>
    %cst_530 = arith.constant dense<0.000000e+00> : vector<8x16xf32>
    %473 = tpu.matmul %472, %457, %cst_530 {dimension_numbers = #tpu.dot_dimension_numbers<[1], [0], [0], [1], [0, 0, 1, 1], [], []>} : vector<8x4xf32>, vector<4x16xf32>, vector<8x16xf32> -> vector<8x16xf32>
    %c2_531 = arith.constant 2 : index
    %c0_532 = arith.constant 0 : index
    %c0_533 = arith.constant 0 : index
    %474 = vector.load %arg4[%c2_531, %c0_532, %c0_533] : memref<4x16x64xf32, #tpu.memory_space<vmem>>, vector<1x16x64xf32>
    %475 = vector.shape_cast %474 : vector<1x16x64xf32> to vector<16x64xf32>
    %cst_534 = arith.constant dense<0.000000e+00> : vector<8x64xf32>
    %476 = tpu.matmul %473, %475, %cst_534 {dimension_numbers = #tpu.dot_dimension_numbers<[1], [0], [0], [1], [0, 0, 1, 1], [], []>} : vector<8x16xf32>, vector<16x64xf32>, vector<8x64xf32> -> vector<8x64xf32>
    %477 = arith.addf %470, %476 : vector<8x64xf32>
    %c3_535 = arith.constant 3 : index
    %c0_536 = arith.constant 0 : index
    %c0_537 = arith.constant 0 : index
    %478 = vector.load %arg3[%c3_535, %c0_536, %c0_537] : memref<4x8x4xf32, #tpu.memory_space<vmem>>, vector<1x8x4xf32>
    %479 = vector.shape_cast %478 : vector<1x8x4xf32> to vector<8x4xf32>
    %cst_538 = arith.constant dense<0.000000e+00> : vector<8x16xf32>
    %480 = tpu.matmul %479, %457, %cst_538 {dimension_numbers = #tpu.dot_dimension_numbers<[1], [0], [0], [1], [0, 0, 1, 1], [], []>} : vector<8x4xf32>, vector<4x16xf32>, vector<8x16xf32> -> vector<8x16xf32>
    %c3_539 = arith.constant 3 : index
    %c0_540 = arith.constant 0 : index
    %c0_541 = arith.constant 0 : index
    %481 = vector.load %arg4[%c3_539, %c0_540, %c0_541] : memref<4x16x64xf32, #tpu.memory_space<vmem>>, vector<1x16x64xf32>
    %482 = vector.shape_cast %481 : vector<1x16x64xf32> to vector<16x64xf32>
    %cst_542 = arith.constant dense<0.000000e+00> : vector<8x64xf32>
    %483 = tpu.matmul %480, %482, %cst_542 {dimension_numbers = #tpu.dot_dimension_numbers<[1], [0], [0], [1], [0, 0, 1, 1], [], []>} : vector<8x16xf32>, vector<16x64xf32>, vector<8x64xf32> -> vector<8x64xf32>
    %484 = arith.addf %477, %483 : vector<8x64xf32>
    %485 = vector.broadcast %0 : vector<8x1xf32> to vector<8x64xf32>
    %486 = arith.addf %484, %485 : vector<8x64xf32>
    %487 = math.tanh %486 : vector<8x64xf32>
    %c0_543 = arith.constant 0 : index
    %c0_544 = arith.constant 0 : index
    %c13_545 = arith.constant 13 : index
    %c0_546 = arith.constant 0 : index
    %488 = vector.load %arg6[%c0_543, %c0_544, %c13_545, %c0_546] : memref<1x8x16x64xf32, #tpu.memory_space<vmem>>, vector<1x8x1x64xf32>
    %489 = vector.shape_cast %488 : vector<1x8x1x64xf32> to vector<8x64xf32>
    %490 = vector.shape_cast %487 : vector<8x64xf32> to vector<1x8x1x64xf32>
    tpu.vector_store %arg6[%c0_543, %c0_544, %c13_545, %c0_546], %490 {strides = array<i32>} : memref<1x8x16x64xf32, #tpu.memory_space<vmem>>, vector<1x8x1x64xf32>,
    %c0_547 = arith.constant 0 : index
    %c0_548 = arith.constant 0 : index
    %c14 = arith.constant 14 : index
    %c0_549 = arith.constant 0 : index
    %491 = vector.load %arg2[%c0_547, %c0_548, %c14, %c0_549] : memref<1x4x16x16xf32, #tpu.memory_space<vmem>>, vector<1x4x1x16xf32>
    %492 = vector.shape_cast %491 : vector<1x4x1x16xf32> to vector<4x16xf32>
    %c0_550 = arith.constant 0 : index
    %c0_551 = arith.constant 0 : index
    %c0_552 = arith.constant 0 : index
    %493 = vector.load %arg3[%c0_550, %c0_551, %c0_552] : memref<4x8x4xf32, #tpu.memory_space<vmem>>, vector<1x8x4xf32>
    %494 = vector.shape_cast %493 : vector<1x8x4xf32> to vector<8x4xf32>
    %cst_553 = arith.constant dense<0.000000e+00> : vector<8x16xf32>
    %495 = tpu.matmul %494, %492, %cst_553 {dimension_numbers = #tpu.dot_dimension_numbers<[1], [0], [0], [1], [0, 0, 1, 1], [], []>} : vector<8x4xf32>, vector<4x16xf32>, vector<8x16xf32> -> vector<8x16xf32>
    %c0_554 = arith.constant 0 : index
    %c0_555 = arith.constant 0 : index
    %c0_556 = arith.constant 0 : index
    %496 = vector.load %arg4[%c0_554, %c0_555, %c0_556] : memref<4x16x64xf32, #tpu.memory_space<vmem>>, vector<1x16x64xf32>
    %497 = vector.shape_cast %496 : vector<1x16x64xf32> to vector<16x64xf32>
    %cst_557 = arith.constant dense<0.000000e+00> : vector<8x64xf32>
    %498 = tpu.matmul %495, %497, %cst_557 {dimension_numbers = #tpu.dot_dimension_numbers<[1], [0], [0], [1], [0, 0, 1, 1], [], []>} : vector<8x16xf32>, vector<16x64xf32>, vector<8x64xf32> -> vector<8x64xf32>
    %c1_558 = arith.constant 1 : index
    %c0_559 = arith.constant 0 : index
    %c0_560 = arith.constant 0 : index
    %499 = vector.load %arg3[%c1_558, %c0_559, %c0_560] : memref<4x8x4xf32, #tpu.memory_space<vmem>>, vector<1x8x4xf32>
    %500 = vector.shape_cast %499 : vector<1x8x4xf32> to vector<8x4xf32>
    %cst_561 = arith.constant dense<0.000000e+00> : vector<8x16xf32>
    %501 = tpu.matmul %500, %492, %cst_561 {dimension_numbers = #tpu.dot_dimension_numbers<[1], [0], [0], [1], [0, 0, 1, 1], [], []>} : vector<8x4xf32>, vector<4x16xf32>, vector<8x16xf32> -> vector<8x16xf32>
    %c1_562 = arith.constant 1 : index
    %c0_563 = arith.constant 0 : index
    %c0_564 = arith.constant 0 : index
    %502 = vector.load %arg4[%c1_562, %c0_563, %c0_564] : memref<4x16x64xf32, #tpu.memory_space<vmem>>, vector<1x16x64xf32>
    %503 = vector.shape_cast %502 : vector<1x16x64xf32> to vector<16x64xf32>
    %cst_565 = arith.constant dense<0.000000e+00> : vector<8x64xf32>
    %504 = tpu.matmul %501, %503, %cst_565 {dimension_numbers = #tpu.dot_dimension_numbers<[1], [0], [0], [1], [0, 0, 1, 1], [], []>} : vector<8x16xf32>, vector<16x64xf32>, vector<8x64xf32> -> vector<8x64xf32>
    %505 = arith.addf %498, %504 : vector<8x64xf32>
    %c2_566 = arith.constant 2 : index
    %c0_567 = arith.constant 0 : index
    %c0_568 = arith.constant 0 : index
    %506 = vector.load %arg3[%c2_566, %c0_567, %c0_568] : memref<4x8x4xf32, #tpu.memory_space<vmem>>, vector<1x8x4xf32>
    %507 = vector.shape_cast %506 : vector<1x8x4xf32> to vector<8x4xf32>
    %cst_569 = arith.constant dense<0.000000e+00> : vector<8x16xf32>
    %508 = tpu.matmul %507, %492, %cst_569 {dimension_numbers = #tpu.dot_dimension_numbers<[1], [0], [0], [1], [0, 0, 1, 1], [], []>} : vector<8x4xf32>, vector<4x16xf32>, vector<8x16xf32> -> vector<8x16xf32>
    %c2_570 = arith.constant 2 : index
    %c0_571 = arith.constant 0 : index
    %c0_572 = arith.constant 0 : index
    %509 = vector.load %arg4[%c2_570, %c0_571, %c0_572] : memref<4x16x64xf32, #tpu.memory_space<vmem>>, vector<1x16x64xf32>
    %510 = vector.shape_cast %509 : vector<1x16x64xf32> to vector<16x64xf32>
    %cst_573 = arith.constant dense<0.000000e+00> : vector<8x64xf32>
    %511 = tpu.matmul %508, %510, %cst_573 {dimension_numbers = #tpu.dot_dimension_numbers<[1], [0], [0], [1], [0, 0, 1, 1], [], []>} : vector<8x16xf32>, vector<16x64xf32>, vector<8x64xf32> -> vector<8x64xf32>
    %512 = arith.addf %505, %511 : vector<8x64xf32>
    %c3_574 = arith.constant 3 : index
    %c0_575 = arith.constant 0 : index
    %c0_576 = arith.constant 0 : index
    %513 = vector.load %arg3[%c3_574, %c0_575, %c0_576] : memref<4x8x4xf32, #tpu.memory_space<vmem>>, vector<1x8x4xf32>
    %514 = vector.shape_cast %513 : vector<1x8x4xf32> to vector<8x4xf32>
    %cst_577 = arith.constant dense<0.000000e+00> : vector<8x16xf32>
    %515 = tpu.matmul %514, %492, %cst_577 {dimension_numbers = #tpu.dot_dimension_numbers<[1], [0], [0], [1], [0, 0, 1, 1], [], []>} : vector<8x4xf32>, vector<4x16xf32>, vector<8x16xf32> -> vector<8x16xf32>
    %c3_578 = arith.constant 3 : index
    %c0_579 = arith.constant 0 : index
    %c0_580 = arith.constant 0 : index
    %516 = vector.load %arg4[%c3_578, %c0_579, %c0_580] : memref<4x16x64xf32, #tpu.memory_space<vmem>>, vector<1x16x64xf32>
    %517 = vector.shape_cast %516 : vector<1x16x64xf32> to vector<16x64xf32>
    %cst_581 = arith.constant dense<0.000000e+00> : vector<8x64xf32>
    %518 = tpu.matmul %515, %517, %cst_581 {dimension_numbers = #tpu.dot_dimension_numbers<[1], [0], [0], [1], [0, 0, 1, 1], [], []>} : vector<8x16xf32>, vector<16x64xf32>, vector<8x64xf32> -> vector<8x64xf32>
    %519 = arith.addf %512, %518 : vector<8x64xf32>
    %520 = vector.broadcast %0 : vector<8x1xf32> to vector<8x64xf32>
    %521 = arith.addf %519, %520 : vector<8x64xf32>
    %522 = math.tanh %521 : vector<8x64xf32>
    %c0_582 = arith.constant 0 : index
    %c0_583 = arith.constant 0 : index
    %c14_584 = arith.constant 14 : index
    %c0_585 = arith.constant 0 : index
    %523 = vector.load %arg6[%c0_582, %c0_583, %c14_584, %c0_585] : memref<1x8x16x64xf32, #tpu.memory_space<vmem>>, vector<1x8x1x64xf32>
    %524 = vector.shape_cast %523 : vector<1x8x1x64xf32> to vector<8x64xf32>
    %525 = vector.shape_cast %522 : vector<8x64xf32> to vector<1x8x1x64xf32>
    tpu.vector_store %arg6[%c0_582, %c0_583, %c14_584, %c0_585], %525 {strides = array<i32>} : memref<1x8x16x64xf32, #tpu.memory_space<vmem>>, vector<1x8x1x64xf32>,
    %c0_586 = arith.constant 0 : index
    %c0_587 = arith.constant 0 : index
    %c15 = arith.constant 15 : index
    %c0_588 = arith.constant 0 : index
    %526 = vector.load %arg2[%c0_586, %c0_587, %c15, %c0_588] : memref<1x4x16x16xf32, #tpu.memory_space<vmem>>, vector<1x4x1x16xf32>
    %527 = vector.shape_cast %526 : vector<1x4x1x16xf32> to vector<4x16xf32>
    %c0_589 = arith.constant 0 : index
    %c0_590 = arith.constant 0 : index
    %c0_591 = arith.constant 0 : index
    %528 = vector.load %arg3[%c0_589, %c0_590, %c0_591] : memref<4x8x4xf32, #tpu.memory_space<vmem>>, vector<1x8x4xf32>
    %529 = vector.shape_cast %528 : vector<1x8x4xf32> to vector<8x4xf32>
    %cst_592 = arith.constant dense<0.000000e+00> : vector<8x16xf32>
    %530 = tpu.matmul %529, %527, %cst_592 {dimension_numbers = #tpu.dot_dimension_numbers<[1], [0], [0], [1], [0, 0, 1, 1], [], []>} : vector<8x4xf32>, vector<4x16xf32>, vector<8x16xf32> -> vector<8x16xf32>
    %c0_593 = arith.constant 0 : index
    %c0_594 = arith.constant 0 : index
    %c0_595 = arith.constant 0 : index
    %531 = vector.load %arg4[%c0_593, %c0_594, %c0_595] : memref<4x16x64xf32, #tpu.memory_space<vmem>>, vector<1x16x64xf32>
    %532 = vector.shape_cast %531 : vector<1x16x64xf32> to vector<16x64xf32>
    %cst_596 = arith.constant dense<0.000000e+00> : vector<8x64xf32>
    %533 = tpu.matmul %530, %532, %cst_596 {dimension_numbers = #tpu.dot_dimension_numbers<[1], [0], [0], [1], [0, 0, 1, 1], [], []>} : vector<8x16xf32>, vector<16x64xf32>, vector<8x64xf32> -> vector<8x64xf32>
    %c1_597 = arith.constant 1 : index
    %c0_598 = arith.constant 0 : index
    %c0_599 = arith.constant 0 : index
    %534 = vector.load %arg3[%c1_597, %c0_598, %c0_599] : memref<4x8x4xf32, #tpu.memory_space<vmem>>, vector<1x8x4xf32>
    %535 = vector.shape_cast %534 : vector<1x8x4xf32> to vector<8x4xf32>
    %cst_600 = arith.constant dense<0.000000e+00> : vector<8x16xf32>
    %536 = tpu.matmul %535, %527, %cst_600 {dimension_numbers = #tpu.dot_dimension_numbers<[1], [0], [0], [1], [0, 0, 1, 1], [], []>} : vector<8x4xf32>, vector<4x16xf32>, vector<8x16xf32> -> vector<8x16xf32>
    %c1_601 = arith.constant 1 : index
    %c0_602 = arith.constant 0 : index
    %c0_603 = arith.constant 0 : index
    %537 = vector.load %arg4[%c1_601, %c0_602, %c0_603] : memref<4x16x64xf32, #tpu.memory_space<vmem>>, vector<1x16x64xf32>
    %538 = vector.shape_cast %537 : vector<1x16x64xf32> to vector<16x64xf32>
    %cst_604 = arith.constant dense<0.000000e+00> : vector<8x64xf32>
    %539 = tpu.matmul %536, %538, %cst_604 {dimension_numbers = #tpu.dot_dimension_numbers<[1], [0], [0], [1], [0, 0, 1, 1], [], []>} : vector<8x16xf32>, vector<16x64xf32>, vector<8x64xf32> -> vector<8x64xf32>
    %540 = arith.addf %533, %539 : vector<8x64xf32>
    %c2_605 = arith.constant 2 : index
    %c0_606 = arith.constant 0 : index
    %c0_607 = arith.constant 0 : index
    %541 = vector.load %arg3[%c2_605, %c0_606, %c0_607] : memref<4x8x4xf32, #tpu.memory_space<vmem>>, vector<1x8x4xf32>
    %542 = vector.shape_cast %541 : vector<1x8x4xf32> to vector<8x4xf32>
    %cst_608 = arith.constant dense<0.000000e+00> : vector<8x16xf32>
    %543 = tpu.matmul %542, %527, %cst_608 {dimension_numbers = #tpu.dot_dimension_numbers<[1], [0], [0], [1], [0, 0, 1, 1], [], []>} : vector<8x4xf32>, vector<4x16xf32>, vector<8x16xf32> -> vector<8x16xf32>
    %c2_609 = arith.constant 2 : index
    %c0_610 = arith.constant 0 : index
    %c0_611 = arith.constant 0 : index
    %544 = vector.load %arg4[%c2_609, %c0_610, %c0_611] : memref<4x16x64xf32, #tpu.memory_space<vmem>>, vector<1x16x64xf32>
    %545 = vector.shape_cast %544 : vector<1x16x64xf32> to vector<16x64xf32>
    %cst_612 = arith.constant dense<0.000000e+00> : vector<8x64xf32>
    %546 = tpu.matmul %543, %545, %cst_612 {dimension_numbers = #tpu.dot_dimension_numbers<[1], [0], [0], [1], [0, 0, 1, 1], [], []>} : vector<8x16xf32>, vector<16x64xf32>, vector<8x64xf32> -> vector<8x64xf32>
    %547 = arith.addf %540, %546 : vector<8x64xf32>
    %c3_613 = arith.constant 3 : index
    %c0_614 = arith.constant 0 : index
    %c0_615 = arith.constant 0 : index
    %548 = vector.load %arg3[%c3_613, %c0_614, %c0_615] : memref<4x8x4xf32, #tpu.memory_space<vmem>>, vector<1x8x4xf32>
    %549 = vector.shape_cast %548 : vector<1x8x4xf32> to vector<8x4xf32>
    %cst_616 = arith.constant dense<0.000000e+00> : vector<8x16xf32>
    %550 = tpu.matmul %549, %527, %cst_616 {dimension_numbers = #tpu.dot_dimension_numbers<[1], [0], [0], [1], [0, 0, 1, 1], [], []>} : vector<8x4xf32>, vector<4x16xf32>, vector<8x16xf32> -> vector<8x16xf32>
    %c3_617 = arith.constant 3 : index
    %c0_618 = arith.constant 0 : index
    %c0_619 = arith.constant 0 : index
    %551 = vector.load %arg4[%c3_617, %c0_618, %c0_619] : memref<4x16x64xf32, #tpu.memory_space<vmem>>, vector<1x16x64xf32>
    %552 = vector.shape_cast %551 : vector<1x16x64xf32> to vector<16x64xf32>
    %cst_620 = arith.constant dense<0.000000e+00> : vector<8x64xf32>
    %553 = tpu.matmul %550, %552, %cst_620 {dimension_numbers = #tpu.dot_dimension_numbers<[1], [0], [0], [1], [0, 0, 1, 1], [], []>} : vector<8x16xf32>, vector<16x64xf32>, vector<8x64xf32> -> vector<8x64xf32>
    %554 = arith.addf %547, %553 : vector<8x64xf32>
    %555 = vector.broadcast %0 : vector<8x1xf32> to vector<8x64xf32>
    %556 = arith.addf %554, %555 : vector<8x64xf32>
    %557 = math.tanh %556 : vector<8x64xf32>
    %c0_621 = arith.constant 0 : index
    %c0_622 = arith.constant 0 : index
    %c15_623 = arith.constant 15 : index
    %c0_624 = arith.constant 0 : index
    %558 = vector.load %arg6[%c0_621, %c0_622, %c15_623, %c0_624] : memref<1x8x16x64xf32, #tpu.memory_space<vmem>>, vector<1x8x1x64xf32>
    %559 = vector.shape_cast %558 : vector<1x8x1x64xf32> to vector<8x64xf32>
    %560 = vector.shape_cast %557 : vector<8x64xf32> to vector<1x8x1x64xf32>
    tpu.vector_store %arg6[%c0_621, %c0_622, %c15_623, %c0_624], %560 {strides = array<i32>} : memref<1x8x16x64xf32, #tpu.memory_space<vmem>>, vector<1x8x1x64xf32>,
    return
  }
  func.func @transform_0(%arg0: i32, %arg1: i32) -> (i32, i32, i32, i32) {
    %c0_i32 = arith.constant 0 : i32
    %c0_i32_0 = arith.constant 0 : i32
    %c0_i32_1 = arith.constant 0 : i32
    return %arg1, %c0_i32, %arg0, %c0_i32_0 : i32, i32, i32, i32
  }
  func.func @transform_1(%arg0: i32, %arg1: i32) -> (i32, i32, i32) {
    %c0_i32 = arith.constant 0 : i32
    %c0_i32_0 = arith.constant 0 : i32
    %c0_i32_1 = arith.constant 0 : i32
    %c0_i32_2 = arith.constant 0 : i32
    return %c0_i32, %c0_i32_0, %c0_i32_1 : i32, i32, i32
  }
  func.func @transform_2(%arg0: i32, %arg1: i32) -> (i32, i32, i32) {
    %c0_i32 = arith.constant 0 : i32
    %c0_i32_0 = arith.constant 0 : i32
    %c0_i32_1 = arith.constant 0 : i32
    %c0_i32_2 = arith.constant 0 : i32
    return %c0_i32, %c0_i32_0, %c0_i32_1 : i32, i32, i32
  }
  func.func @transform_3(%arg0: i32, %arg1: i32) -> (i32, i32) {
    %c0_i32 = arith.constant 0 : i32
    %c0_i32_0 = arith.constant 0 : i32
    %c0_i32_1 = arith.constant 0 : i32
    return %c0_i32, %c0_i32_0 : i32, i32
  }
  func.func @transform_4(%arg0: i32, %arg1: i32) -> (i32, i32, i32, i32) {
    %c0_i32 = arith.constant 0 : i32
    %c0_i32_0 = arith.constant 0 : i32
    %c0_i32_1 = arith.constant 0 : i32
    return %arg1, %c0_i32, %arg0, %c0_i32_0 : i32, i32, i32, i32
  }
}

</mosaic_0001>

<bundles_post_ra>
// kernel: tpu_custom_call.1
= control target key start
LH: loop header
LB: loop body
LE: loop exit
PB: predicated region body
PF: predicated region fallthrough
CT: control target
= control target key end

     0   :  { %s14554_s0 = inlined_call_operand.hbm [shape: f32[2,4,16,16], index: 0, kind: input, shape index: {}]   ;;  %s14555_s1 = inlined_call_operand.vmem [shape: f32[4,8,4], index: 1, kind: input, shape index: {}]   ;;  %s14556_s2 = inlined_call_operand.hbm [shape: f32[4,16,64], index: 2, kind: input, shape index: {}]   ;;  %s14557_s3 = inlined_call_operand.vmem [shape: f32[8,1], index: 3, kind: input, shape index: {}]   ;;  %s14558_s4 = inlined_call_operand.hbm [shape: f32[2,8,16,64], index: 4, kind: output, shape index: {}]  }
   0x1   :  { %14562 = sst [smem:[#allocation11_spill]] %s14556_s2 }
   0x2   :  { %9 = vsyncpa [#allocation3], 0 }
   0x3   :  { %11 = vsyncpa [#allocation3 + $0x1], 0 }
   0x4   :  { %12 = vsyncpa [#allocation6], 0 }
   0x5   :  { %13 = vsyncpa [#allocation4], 0 }
   0x6   :  { %15 = vsyncpa [#allocation4 + $0x1], 0  ;;  %s12932_s15 = smov 0   ;;  %s12934_s16 = smov 0  }
   0x7   :  { %s12936_s17 = smov 0   ;;  %s12938_s18 = smov 0  }
   0x8   :  { %s12940_s19 = smov 0   ;;  %s12942_s20 = smov 0  }
   0x9 LB: > { %s11295_s21 = sadd.s32 4294967295, %s12894_s20   ;;  %s11296_s22 = sadd.s32 4294967294, %s12894_s20   ;;  %s12894_s20 = sphi %s12942_s20, %s21_s20   ;;  %s12890_s19 = sphi %s12940_s19, %s14582_s19   ;;  %s12886_s18 = sphi %s12938_s18, %s14581_s18   ;;  %s12882_s17 = sphi %s12936_s17, %s14580_s17   ;;  %s12878_s16 = sphi %s12934_s16, %s14579_s16   ;;  %s12874_s15 = sphi %s12932_s15, %s14578_s15  }
   0xa   : > { %p55_p0 = scmp.ne.s32.totalorder %s12878_s16, %s12874_s15  ;;  %p12966_p1 = scmp.eq.s32.totalorder %s11295_s21, 0 }
   0xb   : > { %p12970_p2 = scmp.eq.s32.totalorder %s11295_s21, 1  ;;  %p150_p3 = scmp.eq.s32.totalorder %s11296_s22, 1 }
   0xc   : > { %p12976_p4 = por %p12966_p1, %p55_p0  ;;  %p11297_p5 = scmp.ge.s32.totalorder %s12894_s20, 1 }
   0xd   : > { %p12981_p6 = por %p150_p3, %p55_p0  ;;  %p157_p7 = scmp.lt.s32.totalorder %s12894_s20, 3 }
   0xe   : > { %s14565_s25 = scalar_select %p12976_p4, 1, 0 }
   0xf   : > { %s14566_s26 = scalar_select %p12981_p6, 1, 0 }
  0x10   : > { %p12986_p8 = pnand %p11297_p5, %p157_p7  ;;  %s12896_s28 = smov [#allocation5]  }
  0x11   : > { %s172_s29 = sshll.u32 %s12896_s28, 4  ;;  %s30_s5 = sadd.s32 1, %s12890_s19  ;;  %s173_s29 = int_to_ptr.vmem [resolvable:$true] %s172_s29 }
  0x12   : > { %p12650_p9 = pneg %p12986_p8  ;;  %s12767_s6 = scalar_lea.vmem %s173_s29, 1024 }
  0x13   : > { %p12768_p13 = scmp.ne.s32.totalorder %s173_s29, %s12767_s6  ;;  %p12775_p5 = scmp.lt.s32.totalorder %s173_s29, %s173_s29 }
  0x14   : > { %p12995_p11 = pnand %p12650_p9, %p12966_p1  ;;  %p12776_p7 = scmp.lt.s32.totalorder %s12767_s6, %s12767_s6 }
  0x16   : > { %p12758_p12 = pneg %p12995_p11  ;;  %p12777_p6 = por %p12776_p7, %p12775_p5 }
  0x18   : > { %p12770_p0 = pnand %p12768_p13, %p12758_p12 }
  0x1a   : > { %p12771_p3 = pneg %p12770_p0 }
  0x1c   : > { %p12778_p4 = pnand %p12777_p6, %p12771_p3 }
  0x1e   : > { %12781 = shalt.err (!%p12778_p4)
}
  0x1f   : > { %s14560_s7 = smov 128   ;;  %s14561_s8 = smov 8  }
  0x20   : > { %s14569_s2 = sld [smem:[#allocation11_spill]]  ;;  %p31_p4 = scmp.ge.s32.totalorder %s30_s5, 2 }
  0x21   : > { %s42_s11 = sadd.s32 1, %s12882_s17  ;;  %p49_p6 = scmp.ne.s32.totalorder %s12882_s17, %s12878_s16 }
  0x22   : > { %p50_p9 = scmp.eq.s32.totalorder %s12894_s20, 0  ;;  %s14584_s5 = smov (%p31_p4, %s30_s5), 0 }
  0x23   : > { %p13022_p13 = por %p12970_p2, %p49_p6  ;;  %s37_s14 = ssub.s32 %s12890_s19, %s14584_s5 }
  0x24   : > { %p13016_p12 = por %p50_p9, %p49_p6  ;;  %p12663_p0 = scmp.lt.s32.totalorder %s12894_s20, 2 }
  0x25   : > { %s189_s21 = sand.u32 1, %s12882_s17  }
  0x26   : > { %12653 = dma.hbm_to_vmem [thread:$0]  (!%p12995_p11), %s14569_s2, 1024, %s173_s29, [#allocation6], %s14560_s7, %s14560_s7, %s14561_s8  }
  0x27   : > { %p40_p11 = scmp.eq.s32.totalorder %s37_s14, 0  ;;  %s11300_s22 = sshll.u32 %s189_s21, 6 }
  0x28   : > { %s11552_s29 = sshll.u32 %s12890_s19, 10  ;;  %s193_s10 = scalar_lea.vmem [#allocation2], %s11300_s22 }
  0x29   : > { %s13031_s28 = scalar_select %p40_p11, %s12882_s17, %s42_s11  }
  0x2a   : > { %s201_s9 = scalar_lea.hbm %s14554_s0, %s11552_s29  ;;  %s202_s7 = sshll.u32 %s193_s10, 4  ;;  %s203_s7 = int_to_ptr.vmem [resolvable:$true] %s202_s7 }
  0x2b   : > { %p13039_p2 = pnand %p12663_p0, %p13016_p12  ;;  %s190_s8 = scalar_lea.sflag [#allocation3], %s189_s21 }
  0x2c   : > { %s12795_s14 = scalar_lea.vmem %s203_s7, 1024  ;;  %s12899_s11 = smov [#allocation2]  }
  0x2d   : > { %p12784_p3 = pneg %p13039_p2  ;;  %p12796_p5 = scmp.ne.s32.totalorder %s203_s7, %s12795_s14 }
  0x2e   : > { %s12800_s2 = sshll.u32 %s12899_s11, 4  ;;  %s12801_s2 = int_to_ptr.vmem [resolvable:$false] %s12800_s2 }
  0x2f   : > { %p12798_p7 = pnand %p12796_p5, %p12784_p3  ;;  %s12802_s29 = scalar_lea.vmem %s12801_s2, 2048 }
  0x30   : > { %p12803_p6 = scmp.lt.s32.totalorder %s203_s7, %s12801_s2  ;;  %p12804_p9 = scmp.lt.s32.totalorder %s12802_s29, %s12795_s14 }
  0x31   : > { %p12799_p4 = pneg %p12798_p7 }
  0x32   : > { %p12805_p11 = por %p12804_p9, %p12803_p6 }
  0x34   : > { %p12806_p10 = pnand %p12805_p11, %p12799_p4 }
  0x36   : > { %12809 = shalt.err (!%p12806_p10)
}
  0x37   : > { %s14573_s12 = smov 8   ;;  %s14574_s22 = smov 128  }
  0x38   : > { %12657 = dma.hbm_to_vmem [thread:$0]  (!%p13039_p2), %s201_s9, 1024, %s203_s7, %s190_s8, %s14574_s22, %s14574_s22, %s14573_s12  }
  0x39   : > { %214 = sbr.rel (%p12986_p8) target bundleno = 6672 (0x1a10), region = 36  ;;  %s13053_s21 = sand.u32 (!%p12986_p8), 1, %s12878_s16  }
  0x3a   : > { %s11304_s2 = sshll.u32 (!%p12986_p8), %s13053_s21, 6  ;;  %s217_s30 = scalar_lea.sflag (!%p12986_p8), [#allocation3], %s13053_s21 }
  0x3b   : > { %s13057_s6 = scalar_lea.vmem (!%p12986_p8), [#allocation2], %s11304_s2  ;;  %p14575_p10 = scmp.ne.s32.totalorder (!%p12986_p8), %s14565_s25, 0 }
  0x3e   : > { %12861 = dma.done.wait (%p14575_p10), %s217_s30, 1024  }
  0x3f   : > { %12863 = vsyncadd (%p14575_p10), %s217_s30, 4294966272 }
  0x40   : > { %12865 = dma.done.wait (%p12966_p1), [#allocation6], 1024  }
  0x41   : > { %12867 = vsyncadd (%p12966_p1), [#allocation6], 4294966272  ;;  %v12900_v0 = vmov 0.0   ;;  %vm12901_vm0 = vmmov 0   ;;  %vm262_vm1 = vcmask 1041409   ;;  %vm265_vm2 = vcmask 1042434  }
  0x42   : > { %11874 = vmatprep.subr.mxu0 %v12900_v0  ;;  %11879 = vmatprep.subr.mxu1 %v12900_v0  ;;  %v252_v1 = vld [vmem:[%s13057_s6] sm:$0x1]  ;;  %v253_v2 = vld [vmem:[%s13057_s6 + $0x10] sm:$0x1]  ;;  %vm268_vm3 = vcmask 1043459   ;;  %vm274_vm4 = vcmask 1043456   ;;  %v890_v62 = vlaneseq }
  0x43   : > { %11876 = vmatprep.mubr.msk.f32.mxu0 %vm12901_vm0, %v12900_v0  ;;  %11881 = vmatprep.mubr.msk.f32.mxu1 %vm12901_vm0, %v12900_v0  ;;  %v254_v3 = vld [vmem:[%s13057_s6 + $0x20] sm:$0x1]  ;;  %v255_v4 = vld [vmem:[%s13057_s6 + $0x30] sm:$0x1]  ;;  %v261_v5 = vrot.slane %v253_v2, 7  ;;  %vm270_vm5 = vcmask 31744  }
  0x44   : > { %v264_v6 = vrot.slane %v254_v3, 6  ;;  %v267_v7 = vrot.slane %v255_v4, 5  ;;  %v13082_v10 = vld [vmem:[%s14555_s1] sm:$0xff]  ;;  %v13087_v11 = vld [vmem:[%s14555_s1 + $0x8] sm:$0xff]  ;;  %v13092_v13 = vld [vmem:[#allocation5 + $0x18] sm:$0xff]  ;;  %vm427_vm6 = vcmask 130048  }
  0x45   : > { %v263_v8 = vsel %vm262_vm1, %v261_v5, %v252_v1  ;;  %v13094_v14 = vld [vmem:[#allocation5 + $0x8] sm:$0xff]  ;;  %v13102_v15 = vld [vmem:[#allocation5 + $0x10] sm:$0xff]  ;;  %v13114_v16 = vld [vmem:[#allocation5] sm:$0xff]  ;;  %v12902_v36 = vmov 0   ;;  %v12903_v60 = vmov 1966171168  }
  0x46   : > { %v266_v9 = vsel %vm265_vm2, %v264_v6, %v263_v8  ;;  %v13126_v20 = vld [vmem:[%s14555_s1 + $0x10] sm:$0xff]  ;;  %v13139_v22 = vld [vmem:[%s14555_s1 + $0x18] sm:$0xff]  ;;  %v13146_v23 = vld [vmem:[#allocation5 + $0x28] sm:$0xff]  ;;  %12723 = vset.pattern.permute.xlu0 %v12902_v36  ;;  %v888_v61 = vunpack.c.l.s4 %v12903_v60  ;;  %v891_v1 = vshrl.u32 %v890_v62, 7  ;;  %s11306_s29 = sshll.u32 %s13053_s21, 7  ;;  %vm943_vm7 = vcmask 516096  }
  0x47   : > { %v269_v12 = vsel %vm268_vm3, %v267_v7, %v266_v9  ;;  %v13149_v24 = vld [vmem:[#allocation5 + $0x20] sm:$0xff]  ;;  %v953_v25 = vld [vmem:[%s13057_s6 + $0x11] sm:$0x1]  ;;  %v13177_v42 = vld [vmem:[#allocation5 + $0x38] sm:$0xff]  ;;  %s13237_s12 = scalar_lea.vmem [#allocation7], %s11306_s29  ;;  %s11553_s27 = sshll.u32 %s12886_s18, 11 }
  0x48   : > { %11875 = vmatpush3.msk.msra.mxu0 %vm274_vm4, %v269_v12  ;;  %11880 = vmatpush3.msk.msra.mxu1 %vm274_vm4, %v269_v12  ;;  %v954_v26 = vld [vmem:[%s13057_s6 + $0x21] sm:$0x1]  ;;  %v961_v27 = vrot.slane %v953_v25, 7  ;;  %v955_v29 = vld [vmem:[%s13057_s6 + $0x31] sm:$0x1]  ;;  %v889_v63 = vunpack.c.0.s8 %v888_v61  ;;  %s11198_s7 = sshll.u32 %s13237_s12, 4  ;;  %s14496_s10 = scalar_lea.hbm %s14558_s4, %s11553_s27  ;;  %s14498_s7 = int_to_ptr.vmem [resolvable:$true] %s11198_s7 }
  0x49   : > { %11877 = vmatmul.mubr.msk.f32.vlgmr.msra.gmra.mxu0 %vm270_vm5, %v13082_v10  ;;  %11882 = vmatmul.mubr.msk.f32.vlgmr.msra.gmra.mxu1 %vm270_vm5, %v13087_v11  ;;  %v952_v28 = vld [vmem:[%s13057_s6 + $0x1] sm:$0x1]  ;;  %v963_v30 = vrot.slane %v954_v26, 6  ;;  %v965_v32 = vrot.slane %v955_v29, 5  ;;  %v13180_v44 = vld [vmem:[#allocation5 + $0x30] sm:$0xff]  ;;  %s11183_s18 = scalar_lea.sflag [#allocation4], %s13053_s21 }
  0x4a   : > { %11884 = vmatprep.subr.mxu0 %v12900_v0  ;;  %11891 = vmatprep.subr.mxu1 %v12900_v0  ;;  %v962_v31 = vsel %vm262_vm1, %v961_v27, %v952_v28  ;;  %v251_v35 = vld [vmem:[%s14557_s3] sm:$0xff]  ;;  %v13229_v2 = vsub.s32 %v889_v63, %v891_v1  ;;  %v1635_v29 = vld [vmem:[%s13057_s6 + $0x12] sm:$0x1]  ;;  %s12810_s24 = scalar_lea.vmem %s14498_s7, 2048  ;;  %s12904_s14 = smov [#allocation7]  }
  0x4b   : > { %11885 = vmatpush3.msra.mxu0 %v13092_v13  ;;  %11892 = vmatpush3.msra.mxu1 %v13094_v14  ;;  %v964_v33 = vsel %vm265_vm2, %v963_v30, %v962_v31  ;;  %v1636_v30 = vld [vmem:[%s13057_s6 + $0x22] sm:$0x1]  ;;  %v1643_v31 = vrot.slane %v1635_v29, 7  ;;  %p12811_p1 = scmp.ne.s32.totalorder %s14498_s7, %s12810_s24  ;;  %s12814_s11 = sshll.u32 %s12904_s14, 4  ;;  %s12815_s11 = int_to_ptr.vmem [resolvable:$false] %s12814_s11 }
  0x4c   : > { %11886 = vmatprep.subr.mxu0 %v12900_v0  ;;  %11893 = vmatprep.subr.mxu1 %v12900_v0  ;;  %v13161_v34 = vsel %vm268_vm3, %v965_v32, %v964_v33  ;;  %v1634_v32 = vld [vmem:[%s13057_s6 + $0x2] sm:$0x1]  ;;  %v1637_v33 = vld [vmem:[%s13057_s6 + $0x32] sm:$0x1]  ;;  %s12816_s29 = scalar_lea.vmem %s12815_s11, 4096  ;;  %p12817_p0 = scmp.lt.s32.totalorder %s14498_s7, %s12815_s11 }
  0x4d   : > { %11887 = vmatpush3.msra.mxu0 %v13102_v15  ;;  %11888 = vmatprep.mubr.msk.f32.mxu0 %vm12901_vm0, %v12900_v0  ;;  %v1647_v36 = vrot.slane %v1637_v33, 5  ;;  %p12812_p8 = pnand %p12811_p1, %p13022_p13  ;;  %p12818_p2 = scmp.lt.s32.totalorder %s12816_s29, %s12810_s24 }
  0x4e   : > { %11895 = vmatprep.mubr.msk.f32.mxu1 %vm12901_vm0, %v12900_v0  ;;  %11898 = vmatprep.subr.mxu0 %v12900_v0 }
  0x4f   : > { %11894 = vmatpush3.msra.mxu1 %v13114_v16  ;;  %880 = vperm.xlu0 %12723, %v251_v35   ;;  %v1644_v35 = vsel %vm262_vm1, %v1643_v31, %v1634_v32  ;;  %p12813_p12 = pneg %p12812_p8  ;;  %p12819_p3 = por %p12818_p2, %p12817_p0 }
  0x50   : > { %11903 = vmatprep.subr.mxu1 %v12900_v0 }
  0x51   : > { %p12820_p5 = pnand %p12819_p3, %p12813_p12 }
  0xca   : > { %v13209_v54 = vpop.permute.xlu0 %880 }
 0x109   : > { %v343_v17 = vpop.f32.mrf.mxu0  ;;  %v420_v18 = vpop.f32.mrf.mxu1 }
 0x10a   : > { %11889 = vmatmul.mubr.msk.f32.vlgmr.msra.gmra.mxu0 %vm427_vm6, %v420_v18  ;;  %11896 = vmatmul.mubr.msk.f32.vlgmr.msra.gmra.mxu1 %vm427_vm6, %v343_v17 }
 0x10b   : > { %11899 = vmatpush3.msk.msra.mxu0 %vm274_vm4, %v269_v12  ;;  %v11883_v19 = vpop.f32.mrf.mxu1  ;;  %11900 = vmatprep.mubr.msk.f32.mxu0 %vm12901_vm0, %v12900_v0  ;;  %v11878_v21 = vpop.f32.mrf.mxu0 }
 0x10c   : > { %11910 = vmatprep.subr.mxu0 %v12900_v0  ;;  %11907 = vmatprep.mubr.msk.f32.mxu1 %vm12901_vm0, %v12900_v0 }
 0x10d   : > { %11904 = vmatpush3.msra.mxu1 %v13146_v23 }
 0x10e   : > { %11901 = vmatmul.mubr.msk.f32.vlgmr.msra.gmra.mxu0 %vm270_vm5, %v13126_v20  ;;  %11905 = vmatprep.subr.mxu1 %v12900_v0 }
 0x10f   : > { %11911 = vmatpush3.msk.msra.mxu0 %vm274_vm4, %v269_v12  ;;  %11912 = vmatprep.mubr.msk.f32.mxu0 %vm12901_vm0, %v12900_v0 }
 0x110   : > { %11922 = vmatprep.subr.mxu0 %v12900_v0  ;;  %11906 = vmatpush3.msra.mxu1 %v13149_v24 }
 0x111   : > { %11915 = vmatprep.subr.mxu1 %v12900_v0 }
 0x112   : > { %11913 = vmatmul.mubr.msk.f32.vlgmr.msra.gmra.mxu0 %vm270_vm5, %v13139_v22 }
 0x113   : > { %11924 = vmatprep.mubr.msk.f32.mxu0 %vm12901_vm0, %v12900_v0  ;;  %11923 = vmatpush3.msk.msra.mxu0 %vm274_vm4, %v13161_v34 }
 0x114   : > { %11932 = vmatprep.subr.mxu0 %v12900_v0 }
 0x116   : > { %11925 = vmatmul.mubr.msk.f32.vlgmr.msra.gmra.mxu0 %vm270_vm5, %v13082_v10 }
 0x117   : > { %11933 = vmatpush3.msra.mxu0 %v13092_v13  ;;  %11936 = vmatprep.mubr.msk.f32.mxu0 %vm12901_vm0, %v12900_v0 }
 0x118   : > { %11934 = vmatprep.subr.mxu0 %v12900_v0 }
 0x119   : > { %11935 = vmatpush3.msra.mxu0 %v13102_v15 }
 0x11a   : > { %11946 = vmatprep.subr.mxu0 %v12900_v0 }
 0x1ca   : > { %v497_v37 = vpop.f32.mrf.mxu0  ;;  %v570_v38 = vpop.f32.mrf.mxu1 }
 0x1cb   : > { %v571_v39 = vadd.f32 %v570_v38, %v497_v37 }
 0x1cc   : > { %v11890_v40 = vpop.f32.mrf.mxu0  ;;  %v11897_v41 = vpop.f32.mrf.mxu1 }
 0x1ce   : > { %v645_v43 = vpop.f32.mrf.mxu0 }
 0x1cf   : > { %11908 = vmatmul.mubr.msk.f32.vlgmr.msra.gmra.mxu1 %vm427_vm6, %v645_v43 }
 0x1d0   : > { %11916 = vmatpush3.msra.mxu1 %v13177_v42  ;;  %v11902_v45 = vpop.f32.mrf.mxu0  ;;  %11919 = vmatprep.mubr.msk.f32.mxu1 %vm12901_vm0, %v12900_v0 }
 0x1d1   : > { %11917 = vmatprep.subr.mxu1 %v12900_v0 }
 0x1d2   : > { %11918 = vmatpush3.msra.mxu1 %v13180_v44  ;;  %v797_v46 = vpop.f32.mrf.mxu0 }
 0x1d3   : > { %11927 = vmatprep.subr.mxu1 %v12900_v0  ;;  %11920 = vmatmul.mubr.msk.f32.vlgmr.msra.gmra.mxu1 %vm427_vm6, %v797_v46 }
 0x1d4   : > { %11928 = vmatpush3.msk.msra.mxu1 %vm274_vm4, %v13161_v34  ;;  %v11914_v47 = vpop.f32.mrf.mxu0  ;;  %11929 = vmatprep.mubr.msk.f32.mxu1 %vm12901_vm0, %v12900_v0 }
 0x1d5   : > { %11939 = vmatprep.subr.mxu1 %v12900_v0 }
 0x1d6   : > { %v1038_v48 = vpop.f32.mrf.mxu0 }
 0x1d7   : > { %11930 = vmatmul.mubr.msk.f32.vlgmr.msra.gmra.mxu1 %vm270_vm5, %v13087_v11 }
 0x1d8   : > { %11940 = vmatpush3.msra.mxu1 %v13094_v14  ;;  %11943 = vmatprep.mubr.msk.f32.mxu1 %vm12901_vm0, %v12900_v0  ;;  %v11926_v49 = vpop.f32.mrf.mxu0 }
 0x1d9   : > { %11941 = vmatprep.subr.mxu1 %v12900_v0 }
 0x1da   : > { %11942 = vmatpush3.msra.mxu1 %v13114_v16 }
 0x1db   : > { %11951 = vmatprep.subr.mxu1 %v12900_v0  ;;  %11944 = vmatmul.mubr.msk.f32.vlgmr.msra.gmra.mxu1 %vm427_vm6, %v1038_v48 }
 0x1dc   : > { %11952 = vmatpush3.msra.mxu1 %v13146_v23  ;;  %11955 = vmatprep.mubr.msk.f32.mxu1 %vm12901_vm0, %v12900_v0 }
 0x1dd   : > { %11953 = vmatprep.subr.mxu1 %v12900_v0 }
 0x1de   : > { %11954 = vmatpush3.msra.mxu1 %v13149_v24 }
 0x1df   : > { %11963 = vmatprep.subr.mxu1 %v12900_v0 }
 0x28f   : > { %v721_v50 = vpop.f32.mrf.mxu1 }
 0x290   : > { %v725_v52 = vadd.f32 %v721_v50, %v571_v39 }
 0x291   : > { %v11909_v51 = vpop.f32.mrf.mxu1 }
 0x293   : > { %v873_v53 = vpop.f32.mrf.mxu1 }
 0x294   : > { %v877_v55 = vadd.f32 %v873_v53, %v725_v52 }
 0x295   : > { %v11921_v56 = vpop.f32.mrf.mxu1 }
 0x296   : > { %v883_v57 = vadd.f32 %v13209_v54, %v877_v55 }
 0x297   : > { %v1114_v58 = vpop.f32.mrf.mxu1 }
 0x298   : > { %12724 = vtanh.f32 %v883_v57  ;;  %11937 = vmatmul.mubr.msk.f32.vlgmr.msra.gmra.mxu0 %vm427_vm6, %v1114_v58 }
 0x299   : > { %11947 = vmatpush3.msk.msra.mxu0 %vm274_vm4, %v13161_v34  ;;  %v11931_v59 = vpop.f32.mrf.mxu1  ;;  %11948 = vmatprep.mubr.msk.f32.mxu0 %vm12901_vm0, %v12900_v0 }
 0x29a   : > { %11958 = vmatprep.subr.mxu0 %v12900_v0 }
 0x29b   : > { %v1262_v27 = vpop.f32.mrf.mxu1 }
 0x29c   : > { %11949 = vmatmul.mubr.msk.f32.vlgmr.msra.gmra.mxu0 %vm270_vm5, %v13126_v20 }
 0x29d   : > { %11959 = vmatpush3.msk.msra.mxu0 %vm274_vm4, %v13161_v34  ;;  %11960 = vmatprep.mubr.msk.f32.mxu0 %vm12901_vm0, %v12900_v0  ;;  %v11945_v28 = vpop.f32.mrf.mxu1  ;;  %v1645_v34 = vrot.slane %v1636_v30, 6 }
 0x29e   : > { %11970 = vmatprep.subr.mxu0 %v12900_v0  ;;  %v2319_v28 = vld [vmem:[%s13057_s6 + $0x33] sm:$0x1] }
 0x29f   : > { %v1646_v37 = vsel %vm265_vm2, %v1645_v34, %v1644_v35  ;;  %v2329_v31 = vrot.slane %v2319_v28, 5 }
 0x2a0   : > { %11961 = vmatmul.mubr.msk.f32.vlgmr.msra.gmra.mxu0 %vm270_vm5, %v13139_v22  ;;  %v1648_v38 = vsel %vm268_vm3, %v1647_v36, %v1646_v37 }
 0x2a1   : > { %11972 = vmatprep.mubr.msk.f32.mxu0 %vm12901_vm0, %v12900_v0  ;;  %11971 = vmatpush3.msk.msra.mxu0 %vm274_vm4, %v1648_v38 }
 0x2a2   : > { %11980 = vmatprep.subr.mxu0 %v12900_v0 }
 0x2a4   : > { %11973 = vmatmul.mubr.msk.f32.vlgmr.msra.gmra.mxu0 %vm270_vm5, %v13082_v10 }
 0x2a5   : > { %v12725_v3 = vpop.eup %12724  ;;  %11981 = vmatpush3.msra.mxu0 %v13092_v13  ;;  %11984 = vmatprep.mubr.msk.f32.mxu0 %vm12901_vm0, %v12900_v0 }
 0x2a6   : > { %v886_v4 = vcombine.high %v12725_v3, %v12725_v3  ;;  %v893_v5 = vrot.slane %v12725_v3, %v13229_v2  ;;  %11982 = vmatprep.subr.mxu0 %v12900_v0 }
 0x2a7   : > { %11983 = vmatpush3.msra.mxu0 %v13102_v15 }
 0x2a8   : > { %v900_v6 = vrot.slane %v886_v4, %v13229_v2  ;;  %v901_v7 = vcombine.high %v893_v5, %v893_v5  ;;  %v909_v8 = vrot.slane %v893_v5, %v13229_v2  ;;  %11994 = vmatprep.subr.mxu0 %v12900_v0 }
 0x2aa   : > { %v902_v9 = vcombine.high %v900_v6, %v900_v6  ;;  %v916_v12 = vrot.slane %v900_v6, %v13229_v2  ;;  %v923_v17 = vrot.slane %v901_v7, %v13229_v2  ;;  %v931_v18 = vcombine.high %v909_v8, %v909_v8  ;;  %944 = vst.msk [vmem:[%s13237_s12] sm:$0x1] %vm943_vm7, %v909_v8 }
 0x2ac   : > { %v930_v19 = vrot.slane %v902_v9, %v13229_v2  ;;  %v932_v21 = vcombine.high %v916_v12, %v916_v12  ;;  %v933_v25 = vcombine.high %v923_v17, %v923_v17  ;;  %945 = vst.msk [vmem:[%s13237_s12 + $0x10] sm:$0x1] %vm943_vm7, %v923_v17  ;;  %946 = vst.msk [vmem:[%s13237_s12 + $0x20] sm:$0x1] %vm943_vm7, %v931_v18 }
 0x2ad   : > { %948 = vst.msk [vmem:[%s13237_s12 + $0x40] sm:$0x1] %vm943_vm7, %v916_v12 }
 0x2ae   : > { %v934_v26 = vcombine.high %v930_v19, %v930_v19  ;;  %947 = vst.msk [vmem:[%s13237_s12 + $0x30] sm:$0x1] %vm943_vm7, %v933_v25  ;;  %949 = vst.msk [vmem:[%s13237_s12 + $0x50] sm:$0x1] %vm943_vm7, %v930_v19  ;;  %v2318_v25 = vld [vmem:[%s13057_s6 + $0x23] sm:$0x1] }
 0x2af   : > { %950 = vst.msk [vmem:[%s13237_s12 + $0x60] sm:$0x1] %vm943_vm7, %v932_v21  ;;  %v2317_v21 = vld [vmem:[%s13057_s6 + $0x13] sm:$0x1]  ;;  %v2327_v29 = vrot.slane %v2318_v25, 6 }
 0x2b0   : > { %951 = vst.msk [vmem:[%s13237_s12 + $0x70] sm:$0x1] %vm943_vm7, %v934_v26  ;;  %v2325_v26 = vrot.slane %v2317_v21, 7 }
 0x358   : > { %v1189_v39 = vpop.f32.mrf.mxu0 }
 0x359   : > { %v1263_v50 = vadd.f32 %v1262_v27, %v1189_v39  ;;  %v2316_v27 = vld [vmem:[%s13057_s6 + $0x3] sm:$0x1] }
 0x35a   : > { %v11938_v40 = vpop.f32.mrf.mxu0  ;;  %v2326_v30 = vsel %vm262_vm1, %v2325_v26, %v2316_v27 }
 0x35b   : > { %v2328_v32 = vsel %vm265_vm2, %v2327_v29, %v2326_v30 }
 0x35c   : > { %v1336_v41 = vpop.f32.mrf.mxu0  ;;  %v2330_v33 = vsel %vm268_vm3, %v2329_v31, %v2328_v32 }
 0x35d   : > { %11956 = vmatmul.mubr.msk.f32.vlgmr.msra.gmra.mxu1 %vm427_vm6, %v1336_v41 }
 0x35e   : > { %11964 = vmatpush3.msra.mxu1 %v13177_v42  ;;  %v11950_v43 = vpop.f32.mrf.mxu0  ;;  %11967 = vmatprep.mubr.msk.f32.mxu1 %vm12901_vm0, %v12900_v0 }
 0x35f   : > { %11965 = vmatprep.subr.mxu1 %v12900_v0 }
 0x360   : > { %11966 = vmatpush3.msra.mxu1 %v13180_v44  ;;  %v1486_v45 = vpop.f32.mrf.mxu0 }
 0x361   : > { %11975 = vmatprep.subr.mxu1 %v12900_v0  ;;  %11968 = vmatmul.mubr.msk.f32.vlgmr.msra.gmra.mxu1 %vm427_vm6, %v1486_v45 }
 0x362   : > { %11976 = vmatpush3.msk.msra.mxu1 %vm274_vm4, %v1648_v38  ;;  %v11962_v46 = vpop.f32.mrf.mxu0  ;;  %11977 = vmatprep.mubr.msk.f32.mxu1 %vm12901_vm0, %v12900_v0 }
 0x363   : > { %11987 = vmatprep.subr.mxu1 %v12900_v0 }
 0x364   : > { %v1720_v47 = vpop.f32.mrf.mxu0 }
 0x365   : > { %11978 = vmatmul.mubr.msk.f32.vlgmr.msra.gmra.mxu1 %vm270_vm5, %v13087_v11 }
 0x366   : > { %11988 = vmatpush3.msra.mxu1 %v13094_v14  ;;  %11991 = vmatprep.mubr.msk.f32.mxu1 %vm12901_vm0, %v12900_v0  ;;  %v11974_v48 = vpop.f32.mrf.mxu0 }
 0x367   : > { %11989 = vmatprep.subr.mxu1 %v12900_v0 }
 0x368   : > { %11990 = vmatpush3.msra.mxu1 %v13114_v16 }
 0x369   : > { %11999 = vmatprep.subr.mxu1 %v12900_v0  ;;  %11992 = vmatmul.mubr.msk.f32.vlgmr.msra.gmra.mxu1 %vm427_vm6, %v1720_v47 }
 0x36a   : > { %12000 = vmatpush3.msra.mxu1 %v13146_v23  ;;  %12003 = vmatprep.mubr.msk.f32.mxu1 %vm12901_vm0, %v12900_v0 }
 0x36b   : > { %12001 = vmatprep.subr.mxu1 %v12900_v0 }
 0x36c   : > { %12002 = vmatpush3.msra.mxu1 %v13149_v24 }
 0x36d   : > { %12011 = vmatprep.subr.mxu1 %v12900_v0 }
 0x41d   : > { %v1411_v49 = vpop.f32.mrf.mxu1 }
 0x41e   : > { %v1415_v52 = vadd.f32 %v1411_v49, %v1263_v50 }
 0x41f   : > { %v11957_v51 = vpop.f32.mrf.mxu1 }
 0x421   : > { %v1561_v53 = vpop.f32.mrf.mxu1 }
 0x422   : > { %v1565_v55 = vadd.f32 %v1561_v53, %v1415_v52 }
 0x423   : > { %v11969_v56 = vpop.f32.mrf.mxu1 }
 0x424   : > { %v1566_v57 = vadd.f32 %v1565_v55, %v13209_v54 }
 0x425   : > { %v1796_v58 = vpop.f32.mrf.mxu1 }
 0x426   : > { %12726 = vtanh.f32 %v1566_v57  ;;  %11985 = vmatmul.mubr.msk.f32.vlgmr.msra.gmra.mxu0 %vm427_vm6, %v1796_v58 }
 0x427   : > { %11995 = vmatpush3.msk.msra.mxu0 %vm274_vm4, %v1648_v38  ;;  %v11979_v59 = vpop.f32.mrf.mxu1  ;;  %11996 = vmatprep.mubr.msk.f32.mxu0 %vm12901_vm0, %v12900_v0 }
 0x428   : > { %12006 = vmatprep.subr.mxu0 %v12900_v0 }
 0x429   : > { %v1944_v18 = vpop.f32.mrf.mxu1 }
 0x42a   : > { %11997 = vmatmul.mubr.msk.f32.vlgmr.msra.gmra.mxu0 %vm270_vm5, %v13126_v20 }
 0x42b   : > { %12007 = vmatpush3.msk.msra.mxu0 %vm274_vm4, %v1648_v38  ;;  %12008 = vmatprep.mubr.msk.f32.mxu0 %vm12901_vm0, %v12900_v0  ;;  %v11993_v19 = vpop.f32.mrf.mxu1 }
 0x42c   : > { %12018 = vmatprep.subr.mxu0 %v12900_v0  ;;  %v3001_v19 = vld [vmem:[%s13057_s6 + $0x34] sm:$0x1] }
 0x42d   : > { %v3011_v26 = vrot.slane %v3001_v19, 5 }
 0x42e   : > { %12009 = vmatmul.mubr.msk.f32.vlgmr.msra.gmra.mxu0 %vm270_vm5, %v13139_v22 }
 0x42f   : > { %12020 = vmatprep.mubr.msk.f32.mxu0 %vm12901_vm0, %v12900_v0  ;;  %12019 = vmatpush3.msk.msra.mxu0 %vm274_vm4, %v2330_v33 }
 0x430   : > { %12028 = vmatprep.subr.mxu0 %v12900_v0 }
 0x432   : > { %12021 = vmatmul.mubr.msk.f32.vlgmr.msra.gmra.mxu0 %vm270_vm5, %v13082_v10 }
 0x433   : > { %v12727_v60 = vpop.eup %12726  ;;  %12029 = vmatpush3.msra.mxu0 %v13092_v13  ;;  %12032 = vmatprep.mubr.msk.f32.mxu0 %vm12901_vm0, %v12900_v0 }
 0x434   : > { %v1569_v61 = vcombine.high %v12727_v60, %v12727_v60  ;;  %v1576_v62 = vrot.slane %v12727_v60, %v13229_v2  ;;  %12030 = vmatprep.subr.mxu0 %v12900_v0 }
 0x435   : > { %12031 = vmatpush3.msra.mxu0 %v13102_v15 }
 0x436   : > { %v1583_v63 = vrot.slane %v1569_v61, %v13229_v2  ;;  %v1584_v1 = vcombine.high %v1576_v62, %v1576_v62  ;;  %v1592_v3 = vrot.slane %v1576_v62, %v13229_v2  ;;  %12042 = vmatprep.subr.mxu0 %v12900_v0 }
 0x438   : > { %v1585_v4 = vcombine.high %v1583_v63, %v1583_v63  ;;  %v1599_v5 = vrot.slane %v1583_v63, %v13229_v2  ;;  %v1606_v6 = vrot.slane %v1584_v1, %v13229_v2  ;;  %v1614_v7 = vcombine.high %v1592_v3, %v1592_v3  ;;  %1626 = vst.msk [vmem:[%s13237_s12 + $0x1] sm:$0x1] %vm943_vm7, %v1592_v3 }
 0x43a   : > { %v1613_v8 = vrot.slane %v1585_v4, %v13229_v2  ;;  %v1615_v9 = vcombine.high %v1599_v5, %v1599_v5  ;;  %v1616_v12 = vcombine.high %v1606_v6, %v1606_v6  ;;  %1627 = vst.msk [vmem:[%s13237_s12 + $0x11] sm:$0x1] %vm943_vm7, %v1606_v6  ;;  %1628 = vst.msk [vmem:[%s13237_s12 + $0x21] sm:$0x1] %vm943_vm7, %v1614_v7 }
 0x43b   : > { %1630 = vst.msk [vmem:[%s13237_s12 + $0x41] sm:$0x1] %vm943_vm7, %v1599_v5 }
 0x43c   : > { %v1617_v17 = vcombine.high %v1613_v8, %v1613_v8  ;;  %1629 = vst.msk [vmem:[%s13237_s12 + $0x31] sm:$0x1] %vm943_vm7, %v1616_v12  ;;  %1631 = vst.msk [vmem:[%s13237_s12 + $0x51] sm:$0x1] %vm943_vm7, %v1613_v8  ;;  %v3000_v12 = vld [vmem:[%s13057_s6 + $0x24] sm:$0x1] }
 0x43d   : > { %1632 = vst.msk [vmem:[%s13237_s12 + $0x61] sm:$0x1] %vm943_vm7, %v1615_v9  ;;  %v2999_v9 = vld [vmem:[%s13057_s6 + $0x14] sm:$0x1]  ;;  %v3009_v21 = vrot.slane %v3000_v12, 6 }
 0x43e   : > { %1633 = vst.msk [vmem:[%s13237_s12 + $0x71] sm:$0x1] %vm943_vm7, %v1617_v17  ;;  %v3007_v17 = vrot.slane %v2999_v9, 7 }
 0x4e6   : > { %v1871_v34 = vpop.f32.mrf.mxu0 }
 0x4e7   : > { %v1945_v45 = vadd.f32 %v1944_v18, %v1871_v34  ;;  %v2998_v18 = vld [vmem:[%s13057_s6 + $0x4] sm:$0x1] }
 0x4e8   : > { %v11986_v35 = vpop.f32.mrf.mxu0  ;;  %v3008_v25 = vsel %vm262_vm1, %v3007_v17, %v2998_v18  ;;  %v13538_v17 = vld [vmem:[#allocation5 + $0x10] sm:$0xff]  ;;  %v13541_v18 = vld [vmem:[#allocation5] sm:$0xff] }
 0x4e9   : > { %v3010_v27 = vsel %vm265_vm2, %v3009_v21, %v3008_v25 }
 0x4ea   : > { %v2018_v36 = vpop.f32.mrf.mxu0  ;;  %v3012_v28 = vsel %vm268_vm3, %v3011_v26, %v3010_v27 }
 0x4eb   : > { %12004 = vmatmul.mubr.msk.f32.vlgmr.msra.gmra.mxu1 %vm427_vm6, %v2018_v36 }
 0x4ec   : > { %12012 = vmatpush3.msra.mxu1 %v13177_v42  ;;  %v11998_v37 = vpop.f32.mrf.mxu0  ;;  %12015 = vmatprep.mubr.msk.f32.mxu1 %vm12901_vm0, %v12900_v0 }
 0x4ed   : > { %12013 = vmatprep.subr.mxu1 %v12900_v0 }
 0x4ee   : > { %12014 = vmatpush3.msra.mxu1 %v13180_v44  ;;  %v2168_v38 = vpop.f32.mrf.mxu0 }
 0x4ef   : > { %12023 = vmatprep.subr.mxu1 %v12900_v0  ;;  %12016 = vmatmul.mubr.msk.f32.vlgmr.msra.gmra.mxu1 %vm427_vm6, %v2168_v38 }
 0x4f0   : > { %12024 = vmatpush3.msk.msra.mxu1 %vm274_vm4, %v2330_v33  ;;  %v12010_v39 = vpop.f32.mrf.mxu0  ;;  %12025 = vmatprep.mubr.msk.f32.mxu1 %vm12901_vm0, %v12900_v0 }
 0x4f1   : > { %12035 = vmatprep.subr.mxu1 %v12900_v0 }
 0x4f2   : > { %v2402_v40 = vpop.f32.mrf.mxu0 }
 0x4f3   : > { %12026 = vmatmul.mubr.msk.f32.vlgmr.msra.gmra.mxu1 %vm270_vm5, %v13087_v11 }
 0x4f4   : > { %12036 = vmatpush3.msra.mxu1 %v13094_v14  ;;  %12039 = vmatprep.mubr.msk.f32.mxu1 %vm12901_vm0, %v12900_v0  ;;  %v12022_v41 = vpop.f32.mrf.mxu0 }
 0x4f5   : > { %12037 = vmatprep.subr.mxu1 %v12900_v0 }
 0x4f6   : > { %12038 = vmatpush3.msra.mxu1 %v13114_v16 }
 0x4f7   : > { %12047 = vmatprep.subr.mxu1 %v12900_v0  ;;  %12040 = vmatmul.mubr.msk.f32.vlgmr.msra.gmra.mxu1 %vm427_vm6, %v2402_v40 }
 0x4f8   : > { %12048 = vmatpush3.msra.mxu1 %v13146_v23  ;;  %12051 = vmatprep.mubr.msk.f32.mxu1 %vm12901_vm0, %v12900_v0 }
 0x4f9   : > { %12049 = vmatprep.subr.mxu1 %v12900_v0 }
 0x4fa   : > { %12050 = vmatpush3.msra.mxu1 %v13149_v24 }
 0x4fb   : > { %12059 = vmatprep.subr.mxu1 %v12900_v0 }
 0x5ab   : > { %v2093_v43 = vpop.f32.mrf.mxu1 }
 0x5ac   : > { %v2097_v47 = vadd.f32 %v2093_v43, %v1945_v45 }
 0x5ad   : > { %v12005_v46 = vpop.f32.mrf.mxu1 }
 0x5af   : > { %v2243_v48 = vpop.f32.mrf.mxu1 }
 0x5b0   : > { %v2247_v49 = vadd.f32 %v2243_v48, %v2097_v47 }
 0x5b1   : > { %v12017_v50 = vpop.f32.mrf.mxu1 }
 0x5b2   : > { %v2248_v51 = vadd.f32 %v2247_v49, %v13209_v54 }
 0x5b3   : > { %v2478_v52 = vpop.f32.mrf.mxu1 }
 0x5b4   : > { %12728 = vtanh.f32 %v2248_v51  ;;  %12033 = vmatmul.mubr.msk.f32.vlgmr.msra.gmra.mxu0 %vm427_vm6, %v2478_v52 }
 0x5b5   : > { %12043 = vmatpush3.msk.msra.mxu0 %vm274_vm4, %v2330_v33  ;;  %v12027_v53 = vpop.f32.mrf.mxu1  ;;  %12044 = vmatprep.mubr.msk.f32.mxu0 %vm12901_vm0, %v12900_v0 }
 0x5b6   : > { %12054 = vmatprep.subr.mxu0 %v12900_v0 }
 0x5b7   : > { %v2626_v7 = vpop.f32.mrf.mxu1 }
 0x5b8   : > { %12045 = vmatmul.mubr.msk.f32.vlgmr.msra.gmra.mxu0 %vm270_vm5, %v13126_v20 }
 0x5b9   : > { %12055 = vmatpush3.msk.msra.mxu0 %vm274_vm4, %v2330_v33  ;;  %12056 = vmatprep.mubr.msk.f32.mxu0 %vm12901_vm0, %v12900_v0  ;;  %v12041_v8 = vpop.f32.mrf.mxu1 }
 0x5ba   : > { %12066 = vmatprep.subr.mxu0 %v12900_v0 }
 0x5bc   : > { %12057 = vmatmul.mubr.msk.f32.vlgmr.msra.gmra.mxu0 %vm270_vm5, %v13139_v22 }
 0x5bd   : > { %12068 = vmatprep.mubr.msk.f32.mxu0 %vm12901_vm0, %v12900_v0  ;;  %12067 = vmatpush3.msk.msra.mxu0 %vm274_vm4, %v3012_v28 }
 0x5be   : > { %12076 = vmatprep.subr.mxu0 %v12900_v0 }
 0x5c0   : > { %12069 = vmatmul.mubr.msk.f32.vlgmr.msra.gmra.mxu0 %vm270_vm5, %v13082_v10 }
 0x5c1   : > { %v12729_v55 = vpop.eup %12728  ;;  %12077 = vmatpush3.msra.mxu0 %v13092_v13  ;;  %12080 = vmatprep.mubr.msk.f32.mxu0 %vm12901_vm0, %v12900_v0 }
 0x5c2   : > { %v2251_v56 = vcombine.high %v12729_v55, %v12729_v55  ;;  %v2258_v57 = vrot.slane %v12729_v55, %v13229_v2  ;;  %12078 = vmatprep.subr.mxu0 %v12900_v0 }
 0x5c3   : > { %12079 = vmatpush3.msra.mxu0 %v13102_v15 }
 0x5c4   : > { %v2265_v58 = vrot.slane %v2251_v56, %v13229_v2  ;;  %v2266_v59 = vcombine.high %v2258_v57, %v2258_v57  ;;  %v2274_v60 = vrot.slane %v2258_v57, %v13229_v2  ;;  %12090 = vmatprep.subr.mxu0 %v12900_v0 }
 0x5c6   : > { %v2267_v61 = vcombine.high %v2265_v58, %v2265_v58  ;;  %v2281_v62 = vrot.slane %v2265_v58, %v13229_v2  ;;  %v2288_v63 = vrot.slane %v2266_v59, %v13229_v2  ;;  %v2296_v1 = vcombine.high %v2274_v60, %v2274_v60  ;;  %2308 = vst.msk [vmem:[%s13237_s12 + $0x2] sm:$0x1] %vm943_vm7, %v2274_v60  ;;  %v3681_v58 = vld [vmem:[%s13057_s6 + $0x15] sm:$0x1]  ;;  %v3682_v59 = vld [vmem:[%s13057_s6 + $0x25] sm:$0x1] }
 0x5c7   : > { %v3689_v60 = vrot.slane %v3681_v58, 7  ;;  %v13615_v58 = vld [vmem:[%s14555_s1] sm:$0xff] }
 0x5c8   : > { %v2295_v3 = vrot.slane %v2267_v61, %v13229_v2  ;;  %v2297_v4 = vcombine.high %v2281_v62, %v2281_v62  ;;  %v2298_v5 = vcombine.high %v2288_v63, %v2288_v63  ;;  %2309 = vst.msk [vmem:[%s13237_s12 + $0x12] sm:$0x1] %vm943_vm7, %v2288_v63  ;;  %2310 = vst.msk [vmem:[%s13237_s12 + $0x22] sm:$0x1] %vm943_vm7, %v2296_v1  ;;  %v3680_v61 = vld [vmem:[%s13057_s6 + $0x5] sm:$0x1] }
 0x5c9   : > { %2312 = vst.msk [vmem:[%s13237_s12 + $0x42] sm:$0x1] %vm943_vm7, %v2281_v62  ;;  %v3683_v62 = vld [vmem:[%s13057_s6 + $0x35] sm:$0x1]  ;;  %v3691_v63 = vrot.slane %v3682_v59, 6  ;;  %v3690_v1 = vsel %vm262_vm1, %v3689_v60, %v3680_v61 }
 0x5ca   : > { %v2299_v6 = vcombine.high %v2295_v3, %v2295_v3  ;;  %2311 = vst.msk [vmem:[%s13237_s12 + $0x32] sm:$0x1] %vm943_vm7, %v2298_v5  ;;  %2313 = vst.msk [vmem:[%s13237_s12 + $0x52] sm:$0x1] %vm943_vm7, %v2295_v3  ;;  %v3693_v3 = vrot.slane %v3683_v62, 5  ;;  %v13628_v62 = vld [vmem:[#allocation5 + $0x38] sm:$0xff] }
 0x5cb   : > { %2314 = vst.msk [vmem:[%s13237_s12 + $0x62] sm:$0x1] %vm943_vm7, %v2297_v4  ;;  %v3692_v4 = vsel %vm265_vm2, %v3691_v63, %v3690_v1  ;;  %v13631_v1 = vld [vmem:[#allocation5 + $0x30] sm:$0xff] }
 0x5cc   : > { %2315 = vst.msk [vmem:[%s13237_s12 + $0x72] sm:$0x1] %vm943_vm7, %v2299_v6  ;;  %v3694_v5 = vsel %vm268_vm3, %v3693_v3, %v3692_v4 }
 0x674   : > { %v2553_v29 = vpop.f32.mrf.mxu0 }
 0x675   : > { %v2627_v35 = vadd.f32 %v2626_v7, %v2553_v29 }
 0x676   : > { %v12034_v30 = vpop.f32.mrf.mxu0 }
 0x678   : > { %v2700_v31 = vpop.f32.mrf.mxu0 }
 0x679   : > { %12052 = vmatmul.mubr.msk.f32.vlgmr.msra.gmra.mxu1 %vm427_vm6, %v2700_v31 }
 0x67a   : > { %12060 = vmatpush3.msra.mxu1 %v13177_v42  ;;  %v12046_v32 = vpop.f32.mrf.mxu0  ;;  %12063 = vmatprep.mubr.msk.f32.mxu1 %vm12901_vm0, %v12900_v0 }
 0x67b   : > { %12061 = vmatprep.subr.mxu1 %v12900_v0 }
 0x67c   : > { %12062 = vmatpush3.msra.mxu1 %v13180_v44  ;;  %v2850_v13 = vpop.f32.mrf.mxu0 }
 0x67d   : > { %12071 = vmatprep.subr.mxu1 %v12900_v0  ;;  %12064 = vmatmul.mubr.msk.f32.vlgmr.msra.gmra.mxu1 %vm427_vm6, %v2850_v13 }
 0x67e   : > { %12072 = vmatpush3.msk.msra.mxu1 %vm274_vm4, %v3012_v28  ;;  %v12058_v15 = vpop.f32.mrf.mxu0  ;;  %12073 = vmatprep.mubr.msk.f32.mxu1 %vm12901_vm0, %v12900_v0 }
 0x67f   : > { %12083 = vmatprep.subr.mxu1 %v12900_v0  ;;  %v13558_v15 = vld [vmem:[%s14555_s1 + $0x10] sm:$0xff] }
 0x680   : > { %v3084_v33 = vpop.f32.mrf.mxu0 }
 0x681   : > { %12074 = vmatmul.mubr.msk.f32.vlgmr.msra.gmra.mxu1 %vm270_vm5, %v13087_v11 }
 0x682   : > { %12084 = vmatpush3.msra.mxu1 %v13094_v14  ;;  %12087 = vmatprep.mubr.msk.f32.mxu1 %vm12901_vm0, %v12900_v0  ;;  %v12070_v34 = vpop.f32.mrf.mxu0 }
 0x683   : > { %12085 = vmatprep.subr.mxu1 %v12900_v0 }
 0x684   : > { %12086 = vmatpush3.msra.mxu1 %v13114_v16 }
 0x685   : > { %12095 = vmatprep.subr.mxu1 %v12900_v0  ;;  %12088 = vmatmul.mubr.msk.f32.vlgmr.msra.gmra.mxu1 %vm427_vm6, %v3084_v33  ;;  %v13569_v33 = vld [vmem:[%s14555_s1 + $0x18] sm:$0xff] }
 0x686   : > { %12096 = vmatpush3.msra.mxu1 %v13146_v23  ;;  %12099 = vmatprep.mubr.msk.f32.mxu1 %vm12901_vm0, %v12900_v0 }
 0x687   : > { %12097 = vmatprep.subr.mxu1 %v12900_v0 }
 0x688   : > { %12098 = vmatpush3.msra.mxu1 %v13149_v24 }
 0x689   : > { %12107 = vmatprep.subr.mxu1 %v12900_v0 }
 0x739   : > { %v2775_v14 = vpop.f32.mrf.mxu1 }
 0x73a   : > { %v2779_v36 = vadd.f32 %v2775_v14, %v2627_v35 }
 0x73b   : > { %v12053_v16 = vpop.f32.mrf.mxu1 }
 0x73d   : > { %v2925_v37 = vpop.f32.mrf.mxu1 }
 0x73e   : > { %v2929_v38 = vadd.f32 %v2925_v37, %v2779_v36 }
 0x73f   : > { %v12065_v39 = vpop.f32.mrf.mxu1 }
 0x740   : > { %v2930_v40 = vadd.f32 %v2929_v38, %v13209_v54 }
 0x741   : > { %v3160_v41 = vpop.f32.mrf.mxu1 }
 0x742   : > { %12730 = vtanh.f32 %v2930_v40  ;;  %12081 = vmatmul.mubr.msk.f32.vlgmr.msra.gmra.mxu0 %vm427_vm6, %v3160_v41 }
 0x743   : > { %12091 = vmatpush3.msk.msra.mxu0 %vm274_vm4, %v3012_v28  ;;  %v12075_v23 = vpop.f32.mrf.mxu1  ;;  %12092 = vmatprep.mubr.msk.f32.mxu0 %vm12901_vm0, %v12900_v0 }
 0x744   : > { %12102 = vmatprep.subr.mxu0 %v12900_v0 }
 0x745   : > { %v3308_v56 = vpop.f32.mrf.mxu1 }
 0x746   : > { %12093 = vmatmul.mubr.msk.f32.vlgmr.msra.gmra.mxu0 %vm270_vm5, %v13126_v20 }
 0x747   : > { %12103 = vmatpush3.msk.msra.mxu0 %vm274_vm4, %v3012_v28  ;;  %12104 = vmatprep.mubr.msk.f32.mxu0 %vm12901_vm0, %v12900_v0  ;;  %v12089_v57 = vpop.f32.mrf.mxu1 }
 0x748   : > { %12114 = vmatprep.subr.mxu0 %v12900_v0 }
 0x74a   : > { %12105 = vmatmul.mubr.msk.f32.vlgmr.msra.gmra.mxu0 %vm270_vm5, %v13139_v22 }
 0x74b   : > { %12116 = vmatprep.mubr.msk.f32.mxu0 %vm12901_vm0, %v12900_v0  ;;  %12115 = vmatpush3.msk.msra.mxu0 %vm274_vm4, %v3694_v5 }
 0x74c   : > { %12124 = vmatprep.subr.mxu0 %v12900_v0 }
 0x74e   : > { %12117 = vmatmul.mubr.msk.f32.vlgmr.msra.gmra.mxu0 %vm270_vm5, %v13082_v10 }
 0x74f   : > { %v12731_v24 = vpop.eup %12730  ;;  %12128 = vmatprep.mubr.msk.f32.mxu0 %vm12901_vm0, %v12900_v0 }
 0x750   : > { %v2933_v43 = vcombine.high %v12731_v24, %v12731_v24  ;;  %v2940_v20 = vrot.slane %v12731_v24, %v13229_v2 }
 0x752   : > { %v2947_v45 = vrot.slane %v2933_v43, %v13229_v2  ;;  %v2948_v46 = vcombine.high %v2940_v20, %v2940_v20  ;;  %v2956_v47 = vrot.slane %v2940_v20, %v13229_v2 }
 0x754   : > { %v2949_v22 = vcombine.high %v2947_v45, %v2947_v45  ;;  %v2963_v48 = vrot.slane %v2947_v45, %v13229_v2  ;;  %v2970_v49 = vrot.slane %v2948_v46, %v13229_v2  ;;  %v2978_v50 = vcombine.high %v2956_v47, %v2956_v47  ;;  %2990 = vst.msk [vmem:[%s13237_s12 + $0x3] sm:$0x1] %vm943_vm7, %v2956_v47  ;;  %v13598_v46 = vld [vmem:[#allocation5 + $0x28] sm:$0xff]  ;;  %v13601_v47 = vld [vmem:[#allocation5 + $0x20] sm:$0xff] }
 0x756   : > { %v2977_v51 = vrot.slane %v2949_v22, %v13229_v2  ;;  %v2979_v52 = vcombine.high %v2963_v48, %v2963_v48  ;;  %v2980_v53 = vcombine.high %v2970_v49, %v2970_v49  ;;  %2991 = vst.msk [vmem:[%s13237_s12 + $0x13] sm:$0x1] %vm943_vm7, %v2970_v49  ;;  %2992 = vst.msk [vmem:[%s13237_s12 + $0x23] sm:$0x1] %vm943_vm7, %v2978_v50  ;;  %v4364_v49 = vld [vmem:[%s13057_s6 + $0x26] sm:$0x1] }
 0x757   : > { %2994 = vst.msk [vmem:[%s13237_s12 + $0x43] sm:$0x1] %vm943_vm7, %v2963_v48  ;;  %v4363_v48 = vld [vmem:[%s13057_s6 + $0x16] sm:$0x1] }
 0x758   : > { %v2981_v55 = vcombine.high %v2977_v51, %v2977_v51  ;;  %2993 = vst.msk [vmem:[%s13237_s12 + $0x33] sm:$0x1] %vm943_vm7, %v2980_v53  ;;  %2995 = vst.msk [vmem:[%s13237_s12 + $0x53] sm:$0x1] %vm943_vm7, %v2977_v51  ;;  %v4371_v50 = vrot.slane %v4363_v48, 7  ;;  %v4373_v53 = vrot.slane %v4364_v49, 6 }
 0x759   : > { %2996 = vst.msk [vmem:[%s13237_s12 + $0x63] sm:$0x1] %vm943_vm7, %v2979_v52  ;;  %v4362_v51 = vld [vmem:[%s13057_s6 + $0x6] sm:$0x1]  ;;  %v4365_v52 = vld [vmem:[%s13057_s6 + $0x36] sm:$0x1] }
 0x75a   : > { %2997 = vst.msk [vmem:[%s13237_s12 + $0x73] sm:$0x1] %vm943_vm7, %v2981_v55  ;;  %v4372_v55 = vsel %vm262_vm1, %v4371_v50, %v4362_v51 }
 0x75b   : > { %v4374_v57 = vsel %vm265_vm2, %v4373_v53, %v4372_v55 }
 0x802   : > { %v3235_v6 = vpop.f32.mrf.mxu0 }
 0x803   : > { %v3309_v25 = vadd.f32 %v3308_v56, %v3235_v6  ;;  %v4375_v56 = vrot.slane %v4365_v52, 5  ;;  %v13646_v6 = vld [vmem:[%s14555_s1 + $0x8] sm:$0xff] }
 0x804   : > { %v12082_v7 = vpop.f32.mrf.mxu0 }
 0x805   : > { %v4376_v59 = vsel %vm268_vm3, %v4375_v56, %v4374_v57 }
 0x806   : > { %v3382_v8 = vpop.f32.mrf.mxu0 }
 0x807   : > { %12100 = vmatmul.mubr.msk.f32.vlgmr.msra.gmra.mxu1 %vm427_vm6, %v3382_v8 }
 0x808   : > { %12108 = vmatpush3.msra.mxu1 %v13177_v42  ;;  %v12094_v9 = vpop.f32.mrf.mxu0  ;;  %12111 = vmatprep.mubr.msk.f32.mxu1 %vm12901_vm0, %v12900_v0  ;;  %v13531_v42 = vld [vmem:[#allocation5 + $0x18] sm:$0xff] }
 0x809   : > { %12109 = vmatprep.subr.mxu1 %v12900_v0  ;;  %12125 = vmatpush3.msra.mxu0 %v13531_v42 }
 0x80a   : > { %12110 = vmatpush3.msra.mxu1 %v13180_v44  ;;  %v3532_v10 = vpop.f32.mrf.mxu0  ;;  %v13533_v44 = vld [vmem:[#allocation5 + $0x8] sm:$0xff]  ;;  %12126 = vmatprep.subr.mxu0 %v12900_v0 }
 0x80b   : > { %12119 = vmatprep.subr.mxu1 %v12900_v0  ;;  %12112 = vmatmul.mubr.msk.f32.vlgmr.msra.gmra.mxu1 %vm427_vm6, %v3532_v10 }
 0x80c   : > { %12120 = vmatpush3.msk.msra.mxu1 %vm274_vm4, %v3694_v5  ;;  %v12106_v12 = vpop.f32.mrf.mxu0  ;;  %12121 = vmatprep.mubr.msk.f32.mxu1 %vm12901_vm0, %v12900_v0 }
 0x80d   : > { %12131 = vmatprep.subr.mxu1 %v12900_v0  ;;  %12127 = vmatpush3.msra.mxu0 %v13538_v17 }
 0x80e   : > { %12138 = vmatprep.subr.mxu0 %v12900_v0 }
 0x80f   : > { %12122 = vmatmul.mubr.msk.f32.vlgmr.msra.gmra.mxu1 %vm270_vm5, %v13087_v11  ;;  %v3766_v11 = vpop.f32.mrf.mxu0 }
 0x810   : > { %12135 = vmatprep.mubr.msk.f32.mxu1 %vm12901_vm0, %v12900_v0  ;;  %12132 = vmatpush3.msra.mxu1 %v13533_v44 }
 0x811   : > { %12133 = vmatprep.subr.mxu1 %v12900_v0  ;;  %v12118_v19 = vpop.f32.mrf.mxu0 }
 0x812   : > { %12134 = vmatpush3.msra.mxu1 %v13541_v18 }
 0x813   : > { %12136 = vmatmul.mubr.msk.f32.vlgmr.msra.gmra.mxu1 %vm427_vm6, %v3766_v11  ;;  %12143 = vmatprep.subr.mxu1 %v12900_v0 }
 0x814   : > { %12147 = vmatprep.mubr.msk.f32.mxu1 %vm12901_vm0, %v12900_v0  ;;  %12144 = vmatpush3.msra.mxu1 %v13598_v46 }
 0x815   : > { %12145 = vmatprep.subr.mxu1 %v12900_v0 }
 0x816   : > { %12146 = vmatpush3.msra.mxu1 %v13601_v47 }
 0x817   : > { %12155 = vmatprep.subr.mxu1 %v12900_v0 }
 0x8c7   : > { %v3457_v21 = vpop.f32.mrf.mxu1 }
 0x8c8   : > { %v3461_v27 = vadd.f32 %v3457_v21, %v3309_v25 }
 0x8c9   : > { %v12101_v26 = vpop.f32.mrf.mxu1 }
 0x8cb   : > { %v3607_v28 = vpop.f32.mrf.mxu1 }
 0x8cc   : > { %v3611_v29 = vadd.f32 %v3607_v28, %v3461_v27 }
 0x8cd   : > { %v12113_v30 = vpop.f32.mrf.mxu1 }
 0x8ce   : > { %v3612_v31 = vadd.f32 %v3611_v29, %v13209_v54 }
 0x8cf   : > { %v3842_v32 = vpop.f32.mrf.mxu1 }
 0x8d0   : > { %12732 = vtanh.f32 %v3612_v31  ;;  %12129 = vmatmul.mubr.msk.f32.vlgmr.msra.gmra.mxu0 %vm427_vm6, %v3842_v32 }
 0x8d1   : > { %12139 = vmatpush3.msk.msra.mxu0 %vm274_vm4, %v3694_v5  ;;  %v12123_v13 = vpop.f32.mrf.mxu1  ;;  %12140 = vmatprep.mubr.msk.f32.mxu0 %vm12901_vm0, %v12900_v0 }
 0x8d2   : > { %12150 = vmatprep.subr.mxu0 %v12900_v0 }
 0x8d3   : > { %v3990_v45 = vpop.f32.mrf.mxu1 }
 0x8d4   : > { %12141 = vmatmul.mubr.msk.f32.vlgmr.msra.gmra.mxu0 %vm270_vm5, %v13558_v15 }
 0x8d5   : > { %12151 = vmatpush3.msk.msra.mxu0 %vm274_vm4, %v3694_v5  ;;  %12152 = vmatprep.mubr.msk.f32.mxu0 %vm12901_vm0, %v12900_v0  ;;  %v12137_v22 = vpop.f32.mrf.mxu1 }
 0x8d6   : > { %12162 = vmatprep.subr.mxu0 %v12900_v0  ;;  %v5047_v22 = vld [vmem:[%s13057_s6 + $0x37] sm:$0x1] }
 0x8d7   : > { %v5057_v50 = vrot.slane %v5047_v22, 5 }
 0x8d8   : > { %12153 = vmatmul.mubr.msk.f32.vlgmr.msra.gmra.mxu0 %vm270_vm5, %v13569_v33 }
 0x8d9   : > { %12164 = vmatprep.mubr.msk.f32.mxu0 %vm12901_vm0, %v12900_v0  ;;  %12163 = vmatpush3.msk.msra.mxu0 %vm274_vm4, %v4376_v59 }
 0x8da   : > { %12172 = vmatprep.subr.mxu0 %v12900_v0 }
 0x8dc   : > { %12165 = vmatmul.mubr.msk.f32.vlgmr.msra.gmra.mxu0 %vm270_vm5, %v13615_v58 }
 0x8dd   : > { %v12733_v34 = vpop.eup %12732  ;;  %12173 = vmatpush3.msra.mxu0 %v13531_v42  ;;  %12176 = vmatprep.mubr.msk.f32.mxu0 %vm12901_vm0, %v12900_v0 }
 0x8de   : > { %v3615_v14 = vcombine.high %v12733_v34, %v12733_v34  ;;  %v3622_v35 = vrot.slane %v12733_v34, %v13229_v2  ;;  %12174 = vmatprep.subr.mxu0 %v12900_v0 }
 0x8df   : > { %12175 = vmatpush3.msra.mxu0 %v13538_v17 }
 0x8e0   : > { %v3629_v16 = vrot.slane %v3615_v14, %v13229_v2  ;;  %v3630_v36 = vcombine.high %v3622_v35, %v3622_v35  ;;  %v3638_v37 = vrot.slane %v3622_v35, %v13229_v2  ;;  %12186 = vmatprep.subr.mxu0 %v12900_v0 }
 0x8e2   : > { %v3631_v38 = vcombine.high %v3629_v16, %v3629_v16  ;;  %v3645_v39 = vrot.slane %v3629_v16, %v13229_v2  ;;  %v3652_v40 = vrot.slane %v3630_v36, %v13229_v2  ;;  %v3660_v41 = vcombine.high %v3638_v37, %v3638_v37  ;;  %3672 = vst.msk [vmem:[%s13237_s12 + $0x4] sm:$0x1] %vm943_vm7, %v3638_v37 }
 0x8e4   : > { %v3659_v23 = vrot.slane %v3631_v38, %v13229_v2  ;;  %v3661_v24 = vcombine.high %v3645_v39, %v3645_v39  ;;  %v3662_v43 = vcombine.high %v3652_v40, %v3652_v40  ;;  %3673 = vst.msk [vmem:[%s13237_s12 + $0x14] sm:$0x1] %vm943_vm7, %v3652_v40  ;;  %3674 = vst.msk [vmem:[%s13237_s12 + $0x24] sm:$0x1] %vm943_vm7, %v3660_v41 }
 0x8e5   : > { %3676 = vst.msk [vmem:[%s13237_s12 + $0x44] sm:$0x1] %vm943_vm7, %v3645_v39 }
 0x8e6   : > { %v3663_v20 = vcombine.high %v3659_v23, %v3659_v23  ;;  %3675 = vst.msk [vmem:[%s13237_s12 + $0x34] sm:$0x1] %vm943_vm7, %v3662_v43  ;;  %3677 = vst.msk [vmem:[%s13237_s12 + $0x54] sm:$0x1] %vm943_vm7, %v3659_v23  ;;  %v5046_v43 = vld [vmem:[%s13057_s6 + $0x27] sm:$0x1] }
 0x8e7   : > { %3678 = vst.msk [vmem:[%s13237_s12 + $0x64] sm:$0x1] %vm943_vm7, %v3661_v24  ;;  %v5045_v24 = vld [vmem:[%s13057_s6 + $0x17] sm:$0x1]  ;;  %v5055_v48 = vrot.slane %v5046_v43, 6 }
 0x8e8   : > { %3679 = vst.msk [vmem:[%s13237_s12 + $0x74] sm:$0x1] %vm943_vm7, %v3663_v20  ;;  %v5053_v20 = vrot.slane %v5045_v24, 7 }
 0x990   : > { %v3917_v60 = vpop.f32.mrf.mxu0 }
 0x991   : > { %v3991_v10 = vadd.f32 %v3990_v45, %v3917_v60  ;;  %v5044_v45 = vld [vmem:[%s13057_s6 + $0x7] sm:$0x1] }
 0x992   : > { %v12130_v61 = vpop.f32.mrf.mxu0  ;;  %v5054_v49 = vsel %vm262_vm1, %v5053_v20, %v5044_v45 }
 0x993   : > { %v5056_v51 = vsel %vm265_vm2, %v5055_v48, %v5054_v49 }
 0x994   : > { %v4064_v63 = vpop.f32.mrf.mxu0  ;;  %v5058_v52 = vsel %vm268_vm3, %v5057_v50, %v5056_v51 }
 0x995   : > { %12148 = vmatmul.mubr.msk.f32.vlgmr.msra.gmra.mxu1 %vm427_vm6, %v4064_v63 }
 0x996   : > { %12156 = vmatpush3.msra.mxu1 %v13628_v62  ;;  %v12142_v3 = vpop.f32.mrf.mxu0  ;;  %12159 = vmatprep.mubr.msk.f32.mxu1 %vm12901_vm0, %v12900_v0 }
 0x997   : > { %12157 = vmatprep.subr.mxu1 %v12900_v0 }
 0x998   : > { %12158 = vmatpush3.msra.mxu1 %v13631_v1  ;;  %v4214_v4 = vpop.f32.mrf.mxu0 }
 0x999   : > { %12167 = vmatprep.subr.mxu1 %v12900_v0  ;;  %12160 = vmatmul.mubr.msk.f32.vlgmr.msra.gmra.mxu1 %vm427_vm6, %v4214_v4 }
 0x99a   : > { %12168 = vmatpush3.msk.msra.mxu1 %vm274_vm4, %v4376_v59  ;;  %v12154_v5 = vpop.f32.mrf.mxu0  ;;  %12169 = vmatprep.mubr.msk.f32.mxu1 %vm12901_vm0, %v12900_v0 }
 0x99b   : > { %12179 = vmatprep.subr.mxu1 %v12900_v0 }
 0x99c   : > { %v4448_v7 = vpop.f32.mrf.mxu0 }
 0x99d   : > { %12170 = vmatmul.mubr.msk.f32.vlgmr.msra.gmra.mxu1 %vm270_vm5, %v13646_v6 }
 0x99e   : > { %12180 = vmatpush3.msra.mxu1 %v13533_v44  ;;  %12183 = vmatprep.mubr.msk.f32.mxu1 %vm12901_vm0, %v12900_v0  ;;  %v12166_v8 = vpop.f32.mrf.mxu0 }
 0x99f   : > { %12181 = vmatprep.subr.mxu1 %v12900_v0 }
 0x9a0   : > { %12182 = vmatpush3.msra.mxu1 %v13541_v18 }
 0x9a1   : > { %12191 = vmatprep.subr.mxu1 %v12900_v0  ;;  %12184 = vmatmul.mubr.msk.f32.vlgmr.msra.gmra.mxu1 %vm427_vm6, %v4448_v7 }
 0x9a2   : > { %12192 = vmatpush3.msra.mxu1 %v13598_v46  ;;  %12195 = vmatprep.mubr.msk.f32.mxu1 %vm12901_vm0, %v12900_v0 }
 0x9a3   : > { %12193 = vmatprep.subr.mxu1 %v12900_v0 }
 0x9a4   : > { %12194 = vmatpush3.msra.mxu1 %v13601_v47 }
 0x9a5   : > { %12203 = vmatprep.subr.mxu1 %v12900_v0 }
 0xa55   : > { %v4139_v9 = vpop.f32.mrf.mxu1 }
 0xa56   : > { %v4143_v11 = vadd.f32 %v4139_v9, %v3991_v10 }
 0xa57   : > { %v12149_v12 = vpop.f32.mrf.mxu1 }
 0xa59   : > { %v4289_v19 = vpop.f32.mrf.mxu1 }
 0xa5a   : > { %v4293_v21 = vadd.f32 %v4289_v19, %v4143_v11 }
 0xa5b   : > { %v12161_v25 = vpop.f32.mrf.mxu1 }
 0xa5c   : > { %v4294_v26 = vadd.f32 %v4293_v21, %v13209_v54 }
 0xa5d   : > { %v4524_v27 = vpop.f32.mrf.mxu1 }
 0xa5e   : > { %12734 = vtanh.f32 %v4294_v26  ;;  %12177 = vmatmul.mubr.msk.f32.vlgmr.msra.gmra.mxu0 %vm427_vm6, %v4524_v27 }
 0xa5f   : > { %12187 = vmatpush3.msk.msra.mxu0 %vm274_vm4, %v4376_v59  ;;  %v12171_v28 = vpop.f32.mrf.mxu1  ;;  %12188 = vmatprep.mubr.msk.f32.mxu0 %vm12901_vm0, %v12900_v0 }
 0xa60   : > { %12198 = vmatprep.subr.mxu0 %v12900_v0 }
 0xa61   : > { %v4672_v41 = vpop.f32.mrf.mxu1 }
 0xa62   : > { %12189 = vmatmul.mubr.msk.f32.vlgmr.msra.gmra.mxu0 %vm270_vm5, %v13558_v15 }
 0xa63   : > { %12199 = vmatpush3.msk.msra.mxu0 %vm274_vm4, %v4376_v59  ;;  %12200 = vmatprep.mubr.msk.f32.mxu0 %vm12901_vm0, %v12900_v0  ;;  %v12185_v23 = vpop.f32.mrf.mxu1 }
 0xa64   : > { %12210 = vmatprep.subr.mxu0 %v12900_v0  ;;  %v5729_v23 = vld [vmem:[%s13057_s6 + $0x38] sm:$0x1] }
 0xa65   : > { %v5739_v20 = vrot.slane %v5729_v23, 5 }
 0xa66   : > { %12201 = vmatmul.mubr.msk.f32.vlgmr.msra.gmra.mxu0 %vm270_vm5, %v13569_v33 }
 0xa67   : > { %12212 = vmatprep.mubr.msk.f32.mxu0 %vm12901_vm0, %v12900_v0  ;;  %12211 = vmatpush3.msk.msra.mxu0 %vm274_vm4, %v5058_v52 }
 0xa68   : > { %12220 = vmatprep.subr.mxu0 %v12900_v0 }
 0xa6a   : > { %12213 = vmatmul.mubr.msk.f32.vlgmr.msra.gmra.mxu0 %vm270_vm5, %v13615_v58 }
 0xa6b   : > { %v12735_v29 = vpop.eup %12734  ;;  %12221 = vmatpush3.msra.mxu0 %v13531_v42  ;;  %12224 = vmatprep.mubr.msk.f32.mxu0 %vm12901_vm0, %v12900_v0 }
 0xa6c   : > { %v4297_v30 = vcombine.high %v12735_v29, %v12735_v29  ;;  %v4304_v31 = vrot.slane %v12735_v29, %v13229_v2  ;;  %12222 = vmatprep.subr.mxu0 %v12900_v0 }
 0xa6d   : > { %12223 = vmatpush3.msra.mxu0 %v13538_v17 }
 0xa6e   : > { %v4311_v32 = vrot.slane %v4297_v30, %v13229_v2  ;;  %v4312_v13 = vcombine.high %v4304_v31, %v4304_v31  ;;  %v4320_v34 = vrot.slane %v4304_v31, %v13229_v2  ;;  %12234 = vmatprep.subr.mxu0 %v12900_v0 }
 0xa70   : > { %v4313_v14 = vcombine.high %v4311_v32, %v4311_v32  ;;  %v4327_v35 = vrot.slane %v4311_v32, %v13229_v2  ;;  %v4334_v16 = vrot.slane %v4312_v13, %v13229_v2  ;;  %v4342_v36 = vcombine.high %v4320_v34, %v4320_v34  ;;  %4354 = vst.msk [vmem:[%s13237_s12 + $0x5] sm:$0x1] %vm943_vm7, %v4320_v34 }
 0xa72   : > { %v4341_v37 = vrot.slane %v4313_v14, %v13229_v2  ;;  %v4343_v38 = vcombine.high %v4327_v35, %v4327_v35  ;;  %v4344_v39 = vcombine.high %v4334_v16, %v4334_v16  ;;  %4355 = vst.msk [vmem:[%s13237_s12 + $0x15] sm:$0x1] %vm943_vm7, %v4334_v16  ;;  %4356 = vst.msk [vmem:[%s13237_s12 + $0x25] sm:$0x1] %vm943_vm7, %v4342_v36 }
 0xa73   : > { %4358 = vst.msk [vmem:[%s13237_s12 + $0x45] sm:$0x1] %vm943_vm7, %v4327_v35 }
 0xa74   : > { %v4345_v40 = vcombine.high %v4341_v37, %v4341_v37  ;;  %4357 = vst.msk [vmem:[%s13237_s12 + $0x35] sm:$0x1] %vm943_vm7, %v4344_v39  ;;  %4359 = vst.msk [vmem:[%s13237_s12 + $0x55] sm:$0x1] %vm943_vm7, %v4341_v37  ;;  %v5728_v39 = vld [vmem:[%s13057_s6 + $0x28] sm:$0x1] }
 0xa75   : > { %4360 = vst.msk [vmem:[%s13237_s12 + $0x65] sm:$0x1] %vm943_vm7, %v4343_v38  ;;  %v5727_v38 = vld [vmem:[%s13057_s6 + $0x18] sm:$0x1]  ;;  %v5737_v24 = vrot.slane %v5728_v39, 6 }
 0xa76   : > { %4361 = vst.msk [vmem:[%s13237_s12 + $0x75] sm:$0x1] %vm943_vm7, %v4345_v40  ;;  %v5735_v40 = vrot.slane %v5727_v38, 7 }
 0xb1e   : > { %v4599_v53 = vpop.f32.mrf.mxu0 }
 0xb1f   : > { %v4673_v4 = vadd.f32 %v4672_v41, %v4599_v53  ;;  %v5726_v41 = vld [vmem:[%s13057_s6 + $0x8] sm:$0x1] }
 0xb20   : > { %v12178_v55 = vpop.f32.mrf.mxu0  ;;  %v5736_v43 = vsel %vm262_vm1, %v5735_v40, %v5726_v41 }
 0xb21   : > { %v5738_v45 = vsel %vm265_vm2, %v5737_v24, %v5736_v43 }
 0xb22   : > { %v4746_v56 = vpop.f32.mrf.mxu0  ;;  %v5740_v22 = vsel %vm268_vm3, %v5739_v20, %v5738_v45 }
 0xb23   : > { %12196 = vmatmul.mubr.msk.f32.vlgmr.msra.gmra.mxu1 %vm427_vm6, %v4746_v56 }
 0xb24   : > { %12204 = vmatpush3.msra.mxu1 %v13628_v62  ;;  %v12190_v57 = vpop.f32.mrf.mxu0  ;;  %12207 = vmatprep.mubr.msk.f32.mxu1 %vm12901_vm0, %v12900_v0 }
 0xb25   : > { %12205 = vmatprep.subr.mxu1 %v12900_v0 }
 0xb26   : > { %12206 = vmatpush3.msra.mxu1 %v13631_v1  ;;  %v4896_v59 = vpop.f32.mrf.mxu0 }
 0xb27   : > { %12215 = vmatprep.subr.mxu1 %v12900_v0  ;;  %12208 = vmatmul.mubr.msk.f32.vlgmr.msra.gmra.mxu1 %vm427_vm6, %v4896_v59 }
 0xb28   : > { %12216 = vmatpush3.msk.msra.mxu1 %vm274_vm4, %v5058_v52  ;;  %v12202_v60 = vpop.f32.mrf.mxu0  ;;  %12217 = vmatprep.mubr.msk.f32.mxu1 %vm12901_vm0, %v12900_v0 }
 0xb29   : > { %12227 = vmatprep.subr.mxu1 %v12900_v0 }
 0xb2a   : > { %v5130_v61 = vpop.f32.mrf.mxu0 }
 0xb2b   : > { %12218 = vmatmul.mubr.msk.f32.vlgmr.msra.gmra.mxu1 %vm270_vm5, %v13646_v6 }
 0xb2c   : > { %12228 = vmatpush3.msra.mxu1 %v13533_v44  ;;  %12231 = vmatprep.mubr.msk.f32.mxu1 %vm12901_vm0, %v12900_v0  ;;  %v12214_v63 = vpop.f32.mrf.mxu0 }
 0xb2d   : > { %12229 = vmatprep.subr.mxu1 %v12900_v0 }
 0xb2e   : > { %12230 = vmatpush3.msra.mxu1 %v13541_v18 }
 0xb2f   : > { %12239 = vmatprep.subr.mxu1 %v12900_v0  ;;  %12232 = vmatmul.mubr.msk.f32.vlgmr.msra.gmra.mxu1 %vm427_vm6, %v5130_v61 }
 0xb30   : > { %12240 = vmatpush3.msra.mxu1 %v13598_v46  ;;  %12243 = vmatprep.mubr.msk.f32.mxu1 %vm12901_vm0, %v12900_v0 }
 0xb31   : > { %12241 = vmatprep.subr.mxu1 %v12900_v0 }
 0xb32   : > { %12242 = vmatpush3.msra.mxu1 %v13601_v47 }
 0xb33   : > { %12251 = vmatprep.subr.mxu1 %v12900_v0 }
 0xbe3   : > { %v4821_v3 = vpop.f32.mrf.mxu1 }
 0xbe4   : > { %v4825_v7 = vadd.f32 %v4821_v3, %v4673_v4 }
 0xbe5   : > { %v12197_v5 = vpop.f32.mrf.mxu1 }
 0xbe7   : > { %v4971_v8 = vpop.f32.mrf.mxu1 }
 0xbe8   : > { %v4975_v9 = vadd.f32 %v4971_v8, %v4825_v7 }
 0xbe9   : > { %v12209_v10 = vpop.f32.mrf.mxu1 }
 0xbea   : > { %v4976_v12 = vadd.f32 %v4975_v9, %v13209_v54 }
 0xbeb   : > { %v5206_v11 = vpop.f32.mrf.mxu1 }
 0xbec   : > { %12736 = vtanh.f32 %v4976_v12  ;;  %12225 = vmatmul.mubr.msk.f32.vlgmr.msra.gmra.mxu0 %vm427_vm6, %v5206_v11 }
 0xbed   : > { %12235 = vmatpush3.msk.msra.mxu0 %vm274_vm4, %v5058_v52  ;;  %v12219_v19 = vpop.f32.mrf.mxu1  ;;  %12236 = vmatprep.mubr.msk.f32.mxu0 %vm12901_vm0, %v12900_v0 }
 0xbee   : > { %12246 = vmatprep.subr.mxu0 %v12900_v0 }
 0xbef   : > { %v5354_v36 = vpop.f32.mrf.mxu1 }
 0xbf0   : > { %12237 = vmatmul.mubr.msk.f32.vlgmr.msra.gmra.mxu0 %vm270_vm5, %v13558_v15 }
 0xbf1   : > { %12247 = vmatpush3.msk.msra.mxu0 %vm274_vm4, %v5058_v52  ;;  %12248 = vmatprep.mubr.msk.f32.mxu0 %vm12901_vm0, %v12900_v0  ;;  %v12233_v37 = vpop.f32.mrf.mxu1 }
 0xbf2   : > { %12258 = vmatprep.subr.mxu0 %v12900_v0  ;;  %v6411_v37 = vld [vmem:[%s13057_s6 + $0x39] sm:$0x1] }
 0xbf3   : > { %v6421_v40 = vrot.slane %v6411_v37, 5 }
 0xbf4   : > { %12249 = vmatmul.mubr.msk.f32.vlgmr.msra.gmra.mxu0 %vm270_vm5, %v13569_v33 }
 0xbf5   : > { %12260 = vmatprep.mubr.msk.f32.mxu0 %vm12901_vm0, %v12900_v0  ;;  %12259 = vmatpush3.msk.msra.mxu0 %vm274_vm4, %v5740_v22 }
 0xbf6   : > { %12268 = vmatprep.subr.mxu0 %v12900_v0 }
 0xbf8   : > { %12261 = vmatmul.mubr.msk.f32.vlgmr.msra.gmra.mxu0 %vm270_vm5, %v13615_v58 }
 0xbf9   : > { %v12737_v21 = vpop.eup %12736  ;;  %12269 = vmatpush3.msra.mxu0 %v13531_v42  ;;  %12272 = vmatprep.mubr.msk.f32.mxu0 %vm12901_vm0, %v12900_v0 }
 0xbfa   : > { %v4979_v25 = vcombine.high %v12737_v21, %v12737_v21  ;;  %v4986_v26 = vrot.slane %v12737_v21, %v13229_v2  ;;  %12270 = vmatprep.subr.mxu0 %v12900_v0 }
 0xbfb   : > { %12271 = vmatpush3.msra.mxu0 %v13538_v17 }
 0xbfc   : > { %v4993_v27 = vrot.slane %v4979_v25, %v13229_v2  ;;  %v4994_v28 = vcombine.high %v4986_v26, %v4986_v26  ;;  %v5002_v29 = vrot.slane %v4986_v26, %v13229_v2  ;;  %12282 = vmatprep.subr.mxu0 %v12900_v0 }
 0xbfe   : > { %v4995_v30 = vcombine.high %v4993_v27, %v4993_v27  ;;  %v5009_v31 = vrot.slane %v4993_v27, %v13229_v2  ;;  %v5016_v32 = vrot.slane %v4994_v28, %v13229_v2  ;;  %v5024_v13 = vcombine.high %v5002_v29, %v5002_v29  ;;  %5036 = vst.msk [vmem:[%s13237_s12 + $0x6] sm:$0x1] %vm943_vm7, %v5002_v29 }
 0xc00   : > { %v5023_v34 = vrot.slane %v4995_v30, %v13229_v2  ;;  %v5025_v14 = vcombine.high %v5009_v31, %v5009_v31  ;;  %v5026_v35 = vcombine.high %v5016_v32, %v5016_v32  ;;  %5037 = vst.msk [vmem:[%s13237_s12 + $0x16] sm:$0x1] %vm943_vm7, %v5016_v32  ;;  %5038 = vst.msk [vmem:[%s13237_s12 + $0x26] sm:$0x1] %vm943_vm7, %v5024_v13 }
 0xc01   : > { %5040 = vst.msk [vmem:[%s13237_s12 + $0x46] sm:$0x1] %vm943_vm7, %v5009_v31 }
 0xc02   : > { %v5027_v16 = vcombine.high %v5023_v34, %v5023_v34  ;;  %5039 = vst.msk [vmem:[%s13237_s12 + $0x36] sm:$0x1] %vm943_vm7, %v5026_v35  ;;  %5041 = vst.msk [vmem:[%s13237_s12 + $0x56] sm:$0x1] %vm943_vm7, %v5023_v34  ;;  %v6410_v35 = vld [vmem:[%s13057_s6 + $0x29] sm:$0x1] }
 0xc03   : > { %5042 = vst.msk [vmem:[%s13237_s12 + $0x66] sm:$0x1] %vm943_vm7, %v5025_v14  ;;  %v6409_v14 = vld [vmem:[%s13057_s6 + $0x19] sm:$0x1]  ;;  %v6419_v38 = vrot.slane %v6410_v35, 6 }
 0xc04   : > { %5043 = vst.msk [vmem:[%s13237_s12 + $0x76] sm:$0x1] %vm943_vm7, %v5027_v16  ;;  %v6417_v16 = vrot.slane %v6409_v14, 7 }
 0xcac   : > { %v5281_v48 = vpop.f32.mrf.mxu0 }
 0xcad   : > { %v5355_v59 = vadd.f32 %v5354_v36, %v5281_v48  ;;  %v6408_v36 = vld [vmem:[%s13057_s6 + $0x9] sm:$0x1] }
 0xcae   : > { %v12226_v49 = vpop.f32.mrf.mxu0  ;;  %v6418_v39 = vsel %vm262_vm1, %v6417_v16, %v6408_v36  ;;  %v13984_v16 = vld [vmem:[#allocation5 + $0x10] sm:$0xff]  ;;  %v13987_v36 = vld [vmem:[#allocation5] sm:$0xff] }
 0xcaf   : > { %v6420_v41 = vsel %vm265_vm2, %v6419_v38, %v6418_v39 }
 0xcb0   : > { %v5428_v50 = vpop.f32.mrf.mxu0  ;;  %v6422_v23 = vsel %vm268_vm3, %v6421_v40, %v6420_v41 }
 0xcb1   : > { %12244 = vmatmul.mubr.msk.f32.vlgmr.msra.gmra.mxu1 %vm427_vm6, %v5428_v50 }
 0xcb2   : > { %12252 = vmatpush3.msra.mxu1 %v13628_v62  ;;  %v12238_v51 = vpop.f32.mrf.mxu0  ;;  %12255 = vmatprep.mubr.msk.f32.mxu1 %vm12901_vm0, %v12900_v0 }
 0xcb3   : > { %12253 = vmatprep.subr.mxu1 %v12900_v0 }
 0xcb4   : > { %12254 = vmatpush3.msra.mxu1 %v13631_v1  ;;  %v5578_v52 = vpop.f32.mrf.mxu0 }
 0xcb5   : > { %12263 = vmatprep.subr.mxu1 %v12900_v0  ;;  %12256 = vmatmul.mubr.msk.f32.vlgmr.msra.gmra.mxu1 %vm427_vm6, %v5578_v52 }
 0xcb6   : > { %12264 = vmatpush3.msk.msra.mxu1 %vm274_vm4, %v5740_v22  ;;  %v12250_v53 = vpop.f32.mrf.mxu0  ;;  %12265 = vmatprep.mubr.msk.f32.mxu1 %vm12901_vm0, %v12900_v0 }
 0xcb7   : > { %12275 = vmatprep.subr.mxu1 %v12900_v0 }
 0xcb8   : > { %v5812_v55 = vpop.f32.mrf.mxu0 }
 0xcb9   : > { %12266 = vmatmul.mubr.msk.f32.vlgmr.msra.gmra.mxu1 %vm270_vm5, %v13646_v6 }
 0xcba   : > { %12276 = vmatpush3.msra.mxu1 %v13533_v44  ;;  %12279 = vmatprep.mubr.msk.f32.mxu1 %vm12901_vm0, %v12900_v0  ;;  %v12262_v56 = vpop.f32.mrf.mxu0 }
 0xcbb   : > { %12277 = vmatprep.subr.mxu1 %v12900_v0 }
 0xcbc   : > { %12278 = vmatpush3.msra.mxu1 %v13541_v18 }
 0xcbd   : > { %12287 = vmatprep.subr.mxu1 %v12900_v0  ;;  %12280 = vmatmul.mubr.msk.f32.vlgmr.msra.gmra.mxu1 %vm427_vm6, %v5812_v55 }
 0xcbe   : > { %12288 = vmatpush3.msra.mxu1 %v13598_v46  ;;  %12291 = vmatprep.mubr.msk.f32.mxu1 %vm12901_vm0, %v12900_v0 }
 0xcbf   : > { %12289 = vmatprep.subr.mxu1 %v12900_v0 }
 0xcc0   : > { %12290 = vmatpush3.msra.mxu1 %v13601_v47 }
 0xcc1   : > { %12299 = vmatprep.subr.mxu1 %v12900_v0 }
 0xd71   : > { %v5503_v57 = vpop.f32.mrf.mxu1 }
 0xd72   : > { %v5507_v61 = vadd.f32 %v5503_v57, %v5355_v59 }
 0xd73   : > { %v12245_v60 = vpop.f32.mrf.mxu1 }
 0xd75   : > { %v5653_v63 = vpop.f32.mrf.mxu1 }
 0xd76   : > { %v5657_v3 = vadd.f32 %v5653_v63, %v5507_v61 }
 0xd77   : > { %v12257_v4 = vpop.f32.mrf.mxu1 }
 0xd78   : > { %v5658_v5 = vadd.f32 %v5657_v3, %v13209_v54 }
 0xd79   : > { %v5888_v7 = vpop.f32.mrf.mxu1 }
 0xd7a   : > { %12738 = vtanh.f32 %v5658_v5  ;;  %12273 = vmatmul.mubr.msk.f32.vlgmr.msra.gmra.mxu0 %vm427_vm6, %v5888_v7 }
 0xd7b   : > { %12283 = vmatpush3.msk.msra.mxu0 %vm274_vm4, %v5740_v22  ;;  %v12267_v8 = vpop.f32.mrf.mxu1  ;;  %12284 = vmatprep.mubr.msk.f32.mxu0 %vm12901_vm0, %v12900_v0 }
 0xd7c   : > { %12294 = vmatprep.subr.mxu0 %v12900_v0 }
 0xd7d   : > { %v6036_v13 = vpop.f32.mrf.mxu1 }
 0xd7e   : > { %12285 = vmatmul.mubr.msk.f32.vlgmr.msra.gmra.mxu0 %vm270_vm5, %v13558_v15 }
 0xd7f   : > { %12295 = vmatpush3.msk.msra.mxu0 %vm274_vm4, %v5740_v22  ;;  %12296 = vmatprep.mubr.msk.f32.mxu0 %vm12901_vm0, %v12900_v0  ;;  %v12281_v34 = vpop.f32.mrf.mxu1 }
 0xd80   : > { %12306 = vmatprep.subr.mxu0 %v12900_v0 }
 0xd82   : > { %12297 = vmatmul.mubr.msk.f32.vlgmr.msra.gmra.mxu0 %vm270_vm5, %v13569_v33 }
 0xd83   : > { %12308 = vmatprep.mubr.msk.f32.mxu0 %vm12901_vm0, %v12900_v0  ;;  %12307 = vmatpush3.msk.msra.mxu0 %vm274_vm4, %v6422_v23 }
 0xd84   : > { %12316 = vmatprep.subr.mxu0 %v12900_v0 }
 0xd86   : > { %12309 = vmatmul.mubr.msk.f32.vlgmr.msra.gmra.mxu0 %vm270_vm5, %v13615_v58 }
 0xd87   : > { %v12739_v9 = vpop.eup %12738  ;;  %12317 = vmatpush3.msra.mxu0 %v13531_v42  ;;  %12320 = vmatprep.mubr.msk.f32.mxu0 %vm12901_vm0, %v12900_v0 }
 0xd88   : > { %v5661_v10 = vcombine.high %v12739_v9, %v12739_v9  ;;  %v5668_v12 = vrot.slane %v12739_v9, %v13229_v2  ;;  %12318 = vmatprep.subr.mxu0 %v12900_v0 }
 0xd89   : > { %12319 = vmatpush3.msra.mxu0 %v13538_v17 }
 0xd8a   : > { %v5675_v11 = vrot.slane %v5661_v10, %v13229_v2  ;;  %v5676_v19 = vcombine.high %v5668_v12, %v5668_v12  ;;  %v5684_v21 = vrot.slane %v5668_v12, %v13229_v2  ;;  %12330 = vmatprep.subr.mxu0 %v12900_v0 }
 0xd8c   : > { %v5677_v25 = vcombine.high %v5675_v11, %v5675_v11  ;;  %v5691_v26 = vrot.slane %v5675_v11, %v13229_v2  ;;  %v5698_v27 = vrot.slane %v5676_v19, %v13229_v2  ;;  %v5706_v28 = vcombine.high %v5684_v21, %v5684_v21  ;;  %5718 = vst.msk [vmem:[%s13237_s12 + $0x7] sm:$0x1] %vm943_vm7, %v5684_v21  ;;  %v7091_v11 = vld [vmem:[%s13057_s6 + $0x1a] sm:$0x1]  ;;  %v7092_v19 = vld [vmem:[%s13057_s6 + $0x2a] sm:$0x1] }
 0xd8d   : > { %v7099_v21 = vrot.slane %v7091_v11, 7  ;;  %v14061_v11 = vld [vmem:[%s14555_s1] sm:$0xff] }
 0xd8e   : > { %v5705_v29 = vrot.slane %v5677_v25, %v13229_v2  ;;  %v5707_v30 = vcombine.high %v5691_v26, %v5691_v26  ;;  %v5708_v31 = vcombine.high %v5698_v27, %v5698_v27  ;;  %5719 = vst.msk [vmem:[%s13237_s12 + $0x17] sm:$0x1] %vm943_vm7, %v5698_v27  ;;  %5720 = vst.msk [vmem:[%s13237_s12 + $0x27] sm:$0x1] %vm943_vm7, %v5706_v28  ;;  %v7090_v25 = vld [vmem:[%s13057_s6 + $0xa] sm:$0x1] }
 0xd8f   : > { %5722 = vst.msk [vmem:[%s13237_s12 + $0x47] sm:$0x1] %vm943_vm7, %v5691_v26  ;;  %v7093_v26 = vld [vmem:[%s13057_s6 + $0x3a] sm:$0x1]  ;;  %v7101_v27 = vrot.slane %v7092_v19, 6  ;;  %v7100_v28 = vsel %vm262_vm1, %v7099_v21, %v7090_v25 }
 0xd90   : > { %v5709_v32 = vcombine.high %v5705_v29, %v5705_v29  ;;  %5721 = vst.msk [vmem:[%s13237_s12 + $0x37] sm:$0x1] %vm943_vm7, %v5708_v31  ;;  %5723 = vst.msk [vmem:[%s13237_s12 + $0x57] sm:$0x1] %vm943_vm7, %v5705_v29  ;;  %v7103_v29 = vrot.slane %v7093_v26, 5  ;;  %v14074_v26 = vld [vmem:[#allocation5 + $0x38] sm:$0xff] }
 0xd91   : > { %5724 = vst.msk [vmem:[%s13237_s12 + $0x67] sm:$0x1] %vm943_vm7, %v5707_v30  ;;  %v7102_v30 = vsel %vm265_vm2, %v7101_v27, %v7100_v28  ;;  %v14077_v28 = vld [vmem:[#allocation5 + $0x30] sm:$0xff] }
 0xd92   : > { %5725 = vst.msk [vmem:[%s13237_s12 + $0x77] sm:$0x1] %vm943_vm7, %v5709_v32  ;;  %v7104_v31 = vsel %vm268_vm3, %v7103_v29, %v7102_v30 }
 0xe3a   : > { %v5963_v24 = vpop.f32.mrf.mxu0 }
 0xe3b   : > { %v6037_v49 = vadd.f32 %v6036_v13, %v5963_v24 }
 0xe3c   : > { %v12274_v43 = vpop.f32.mrf.mxu0 }
 0xe3e   : > { %v6110_v20 = vpop.f32.mrf.mxu0 }
 0xe3f   : > { %12292 = vmatmul.mubr.msk.f32.vlgmr.msra.gmra.mxu1 %vm427_vm6, %v6110_v20 }
 0xe40   : > { %12300 = vmatpush3.msra.mxu1 %v13628_v62  ;;  %v12286_v45 = vpop.f32.mrf.mxu0  ;;  %12303 = vmatprep.mubr.msk.f32.mxu1 %vm12901_vm0, %v12900_v0 }
 0xe41   : > { %12301 = vmatprep.subr.mxu1 %v12900_v0 }
 0xe42   : > { %12302 = vmatpush3.msra.mxu1 %v13631_v1  ;;  %v6260_v42 = vpop.f32.mrf.mxu0 }
 0xe43   : > { %12311 = vmatprep.subr.mxu1 %v12900_v0  ;;  %12304 = vmatmul.mubr.msk.f32.vlgmr.msra.gmra.mxu1 %vm427_vm6, %v6260_v42 }
 0xe44   : > { %12312 = vmatpush3.msk.msra.mxu1 %vm274_vm4, %v6422_v23  ;;  %v12298_v17 = vpop.f32.mrf.mxu0  ;;  %12313 = vmatprep.mubr.msk.f32.mxu1 %vm12901_vm0, %v12900_v0 }
 0xe45   : > { %12323 = vmatprep.subr.mxu1 %v12900_v0  ;;  %v14004_v17 = vld [vmem:[%s14555_s1 + $0x10] sm:$0xff] }
 0xe46   : > { %v6494_v22 = vpop.f32.mrf.mxu0 }
 0xe47   : > { %12314 = vmatmul.mubr.msk.f32.vlgmr.msra.gmra.mxu1 %vm270_vm5, %v13646_v6 }
 0xe48   : > { %12324 = vmatpush3.msra.mxu1 %v13533_v44  ;;  %12327 = vmatprep.mubr.msk.f32.mxu1 %vm12901_vm0, %v12900_v0  ;;  %v12310_v48 = vpop.f32.mrf.mxu0 }
 0xe49   : > { %12325 = vmatprep.subr.mxu1 %v12900_v0 }
 0xe4a   : > { %12326 = vmatpush3.msra.mxu1 %v13541_v18 }
 0xe4b   : > { %12335 = vmatprep.subr.mxu1 %v12900_v0  ;;  %12328 = vmatmul.mubr.msk.f32.vlgmr.msra.gmra.mxu1 %vm427_vm6, %v6494_v22  ;;  %v14015_v22 = vld [vmem:[%s14555_s1 + $0x18] sm:$0xff] }
 0xe4c   : > { %12336 = vmatpush3.msra.mxu1 %v13598_v46  ;;  %12339 = vmatprep.mubr.msk.f32.mxu1 %vm12901_vm0, %v12900_v0 }
 0xe4d   : > { %12337 = vmatprep.subr.mxu1 %v12900_v0 }
 0xe4e   : > { %12338 = vmatpush3.msra.mxu1 %v13601_v47 }
 0xe4f   : > { %12347 = vmatprep.subr.mxu1 %v12900_v0 }
 0xeff   : > { %v6185_v44 = vpop.f32.mrf.mxu1 }
 0xf00   : > { %v6189_v50 = vadd.f32 %v6185_v44, %v6037_v49 }
 0xf01   : > { %v12293_v18 = vpop.f32.mrf.mxu1 }
 0xf03   : > { %v6335_v51 = vpop.f32.mrf.mxu1 }
 0xf04   : > { %v6339_v52 = vadd.f32 %v6335_v51, %v6189_v50 }
 0xf05   : > { %v12305_v53 = vpop.f32.mrf.mxu1 }
 0xf06   : > { %v6340_v55 = vadd.f32 %v6339_v52, %v13209_v54 }
 0xf07   : > { %v6570_v56 = vpop.f32.mrf.mxu1 }
 0xf08   : > { %12740 = vtanh.f32 %v6340_v55  ;;  %12321 = vmatmul.mubr.msk.f32.vlgmr.msra.gmra.mxu0 %vm427_vm6, %v6570_v56 }
 0xf09   : > { %12331 = vmatpush3.msk.msra.mxu0 %vm274_vm4, %v6422_v23  ;;  %v12315_v46 = vpop.f32.mrf.mxu1  ;;  %12332 = vmatprep.mubr.msk.f32.mxu0 %vm12901_vm0, %v12900_v0 }
 0xf0a   : > { %12342 = vmatprep.subr.mxu0 %v12900_v0 }
 0xf0b   : > { %v6718_v10 = vpop.f32.mrf.mxu1 }
 0xf0c   : > { %12333 = vmatmul.mubr.msk.f32.vlgmr.msra.gmra.mxu0 %vm270_vm5, %v13558_v15 }
 0xf0d   : > { %12343 = vmatpush3.msk.msra.mxu0 %vm274_vm4, %v6422_v23  ;;  %12344 = vmatprep.mubr.msk.f32.mxu0 %vm12901_vm0, %v12900_v0  ;;  %v12329_v12 = vpop.f32.mrf.mxu1 }
 0xf0e   : > { %12354 = vmatprep.subr.mxu0 %v12900_v0 }
 0xf10   : > { %12345 = vmatmul.mubr.msk.f32.vlgmr.msra.gmra.mxu0 %vm270_vm5, %v13569_v33 }
 0xf11   : > { %12356 = vmatprep.mubr.msk.f32.mxu0 %vm12901_vm0, %v12900_v0  ;;  %12355 = vmatpush3.msk.msra.mxu0 %vm274_vm4, %v7104_v31 }
 0xf12   : > { %12364 = vmatprep.subr.mxu0 %v12900_v0 }
 0xf14   : > { %12357 = vmatmul.mubr.msk.f32.vlgmr.msra.gmra.mxu0 %vm270_vm5, %v13615_v58 }
 0xf15   : > { %v12741_v47 = vpop.eup %12740  ;;  %12368 = vmatprep.mubr.msk.f32.mxu0 %vm12901_vm0, %v12900_v0 }
 0xf16   : > { %v6343_v57 = vcombine.high %v12741_v47, %v12741_v47  ;;  %v6350_v15 = vrot.slane %v12741_v47, %v13229_v2 }
 0xf18   : > { %v6357_v59 = vrot.slane %v6343_v57, %v13229_v2  ;;  %v6358_v60 = vcombine.high %v6350_v15, %v6350_v15  ;;  %v6366_v61 = vrot.slane %v6350_v15, %v13229_v2 }
 0xf1a   : > { %v6359_v33 = vcombine.high %v6357_v59, %v6357_v59  ;;  %v6373_v63 = vrot.slane %v6357_v59, %v13229_v2  ;;  %v6380_v3 = vrot.slane %v6358_v60, %v13229_v2  ;;  %v6388_v4 = vcombine.high %v6366_v61, %v6366_v61  ;;  %6400 = vst.msk [vmem:[%s13237_s12 + $0x8] sm:$0x1] %vm943_vm7, %v6366_v61  ;;  %v14044_v60 = vld [vmem:[#allocation5 + $0x28] sm:$0xff]  ;;  %v14047_v61 = vld [vmem:[#allocation5 + $0x20] sm:$0xff] }
 0xf1c   : > { %v6387_v5 = vrot.slane %v6359_v33, %v13229_v2  ;;  %v6389_v7 = vcombine.high %v6373_v63, %v6373_v63  ;;  %v6390_v8 = vcombine.high %v6380_v3, %v6380_v3  ;;  %6401 = vst.msk [vmem:[%s13237_s12 + $0x18] sm:$0x1] %vm943_vm7, %v6380_v3  ;;  %6402 = vst.msk [vmem:[%s13237_s12 + $0x28] sm:$0x1] %vm943_vm7, %v6388_v4  ;;  %v7774_v3 = vld [vmem:[%s13057_s6 + $0x2b] sm:$0x1] }
 0xf1d   : > { %6404 = vst.msk [vmem:[%s13237_s12 + $0x48] sm:$0x1] %vm943_vm7, %v6373_v63  ;;  %v7773_v63 = vld [vmem:[%s13057_s6 + $0x1b] sm:$0x1] }
 0xf1e   : > { %v6391_v9 = vcombine.high %v6387_v5, %v6387_v5  ;;  %6403 = vst.msk [vmem:[%s13237_s12 + $0x38] sm:$0x1] %vm943_vm7, %v6390_v8  ;;  %6405 = vst.msk [vmem:[%s13237_s12 + $0x58] sm:$0x1] %vm943_vm7, %v6387_v5  ;;  %v7781_v4 = vrot.slane %v7773_v63, 7  ;;  %v7783_v8 = vrot.slane %v7774_v3, 6 }
 0xf1f   : > { %6406 = vst.msk [vmem:[%s13237_s12 + $0x68] sm:$0x1] %vm943_vm7, %v6389_v7  ;;  %v7772_v5 = vld [vmem:[%s13057_s6 + $0xb] sm:$0x1]  ;;  %v7775_v7 = vld [vmem:[%s13057_s6 + $0x3b] sm:$0x1] }
 0xf20   : > { %6407 = vst.msk [vmem:[%s13237_s12 + $0x78] sm:$0x1] %vm943_vm7, %v6391_v9  ;;  %v7782_v9 = vsel %vm262_vm1, %v7781_v4, %v7772_v5 }
 0xf21   : > { %v7784_v12 = vsel %vm265_vm2, %v7783_v8, %v7782_v9 }
 0xfc8   : > { %v6645_v32 = vpop.f32.mrf.mxu0 }
 0xfc9   : > { %v6719_v39 = vadd.f32 %v6718_v10, %v6645_v32  ;;  %v7785_v10 = vrot.slane %v7775_v7, 5  ;;  %v14092_v32 = vld [vmem:[%s14555_s1 + $0x8] sm:$0xff] }
 0xfca   : > { %v12322_v13 = vpop.f32.mrf.mxu0 }
 0xfcb   : > { %v7786_v19 = vsel %vm268_vm3, %v7785_v10, %v7784_v12 }
 0xfcc   : > { %v6792_v34 = vpop.f32.mrf.mxu0 }
 0xfcd   : > { %12340 = vmatmul.mubr.msk.f32.vlgmr.msra.gmra.mxu1 %vm427_vm6, %v6792_v34 }
 0xfce   : > { %12348 = vmatpush3.msra.mxu1 %v13628_v62  ;;  %v12334_v14 = vpop.f32.mrf.mxu0  ;;  %12351 = vmatprep.mubr.msk.f32.mxu1 %vm12901_vm0, %v12900_v0  ;;  %v13977_v62 = vld [vmem:[#allocation5 + $0x18] sm:$0xff] }
 0xfcf   : > { %12349 = vmatprep.subr.mxu1 %v12900_v0  ;;  %12365 = vmatpush3.msra.mxu0 %v13977_v62 }
 0xfd0   : > { %12350 = vmatpush3.msra.mxu1 %v13631_v1  ;;  %v6942_v58 = vpop.f32.mrf.mxu0  ;;  %v13979_v1 = vld [vmem:[#allocation5 + $0x8] sm:$0xff]  ;;  %12366 = vmatprep.subr.mxu0 %v12900_v0 }
 0xfd1   : > { %12359 = vmatprep.subr.mxu1 %v12900_v0  ;;  %12352 = vmatmul.mubr.msk.f32.vlgmr.msra.gmra.mxu1 %vm427_vm6, %v6942_v58 }
 0xfd2   : > { %12360 = vmatpush3.msk.msra.mxu1 %vm274_vm4, %v7104_v31  ;;  %v12346_v35 = vpop.f32.mrf.mxu0  ;;  %12361 = vmatprep.mubr.msk.f32.mxu1 %vm12901_vm0, %v12900_v0 }
 0xfd3   : > { %12371 = vmatprep.subr.mxu1 %v12900_v0  ;;  %12367 = vmatpush3.msra.mxu0 %v13984_v16 }
 0xfd4   : > { %12378 = vmatprep.subr.mxu0 %v12900_v0 }
 0xfd5   : > { %12362 = vmatmul.mubr.msk.f32.vlgmr.msra.gmra.mxu1 %vm270_vm5, %v13646_v6  ;;  %v7176_v6 = vpop.f32.mrf.mxu0 }
 0xfd6   : > { %12375 = vmatprep.mubr.msk.f32.mxu1 %vm12901_vm0, %v12900_v0  ;;  %12372 = vmatpush3.msra.mxu1 %v13979_v1 }
 0xfd7   : > { %12373 = vmatprep.subr.mxu1 %v12900_v0  ;;  %v12358_v37 = vpop.f32.mrf.mxu0 }
 0xfd8   : > { %12374 = vmatpush3.msra.mxu1 %v13987_v36 }
 0xfd9   : > { %12376 = vmatmul.mubr.msk.f32.vlgmr.msra.gmra.mxu1 %vm427_vm6, %v7176_v6  ;;  %12383 = vmatprep.subr.mxu1 %v12900_v0 }
 0xfda   : > { %12387 = vmatprep.mubr.msk.f32.mxu1 %vm12901_vm0, %v12900_v0  ;;  %12384 = vmatpush3.msra.mxu1 %v14044_v60 }
 0xfdb   : > { %12385 = vmatprep.subr.mxu1 %v12900_v0 }
 0xfdc   : > { %12386 = vmatpush3.msra.mxu1 %v14047_v61 }
 0xfdd   : > { %12395 = vmatprep.subr.mxu1 %v12900_v0 }
0x108d   : > { %v6867_v38 = vpop.f32.mrf.mxu1 }
0x108e   : > { %v6871_v41 = vadd.f32 %v6867_v38, %v6719_v39 }
0x108f   : > { %v12341_v40 = vpop.f32.mrf.mxu1 }
0x1091   : > { %v7017_v23 = vpop.f32.mrf.mxu1 }
0x1092   : > { %v7021_v24 = vadd.f32 %v7017_v23, %v6871_v41 }
0x1093   : > { %v12353_v43 = vpop.f32.mrf.mxu1 }
0x1094   : > { %v7022_v20 = vadd.f32 %v7021_v24, %v13209_v54 }
0x1095   : > { %v7252_v45 = vpop.f32.mrf.mxu1 }
0x1096   : > { %12742 = vtanh.f32 %v7022_v20  ;;  %12369 = vmatmul.mubr.msk.f32.vlgmr.msra.gmra.mxu0 %vm427_vm6, %v7252_v45 }
0x1097   : > { %12379 = vmatpush3.msk.msra.mxu0 %vm274_vm4, %v7104_v31  ;;  %v12363_v42 = vpop.f32.mrf.mxu1  ;;  %12380 = vmatprep.mubr.msk.f32.mxu0 %vm12901_vm0, %v12900_v0 }
0x1098   : > { %12390 = vmatprep.subr.mxu0 %v12900_v0 }
0x1099   : > { %v7400_v59 = vpop.f32.mrf.mxu1 }
0x109a   : > { %12381 = vmatmul.mubr.msk.f32.vlgmr.msra.gmra.mxu0 %vm270_vm5, %v14004_v17 }
0x109b   : > { %12391 = vmatpush3.msk.msra.mxu0 %vm274_vm4, %v7104_v31  ;;  %12392 = vmatprep.mubr.msk.f32.mxu0 %vm12901_vm0, %v12900_v0  ;;  %v12377_v33 = vpop.f32.mrf.mxu1 }
0x109c   : > { %12402 = vmatprep.subr.mxu0 %v12900_v0  ;;  %v8457_v33 = vld [vmem:[%s13057_s6 + $0x3c] sm:$0x1] }
0x109d   : > { %v8467_v4 = vrot.slane %v8457_v33, 5 }
0x109e   : > { %12393 = vmatmul.mubr.msk.f32.vlgmr.msra.gmra.mxu0 %vm270_vm5, %v14015_v22 }
0x109f   : > { %12404 = vmatprep.mubr.msk.f32.mxu0 %vm12901_vm0, %v12900_v0  ;;  %12403 = vmatpush3.msk.msra.mxu0 %vm274_vm4, %v7786_v19 }
0x10a0   : > { %12412 = vmatprep.subr.mxu0 %v12900_v0 }
0x10a2   : > { %12405 = vmatmul.mubr.msk.f32.vlgmr.msra.gmra.mxu0 %vm270_vm5, %v14061_v11 }
0x10a3   : > { %v12743_v48 = vpop.eup %12742  ;;  %12413 = vmatpush3.msra.mxu0 %v13977_v62  ;;  %12416 = vmatprep.mubr.msk.f32.mxu0 %vm12901_vm0, %v12900_v0 }
0x10a4   : > { %v7025_v44 = vcombine.high %v12743_v48, %v12743_v48  ;;  %v7032_v49 = vrot.slane %v12743_v48, %v13229_v2  ;;  %12414 = vmatprep.subr.mxu0 %v12900_v0 }
0x10a5   : > { %12415 = vmatpush3.msra.mxu0 %v13984_v16 }
0x10a6   : > { %v7039_v18 = vrot.slane %v7025_v44, %v13229_v2  ;;  %v7040_v50 = vcombine.high %v7032_v49, %v7032_v49  ;;  %v7048_v51 = vrot.slane %v7032_v49, %v13229_v2  ;;  %12426 = vmatprep.subr.mxu0 %v12900_v0 }
0x10a8   : > { %v7041_v52 = vcombine.high %v7039_v18, %v7039_v18  ;;  %v7055_v53 = vrot.slane %v7039_v18, %v13229_v2  ;;  %v7062_v55 = vrot.slane %v7040_v50, %v13229_v2  ;;  %v7070_v56 = vcombine.high %v7048_v51, %v7048_v51  ;;  %7082 = vst.msk [vmem:[%s13237_s12 + $0x9] sm:$0x1] %vm943_vm7, %v7048_v51 }
0x10aa   : > { %v7069_v46 = vrot.slane %v7041_v52, %v13229_v2  ;;  %v7071_v47 = vcombine.high %v7055_v53, %v7055_v53  ;;  %v7072_v57 = vcombine.high %v7062_v55, %v7062_v55  ;;  %7083 = vst.msk [vmem:[%s13237_s12 + $0x19] sm:$0x1] %vm943_vm7, %v7062_v55  ;;  %7084 = vst.msk [vmem:[%s13237_s12 + $0x29] sm:$0x1] %vm943_vm7, %v7070_v56 }
0x10ab   : > { %7086 = vst.msk [vmem:[%s13237_s12 + $0x49] sm:$0x1] %vm943_vm7, %v7055_v53 }
0x10ac   : > { %v7073_v15 = vcombine.high %v7069_v46, %v7069_v46  ;;  %7085 = vst.msk [vmem:[%s13237_s12 + $0x39] sm:$0x1] %vm943_vm7, %v7072_v57  ;;  %7087 = vst.msk [vmem:[%s13237_s12 + $0x59] sm:$0x1] %vm943_vm7, %v7069_v46  ;;  %v8456_v57 = vld [vmem:[%s13057_s6 + $0x2c] sm:$0x1] }
0x10ad   : > { %7088 = vst.msk [vmem:[%s13237_s12 + $0x69] sm:$0x1] %vm943_vm7, %v7071_v47  ;;  %v8455_v47 = vld [vmem:[%s13057_s6 + $0x1c] sm:$0x1]  ;;  %v8465_v63 = vrot.slane %v8456_v57, 6 }
0x10ae   : > { %7089 = vst.msk [vmem:[%s13237_s12 + $0x79] sm:$0x1] %vm943_vm7, %v7073_v15  ;;  %v8463_v15 = vrot.slane %v8455_v47, 7 }
0x1156   : > { %v7327_v21 = vpop.f32.mrf.mxu0 }
0x1157   : > { %v7401_v58 = vadd.f32 %v7400_v59, %v7327_v21  ;;  %v8454_v59 = vld [vmem:[%s13057_s6 + $0xc] sm:$0x1] }
0x1158   : > { %v12370_v25 = vpop.f32.mrf.mxu0  ;;  %v8464_v3 = vsel %vm262_vm1, %v8463_v15, %v8454_v59 }
0x1159   : > { %v8466_v5 = vsel %vm265_vm2, %v8465_v63, %v8464_v3 }
0x115a   : > { %v7474_v27 = vpop.f32.mrf.mxu0  ;;  %v8468_v7 = vsel %vm268_vm3, %v8467_v4, %v8466_v5 }
0x115b   : > { %12388 = vmatmul.mubr.msk.f32.vlgmr.msra.gmra.mxu1 %vm427_vm6, %v7474_v27 }
0x115c   : > { %12396 = vmatpush3.msra.mxu1 %v14074_v26  ;;  %v12382_v29 = vpop.f32.mrf.mxu0  ;;  %12399 = vmatprep.mubr.msk.f32.mxu1 %vm12901_vm0, %v12900_v0 }
0x115d   : > { %12397 = vmatprep.subr.mxu1 %v12900_v0 }
0x115e   : > { %12398 = vmatpush3.msra.mxu1 %v14077_v28  ;;  %v7624_v30 = vpop.f32.mrf.mxu0 }
0x115f   : > { %12407 = vmatprep.subr.mxu1 %v12900_v0  ;;  %12400 = vmatmul.mubr.msk.f32.vlgmr.msra.gmra.mxu1 %vm427_vm6, %v7624_v30 }
0x1160   : > { %12408 = vmatpush3.msk.msra.mxu1 %vm274_vm4, %v7786_v19  ;;  %v12394_v31 = vpop.f32.mrf.mxu0  ;;  %12409 = vmatprep.mubr.msk.f32.mxu1 %vm12901_vm0, %v12900_v0 }
0x1161   : > { %12419 = vmatprep.subr.mxu1 %v12900_v0 }
0x1162   : > { %v7858_v13 = vpop.f32.mrf.mxu0 }
0x1163   : > { %12410 = vmatmul.mubr.msk.f32.vlgmr.msra.gmra.mxu1 %vm270_vm5, %v14092_v32 }
0x1164   : > { %12420 = vmatpush3.msra.mxu1 %v13979_v1  ;;  %12423 = vmatprep.mubr.msk.f32.mxu1 %vm12901_vm0, %v12900_v0  ;;  %v12406_v34 = vpop.f32.mrf.mxu0 }
0x1165   : > { %12421 = vmatprep.subr.mxu1 %v12900_v0 }
0x1166   : > { %12422 = vmatpush3.msra.mxu1 %v13987_v36 }
0x1167   : > { %12431 = vmatprep.subr.mxu1 %v12900_v0  ;;  %12424 = vmatmul.mubr.msk.f32.vlgmr.msra.gmra.mxu1 %vm427_vm6, %v7858_v13 }
0x1168   : > { %12432 = vmatpush3.msra.mxu1 %v14044_v60  ;;  %12435 = vmatprep.mubr.msk.f32.mxu1 %vm12901_vm0, %v12900_v0 }
0x1169   : > { %12433 = vmatprep.subr.mxu1 %v12900_v0 }
0x116a   : > { %12434 = vmatpush3.msra.mxu1 %v14047_v61 }
0x116b   : > { %12443 = vmatprep.subr.mxu1 %v12900_v0 }
0x121b   : > { %v7549_v14 = vpop.f32.mrf.mxu1 }
0x121c   : > { %v7553_v6 = vadd.f32 %v7549_v14, %v7401_v58 }
0x121d   : > { %v12389_v35 = vpop.f32.mrf.mxu1 }
0x121f   : > { %v7699_v37 = vpop.f32.mrf.mxu1 }
0x1220   : > { %v7703_v38 = vadd.f32 %v7699_v37, %v7553_v6 }
0x1221   : > { %v12401_v39 = vpop.f32.mrf.mxu1 }
0x1222   : > { %v7704_v40 = vadd.f32 %v7703_v38, %v13209_v54 }
0x1223   : > { %v7934_v41 = vpop.f32.mrf.mxu1 }
0x1224   : > { %12744 = vtanh.f32 %v7704_v40  ;;  %12417 = vmatmul.mubr.msk.f32.vlgmr.msra.gmra.mxu0 %vm427_vm6, %v7934_v41 }
0x1225   : > { %12427 = vmatpush3.msk.msra.mxu0 %vm274_vm4, %v7786_v19  ;;  %v12411_v23 = vpop.f32.mrf.mxu1  ;;  %12428 = vmatprep.mubr.msk.f32.mxu0 %vm12901_vm0, %v12900_v0 }
0x1226   : > { %12438 = vmatprep.subr.mxu0 %v12900_v0 }
0x1227   : > { %v8082_v56 = vpop.f32.mrf.mxu1 }
0x1228   : > { %12429 = vmatmul.mubr.msk.f32.vlgmr.msra.gmra.mxu0 %vm270_vm5, %v14004_v17 }
0x1229   : > { %12439 = vmatpush3.msk.msra.mxu0 %vm274_vm4, %v7786_v19  ;;  %12440 = vmatprep.mubr.msk.f32.mxu0 %vm12901_vm0, %v12900_v0  ;;  %v12425_v46 = vpop.f32.mrf.mxu1 }
0x122a   : > { %12450 = vmatprep.subr.mxu0 %v12900_v0  ;;  %v9139_v46 = vld [vmem:[%s13057_s6 + $0x3d] sm:$0x1] }
0x122b   : > { %v9149_v15 = vrot.slane %v9139_v46, 5 }
0x122c   : > { %12441 = vmatmul.mubr.msk.f32.vlgmr.msra.gmra.mxu0 %vm270_vm5, %v14015_v22 }
0x122d   : > { %12452 = vmatprep.mubr.msk.f32.mxu0 %vm12901_vm0, %v12900_v0  ;;  %12451 = vmatpush3.msk.msra.mxu0 %vm274_vm4, %v8468_v7 }
0x122e   : > { %12460 = vmatprep.subr.mxu0 %v12900_v0 }
0x1230   : > { %12453 = vmatmul.mubr.msk.f32.vlgmr.msra.gmra.mxu0 %vm270_vm5, %v14061_v11 }
0x1231   : > { %v12745_v24 = vpop.eup %12744  ;;  %12461 = vmatpush3.msra.mxu0 %v13977_v62  ;;  %12464 = vmatprep.mubr.msk.f32.mxu0 %vm12901_vm0, %v12900_v0 }
0x1232   : > { %v7707_v43 = vcombine.high %v12745_v24, %v12745_v24  ;;  %v7714_v20 = vrot.slane %v12745_v24, %v13229_v2  ;;  %12462 = vmatprep.subr.mxu0 %v12900_v0 }
0x1233   : > { %12463 = vmatpush3.msra.mxu0 %v13984_v16 }
0x1234   : > { %v7721_v45 = vrot.slane %v7707_v43, %v13229_v2  ;;  %v7722_v42 = vcombine.high %v7714_v20, %v7714_v20  ;;  %v7730_v48 = vrot.slane %v7714_v20, %v13229_v2  ;;  %12474 = vmatprep.subr.mxu0 %v12900_v0 }
0x1236   : > { %v7723_v44 = vcombine.high %v7721_v45, %v7721_v45  ;;  %v7737_v49 = vrot.slane %v7721_v45, %v13229_v2  ;;  %v7744_v18 = vrot.slane %v7722_v42, %v13229_v2  ;;  %v7752_v50 = vcombine.high %v7730_v48, %v7730_v48  ;;  %7764 = vst.msk [vmem:[%s13237_s12 + $0xa] sm:$0x1] %vm943_vm7, %v7730_v48 }
0x1238   : > { %v7751_v51 = vrot.slane %v7723_v44, %v13229_v2  ;;  %v7753_v52 = vcombine.high %v7737_v49, %v7737_v49  ;;  %v7754_v53 = vcombine.high %v7744_v18, %v7744_v18  ;;  %7765 = vst.msk [vmem:[%s13237_s12 + $0x1a] sm:$0x1] %vm943_vm7, %v7744_v18  ;;  %7766 = vst.msk [vmem:[%s13237_s12 + $0x2a] sm:$0x1] %vm943_vm7, %v7752_v50 }
0x1239   : > { %7768 = vst.msk [vmem:[%s13237_s12 + $0x4a] sm:$0x1] %vm943_vm7, %v7737_v49 }
0x123a   : > { %v7755_v55 = vcombine.high %v7751_v51, %v7751_v51  ;;  %7767 = vst.msk [vmem:[%s13237_s12 + $0x3a] sm:$0x1] %vm943_vm7, %v7754_v53  ;;  %7769 = vst.msk [vmem:[%s13237_s12 + $0x5a] sm:$0x1] %vm943_vm7, %v7751_v51  ;;  %v9138_v53 = vld [vmem:[%s13057_s6 + $0x2d] sm:$0x1] }
0x123b   : > { %7770 = vst.msk [vmem:[%s13237_s12 + $0x6a] sm:$0x1] %vm943_vm7, %v7753_v52  ;;  %v9137_v52 = vld [vmem:[%s13057_s6 + $0x1d] sm:$0x1]  ;;  %v9147_v47 = vrot.slane %v9138_v53, 6 }
0x123c   : > { %7771 = vst.msk [vmem:[%s13237_s12 + $0x7a] sm:$0x1] %vm943_vm7, %v7755_v55  ;;  %v9145_v55 = vrot.slane %v9137_v52, 7 }
0x12e4   : > { %v8009_v8 = vpop.f32.mrf.mxu0 }
0x12e5   : > { %v8083_v30 = vadd.f32 %v8082_v56, %v8009_v8  ;;  %v9136_v56 = vld [vmem:[%s13057_s6 + $0xd] sm:$0x1] }
0x12e6   : > { %v12418_v9 = vpop.f32.mrf.mxu0  ;;  %v9146_v57 = vsel %vm262_vm1, %v9145_v55, %v9136_v56 }
0x12e7   : > { %v9148_v59 = vsel %vm265_vm2, %v9147_v47, %v9146_v57 }
0x12e8   : > { %v8156_v10 = vpop.f32.mrf.mxu0  ;;  %v9150_v33 = vsel %vm268_vm3, %v9149_v15, %v9148_v59 }
0x12e9   : > { %12436 = vmatmul.mubr.msk.f32.vlgmr.msra.gmra.mxu1 %vm427_vm6, %v8156_v10 }
0x12ea   : > { %12444 = vmatpush3.msra.mxu1 %v14074_v26  ;;  %v12430_v12 = vpop.f32.mrf.mxu0  ;;  %12447 = vmatprep.mubr.msk.f32.mxu1 %vm12901_vm0, %v12900_v0 }
0x12eb   : > { %12445 = vmatprep.subr.mxu1 %v12900_v0 }
0x12ec   : > { %12446 = vmatpush3.msra.mxu1 %v14077_v28  ;;  %v8306_v19 = vpop.f32.mrf.mxu0 }
0x12ed   : > { %12455 = vmatprep.subr.mxu1 %v12900_v0  ;;  %12448 = vmatmul.mubr.msk.f32.vlgmr.msra.gmra.mxu1 %vm427_vm6, %v8306_v19 }
0x12ee   : > { %12456 = vmatpush3.msk.msra.mxu1 %vm274_vm4, %v8468_v7  ;;  %v12442_v21 = vpop.f32.mrf.mxu0  ;;  %12457 = vmatprep.mubr.msk.f32.mxu1 %vm12901_vm0, %v12900_v0 }
0x12ef   : > { %12467 = vmatprep.subr.mxu1 %v12900_v0 }
0x12f0   : > { %v8540_v25 = vpop.f32.mrf.mxu0 }
0x12f1   : > { %12458 = vmatmul.mubr.msk.f32.vlgmr.msra.gmra.mxu1 %vm270_vm5, %v14092_v32 }
0x12f2   : > { %12468 = vmatpush3.msra.mxu1 %v13979_v1  ;;  %12471 = vmatprep.mubr.msk.f32.mxu1 %vm12901_vm0, %v12900_v0  ;;  %v12454_v27 = vpop.f32.mrf.mxu0 }
0x12f3   : > { %12469 = vmatprep.subr.mxu1 %v12900_v0 }
0x12f4   : > { %12470 = vmatpush3.msra.mxu1 %v13987_v36 }
0x12f5   : > { %12479 = vmatprep.subr.mxu1 %v12900_v0  ;;  %12472 = vmatmul.mubr.msk.f32.vlgmr.msra.gmra.mxu1 %vm427_vm6, %v8540_v25 }
0x12f6   : > { %12480 = vmatpush3.msra.mxu1 %v14044_v60  ;;  %12483 = vmatprep.mubr.msk.f32.mxu1 %vm12901_vm0, %v12900_v0 }
0x12f7   : > { %12481 = vmatprep.subr.mxu1 %v12900_v0 }
0x12f8   : > { %12482 = vmatpush3.msra.mxu1 %v14047_v61 }
0x12f9   : > { %12491 = vmatprep.subr.mxu1 %v12900_v0 }
0x13a9   : > { %v8231_v29 = vpop.f32.mrf.mxu1 }
0x13aa   : > { %v8235_v13 = vadd.f32 %v8231_v29, %v8083_v30 }
0x13ab   : > { %v12437_v31 = vpop.f32.mrf.mxu1 }
0x13ad   : > { %v8381_v34 = vpop.f32.mrf.mxu1 }
0x13ae   : > { %v8385_v14 = vadd.f32 %v8381_v34, %v8235_v13 }
0x13af   : > { %v12449_v58 = vpop.f32.mrf.mxu1 }
0x13b0   : > { %v8386_v35 = vadd.f32 %v8385_v14, %v13209_v54 }
0x13b1   : > { %v8616_v6 = vpop.f32.mrf.mxu1 }
0x13b2   : > { %12746 = vtanh.f32 %v8386_v35  ;;  %12465 = vmatmul.mubr.msk.f32.vlgmr.msra.gmra.mxu0 %vm427_vm6, %v8616_v6 }
0x13b3   : > { %12475 = vmatpush3.msk.msra.mxu0 %vm274_vm4, %v8468_v7  ;;  %v12459_v37 = vpop.f32.mrf.mxu1  ;;  %12476 = vmatprep.mubr.msk.f32.mxu0 %vm12901_vm0, %v12900_v0 }
0x13b4   : > { %12486 = vmatprep.subr.mxu0 %v12900_v0 }
0x13b5   : > { %v8764_v50 = vpop.f32.mrf.mxu1 }
0x13b6   : > { %12477 = vmatmul.mubr.msk.f32.vlgmr.msra.gmra.mxu0 %vm270_vm5, %v14004_v17 }
0x13b7   : > { %12487 = vmatpush3.msk.msra.mxu0 %vm274_vm4, %v8468_v7  ;;  %12488 = vmatprep.mubr.msk.f32.mxu0 %vm12901_vm0, %v12900_v0  ;;  %v12473_v51 = vpop.f32.mrf.mxu1 }
0x13b8   : > { %12498 = vmatprep.subr.mxu0 %v12900_v0  ;;  %v9821_v51 = vld [vmem:[%s13057_s6 + $0x3e] sm:$0x1] }
0x13b9   : > { %v9831_v55 = vrot.slane %v9821_v51, 5 }
0x13ba   : > { %12489 = vmatmul.mubr.msk.f32.vlgmr.msra.gmra.mxu0 %vm270_vm5, %v14015_v22 }
0x13bb   : > { %12500 = vmatprep.mubr.msk.f32.mxu0 %vm12901_vm0, %v12900_v0  ;;  %12499 = vmatpush3.msk.msra.mxu0 %vm274_vm4, %v9150_v33 }
0x13bc   : > { %12508 = vmatprep.subr.mxu0 %v12900_v0 }
0x13be   : > { %12501 = vmatmul.mubr.msk.f32.vlgmr.msra.gmra.mxu0 %vm270_vm5, %v14061_v11 }
0x13bf   : > { %v12747_v38 = vpop.eup %12746  ;;  %12509 = vmatpush3.msra.mxu0 %v13977_v62  ;;  %12512 = vmatprep.mubr.msk.f32.mxu0 %vm12901_vm0, %v12900_v0 }
0x13c0   : > { %v8389_v39 = vcombine.high %v12747_v38, %v12747_v38  ;;  %v8396_v40 = vrot.slane %v12747_v38, %v13229_v2  ;;  %12510 = vmatprep.subr.mxu0 %v12900_v0 }
0x13c1   : > { %12511 = vmatpush3.msra.mxu0 %v13984_v16 }
0x13c2   : > { %v8403_v41 = vrot.slane %v8389_v39, %v13229_v2  ;;  %v8404_v23 = vcombine.high %v8396_v40, %v8396_v40  ;;  %v8412_v24 = vrot.slane %v8396_v40, %v13229_v2  ;;  %12522 = vmatprep.subr.mxu0 %v12900_v0 }
0x13c4   : > { %v8405_v43 = vcombine.high %v8403_v41, %v8403_v41  ;;  %v8419_v20 = vrot.slane %v8403_v41, %v13229_v2  ;;  %v8426_v45 = vrot.slane %v8404_v23, %v13229_v2  ;;  %v8434_v42 = vcombine.high %v8412_v24, %v8412_v24  ;;  %8446 = vst.msk [vmem:[%s13237_s12 + $0xb] sm:$0x1] %vm943_vm7, %v8412_v24 }
0x13c6   : > { %v8433_v48 = vrot.slane %v8405_v43, %v13229_v2  ;;  %v8435_v44 = vcombine.high %v8419_v20, %v8419_v20  ;;  %v8436_v49 = vcombine.high %v8426_v45, %v8426_v45  ;;  %8447 = vst.msk [vmem:[%s13237_s12 + $0x1b] sm:$0x1] %vm943_vm7, %v8426_v45  ;;  %8448 = vst.msk [vmem:[%s13237_s12 + $0x2b] sm:$0x1] %vm943_vm7, %v8434_v42 }
0x13c7   : > { %8450 = vst.msk [vmem:[%s13237_s12 + $0x4b] sm:$0x1] %vm943_vm7, %v8419_v20 }
0x13c8   : > { %v8437_v18 = vcombine.high %v8433_v48, %v8433_v48  ;;  %8449 = vst.msk [vmem:[%s13237_s12 + $0x3b] sm:$0x1] %vm943_vm7, %v8436_v49  ;;  %8451 = vst.msk [vmem:[%s13237_s12 + $0x5b] sm:$0x1] %vm943_vm7, %v8433_v48  ;;  %v9820_v49 = vld [vmem:[%s13057_s6 + $0x2e] sm:$0x1] }
0x13c9   : > { %8452 = vst.msk [vmem:[%s13237_s12 + $0x6b] sm:$0x1] %vm943_vm7, %v8435_v44  ;;  %v9819_v44 = vld [vmem:[%s13057_s6 + $0x1e] sm:$0x1]  ;;  %v9829_v52 = vrot.slane %v9820_v49, 6 }
0x13ca   : > { %8453 = vst.msk [vmem:[%s13237_s12 + $0x7b] sm:$0x1] %vm943_vm7, %v8437_v18  ;;  %v9827_v18 = vrot.slane %v9819_v44, 7 }
0x1472   : > { %v8691_v63 = vpop.f32.mrf.mxu0 }
0x1473   : > { %v8765_v19 = vadd.f32 %v8764_v50, %v8691_v63  ;;  %v9818_v50 = vld [vmem:[%s13057_s6 + $0xe] sm:$0x1] }
0x1474   : > { %v12466_v3 = vpop.f32.mrf.mxu0  ;;  %v9828_v53 = vsel %vm262_vm1, %v9827_v18, %v9818_v50  ;;  %v10666_v18 = vld [vmem:[#allocation5 + $0x10] sm:$0xff]  ;;  %v10590_v50 = vld [vmem:[#allocation5] sm:$0xff] }
0x1475   : > { %v9830_v56 = vsel %vm265_vm2, %v9829_v52, %v9828_v53 }
0x1476   : > { %v8838_v4 = vpop.f32.mrf.mxu0  ;;  %v9832_v46 = vsel %vm268_vm3, %v9831_v55, %v9830_v56 }
0x1477   : > { %12484 = vmatmul.mubr.msk.f32.vlgmr.msra.gmra.mxu1 %vm427_vm6, %v8838_v4 }
0x1478   : > { %12492 = vmatpush3.msra.mxu1 %v14074_v26  ;;  %v12478_v5 = vpop.f32.mrf.mxu0  ;;  %12495 = vmatprep.mubr.msk.f32.mxu1 %vm12901_vm0, %v12900_v0 }
0x1479   : > { %12493 = vmatprep.subr.mxu1 %v12900_v0 }
0x147a   : > { %12494 = vmatpush3.msra.mxu1 %v14077_v28  ;;  %v8988_v7 = vpop.f32.mrf.mxu0 }
0x147b   : > { %12503 = vmatprep.subr.mxu1 %v12900_v0  ;;  %12496 = vmatmul.mubr.msk.f32.vlgmr.msra.gmra.mxu1 %vm427_vm6, %v8988_v7 }
0x147c   : > { %12504 = vmatpush3.msk.msra.mxu1 %vm274_vm4, %v9150_v33  ;;  %v12490_v8 = vpop.f32.mrf.mxu0  ;;  %12505 = vmatprep.mubr.msk.f32.mxu1 %vm12901_vm0, %v12900_v0 }
0x147d   : > { %12515 = vmatprep.subr.mxu1 %v12900_v0 }
0x147e   : > { %v9222_v9 = vpop.f32.mrf.mxu0 }
0x147f   : > { %12506 = vmatmul.mubr.msk.f32.vlgmr.msra.gmra.mxu1 %vm270_vm5, %v14092_v32 }
0x1480   : > { %12516 = vmatpush3.msra.mxu1 %v13979_v1  ;;  %12519 = vmatprep.mubr.msk.f32.mxu1 %vm12901_vm0, %v12900_v0  ;;  %v12502_v10 = vpop.f32.mrf.mxu0 }
0x1481   : > { %12517 = vmatprep.subr.mxu1 %v12900_v0 }
0x1482   : > { %12518 = vmatpush3.msra.mxu1 %v13987_v36 }
0x1483   : > { %12527 = vmatprep.subr.mxu1 %v12900_v0  ;;  %12520 = vmatmul.mubr.msk.f32.vlgmr.msra.gmra.mxu1 %vm427_vm6, %v9222_v9 }
0x1484   : > { %12528 = vmatpush3.msra.mxu1 %v14044_v60  ;;  %12531 = vmatprep.mubr.msk.f32.mxu1 %vm12901_vm0, %v12900_v0 }
0x1485   : > { %12529 = vmatprep.subr.mxu1 %v12900_v0 }
0x1486   : > { %12530 = vmatpush3.msra.mxu1 %v14047_v61 }
0x1487   : > { %12539 = vmatprep.subr.mxu1 %v12900_v0 }
0x1537   : > { %v8913_v12 = vpop.f32.mrf.mxu1 }
0x1538   : > { %v8917_v25 = vadd.f32 %v8913_v12, %v8765_v19 }
0x1539   : > { %v12485_v21 = vpop.f32.mrf.mxu1 }
0x153b   : > { %v9063_v27 = vpop.f32.mrf.mxu1 }
0x153c   : > { %v9067_v29 = vadd.f32 %v9063_v27, %v8917_v25 }
0x153d   : > { %v12497_v30 = vpop.f32.mrf.mxu1 }
0x153e   : > { %v9068_v31 = vadd.f32 %v9067_v29, %v13209_v54 }
0x153f   : > { %v9298_v13 = vpop.f32.mrf.mxu1 }
0x1540   : > { %12748 = vtanh.f32 %v9068_v31  ;;  %12513 = vmatmul.mubr.msk.f32.vlgmr.msra.gmra.mxu0 %vm427_vm6, %v9298_v13 }
0x1541   : > { %12523 = vmatpush3.msk.msra.mxu0 %vm274_vm4, %v9150_v33  ;;  %v12507_v34 = vpop.f32.mrf.mxu1  ;;  %12524 = vmatprep.mubr.msk.f32.mxu0 %vm12901_vm0, %v12900_v0 }
0x1542   : > { %12534 = vmatprep.subr.mxu0 %v12900_v0 }
0x1543   : > { %v9446_v42 = vpop.f32.mrf.mxu1 }
0x1544   : > { %12525 = vmatmul.mubr.msk.f32.vlgmr.msra.gmra.mxu0 %vm270_vm5, %v14004_v17 }
0x1545   : > { %12535 = vmatpush3.msk.msra.mxu0 %vm274_vm4, %v9150_v33  ;;  %12536 = vmatprep.mubr.msk.f32.mxu0 %vm12901_vm0, %v12900_v0  ;;  %v12521_v48 = vpop.f32.mrf.mxu1 }
0x1546   : > { %12546 = vmatprep.subr.mxu0 %v12900_v0 }
0x1548   : > { %12537 = vmatmul.mubr.msk.f32.vlgmr.msra.gmra.mxu0 %vm270_vm5, %v14015_v22 }
0x1549   : > { %12548 = vmatprep.mubr.msk.f32.mxu0 %vm12901_vm0, %v12900_v0  ;;  %12547 = vmatpush3.msk.msra.mxu0 %vm274_vm4, %v9832_v46 }
0x154a   : > { %12556 = vmatprep.subr.mxu0 %v12900_v0 }
0x154c   : > { %12549 = vmatmul.mubr.msk.f32.vlgmr.msra.gmra.mxu0 %vm270_vm5, %v14061_v11 }
0x154d   : > { %v12749_v14 = vpop.eup %12748  ;;  %12557 = vmatpush3.msra.mxu0 %v13977_v62  ;;  %12560 = vmatprep.mubr.msk.f32.mxu0 %vm12901_vm0, %v12900_v0 }
0x154e   : > { %v9071_v58 = vcombine.high %v12749_v14, %v12749_v14  ;;  %v9078_v35 = vrot.slane %v12749_v14, %v13229_v2  ;;  %12558 = vmatprep.subr.mxu0 %v12900_v0 }
0x154f   : > { %12559 = vmatpush3.msra.mxu0 %v13984_v16 }
0x1550   : > { %v9085_v6 = vrot.slane %v9071_v58, %v13229_v2  ;;  %v9086_v37 = vcombine.high %v9078_v35, %v9078_v35  ;;  %v9094_v38 = vrot.slane %v9078_v35, %v13229_v2  ;;  %12570 = vmatprep.subr.mxu0 %v12900_v0 }
0x1552   : > { %v9087_v39 = vcombine.high %v9085_v6, %v9085_v6  ;;  %v9101_v40 = vrot.slane %v9085_v6, %v13229_v2  ;;  %v9108_v41 = vrot.slane %v9086_v37, %v13229_v2  ;;  %v9116_v23 = vcombine.high %v9094_v38, %v9094_v38  ;;  %9128 = vst.msk [vmem:[%s13237_s12 + $0xc] sm:$0x1] %vm943_vm7, %v9094_v38  ;;  %v10501_v6 = vld [vmem:[%s13057_s6 + $0x1f] sm:$0x1]  ;;  %v10502_v37 = vld [vmem:[%s13057_s6 + $0x2f] sm:$0x1] }
0x1553   : > { %v10509_v38 = vrot.slane %v10501_v6, 7 }
0x1554   : > { %v9115_v24 = vrot.slane %v9087_v39, %v13229_v2  ;;  %v9117_v43 = vcombine.high %v9101_v40, %v9101_v40  ;;  %v9118_v20 = vcombine.high %v9108_v41, %v9108_v41  ;;  %9129 = vst.msk [vmem:[%s13237_s12 + $0x1c] sm:$0x1] %vm943_vm7, %v9108_v41  ;;  %9130 = vst.msk [vmem:[%s13237_s12 + $0x2c] sm:$0x1] %vm943_vm7, %v9116_v23  ;;  %v10500_v39 = vld [vmem:[%s13057_s6 + $0xf] sm:$0x1] }
0x1555   : > { %9132 = vst.msk [vmem:[%s13237_s12 + $0x4c] sm:$0x1] %vm943_vm7, %v9101_v40  ;;  %v10503_v40 = vld [vmem:[%s13057_s6 + $0x3f] sm:$0x1]  ;;  %v10511_v41 = vrot.slane %v10502_v37, 6  ;;  %v10510_v23 = vsel %vm262_vm1, %v10509_v38, %v10500_v39 }
0x1556   : > { %v9119_v45 = vcombine.high %v9115_v24, %v9115_v24  ;;  %9131 = vst.msk [vmem:[%s13237_s12 + $0x3c] sm:$0x1] %vm943_vm7, %v9118_v20  ;;  %9133 = vst.msk [vmem:[%s13237_s12 + $0x5c] sm:$0x1] %vm943_vm7, %v9115_v24  ;;  %v10513_v24 = vrot.slane %v10503_v40, 5 }
0x1557   : > { %9134 = vst.msk [vmem:[%s13237_s12 + $0x6c] sm:$0x1] %vm943_vm7, %v9117_v43  ;;  %v10512_v43 = vsel %vm265_vm2, %v10511_v41, %v10510_v23 }
0x1558   : > { %9135 = vst.msk [vmem:[%s13237_s12 + $0x7c] sm:$0x1] %vm943_vm7, %v9119_v45  ;;  %v10514_v20 = vsel %vm268_vm3, %v10513_v24, %v10512_v43 }
0x1600   : > { %v9373_v47 = vpop.f32.mrf.mxu0 }
0x1601   : > { %v9447_v3 = vadd.f32 %v9446_v42, %v9373_v47 }
0x1602   : > { %v12514_v57 = vpop.f32.mrf.mxu0 }
0x1604   : > { %v9520_v15 = vpop.f32.mrf.mxu0 }
0x1605   : > { %12532 = vmatmul.mubr.msk.f32.vlgmr.msra.gmra.mxu1 %vm427_vm6, %v9520_v15 }
0x1606   : > { %12540 = vmatpush3.msra.mxu1 %v14074_v26  ;;  %v12526_v59 = vpop.f32.mrf.mxu0  ;;  %12543 = vmatprep.mubr.msk.f32.mxu1 %vm12901_vm0, %v12900_v0 }
0x1607   : > { %12541 = vmatprep.subr.mxu1 %v12900_v0 }
0x1608   : > { %12542 = vmatpush3.msra.mxu1 %v14077_v28  ;;  %v9670_v62 = vpop.f32.mrf.mxu0 }
0x1609   : > { %12551 = vmatprep.subr.mxu1 %v12900_v0  ;;  %12544 = vmatmul.mubr.msk.f32.vlgmr.msra.gmra.mxu1 %vm427_vm6, %v9670_v62 }
0x160a   : > { %12552 = vmatpush3.msk.msra.mxu1 %vm274_vm4, %v9832_v46  ;;  %v12538_v16 = vpop.f32.mrf.mxu0  ;;  %12553 = vmatprep.mubr.msk.f32.mxu1 %vm12901_vm0, %v12900_v0 }
0x160b   : > { %12563 = vmatprep.subr.mxu1 %v12900_v0  ;;  %v11539_v16 = vld [vmem:[%s14555_s1 + $0x10] sm:$0xff] }
0x160c   : > { %v9904_v33 = vpop.f32.mrf.mxu0 }
0x160d   : > { %12554 = vmatmul.mubr.msk.f32.vlgmr.msra.gmra.mxu1 %vm270_vm5, %v14092_v32 }
0x160e   : > { %12564 = vmatpush3.msra.mxu1 %v13979_v1  ;;  %12567 = vmatprep.mubr.msk.f32.mxu1 %vm12901_vm0, %v12900_v0  ;;  %v12550_v63 = vpop.f32.mrf.mxu0 }
0x160f   : > { %12565 = vmatprep.subr.mxu1 %v12900_v0 }
0x1610   : > { %12566 = vmatpush3.msra.mxu1 %v13987_v36 }
0x1611   : > { %12575 = vmatprep.subr.mxu1 %v12900_v0  ;;  %12568 = vmatmul.mubr.msk.f32.vlgmr.msra.gmra.mxu1 %vm427_vm6, %v9904_v33  ;;  %v11543_v33 = vld [vmem:[%s14555_s1 + $0x18] sm:$0xff] }
0x1612   : > { %12576 = vmatpush3.msra.mxu1 %v14044_v60  ;;  %12579 = vmatprep.mubr.msk.f32.mxu1 %vm12901_vm0, %v12900_v0 }
0x1613   : > { %12577 = vmatprep.subr.mxu1 %v12900_v0 }
0x1614   : > { %12578 = vmatpush3.msra.mxu1 %v14047_v61 }
0x1615   : > { %12587 = vmatprep.subr.mxu1 %v12900_v0 }
0x16c5   : > { %v9595_v1 = vpop.f32.mrf.mxu1 }
0x16c6   : > { %v9599_v4 = vadd.f32 %v9595_v1, %v9447_v3 }
0x16c7   : > { %v12533_v36 = vpop.f32.mrf.mxu1 }
0x16c9   : > { %v9745_v5 = vpop.f32.mrf.mxu1 }
0x16ca   : > { %v9749_v7 = vadd.f32 %v9745_v5, %v9599_v4 }
0x16cb   : > { %v12545_v8 = vpop.f32.mrf.mxu1 }
0x16cc   : > { %v9750_v9 = vadd.f32 %v9749_v7, %v13209_v54 }
0x16cd   : > { %v9980_v10 = vpop.f32.mrf.mxu1 }
0x16ce   : > { %12750 = vtanh.f32 %v9750_v9  ;;  %12561 = vmatmul.mubr.msk.f32.vlgmr.msra.gmra.mxu0 %vm427_vm6, %v9980_v10 }
0x16cf   : > { %12571 = vmatpush3.msk.msra.mxu0 %vm274_vm4, %v9832_v46  ;;  %v12555_v60 = vpop.f32.mrf.mxu1  ;;  %12572 = vmatprep.mubr.msk.f32.mxu0 %vm12901_vm0, %v12900_v0 }
0x16d0   : > { %12582 = vmatprep.subr.mxu0 %v12900_v0 }
0x16d1   : > { %v10128_v58 = vpop.f32.mrf.mxu1 }
0x16d2   : > { %12573 = vmatmul.mubr.msk.f32.vlgmr.msra.gmra.mxu0 %vm270_vm5, %v14004_v17 }
0x16d3   : > { %12583 = vmatpush3.msk.msra.mxu0 %vm274_vm4, %v9832_v46  ;;  %12584 = vmatprep.mubr.msk.f32.mxu0 %vm12901_vm0, %v12900_v0  ;;  %v12569_v35 = vpop.f32.mrf.mxu1 }
0x16d4   : > { %12594 = vmatprep.subr.mxu0 %v12900_v0 }
0x16d6   : > { %12585 = vmatmul.mubr.msk.f32.vlgmr.msra.gmra.mxu0 %vm270_vm5, %v14015_v22 }
0x16d7   : > { %12596 = vmatprep.mubr.msk.f32.mxu0 %vm12901_vm0, %v12900_v0  ;;  %12595 = vmatpush3.msk.msra.mxu0 %vm274_vm4, %v10514_v20 }
0x16d8   : > { %12604 = vmatprep.subr.mxu0 %v12900_v0 }
0x16da   : > { %12597 = vmatmul.mubr.msk.f32.vlgmr.msra.gmra.mxu0 %vm270_vm5, %v14061_v11 }
0x16db   : > { %v12751_v61 = vpop.eup %12750  ;;  %12608 = vmatprep.mubr.msk.f32.mxu0 %vm12901_vm0, %v12900_v0 }
0x16dc   : > { %v9753_v12 = vcombine.high %v12751_v61, %v12751_v61  ;;  %v9760_v17 = vrot.slane %v12751_v61, %v13229_v2 }
0x16de   : > { %v9767_v19 = vrot.slane %v9753_v12, %v13229_v2  ;;  %v9768_v21 = vcombine.high %v9760_v17, %v9760_v17  ;;  %v9776_v25 = vrot.slane %v9760_v17, %v13229_v2 }
0x16e0   : > { %v9769_v22 = vcombine.high %v9767_v19, %v9767_v19  ;;  %v9783_v27 = vrot.slane %v9767_v19, %v13229_v2  ;;  %v9790_v29 = vrot.slane %v9768_v21, %v13229_v2  ;;  %v9798_v30 = vcombine.high %v9776_v25, %v9776_v25  ;;  %9810 = vst.msk [vmem:[%s13237_s12 + $0xd] sm:$0x1] %vm943_vm7, %v9776_v25  ;;  %v10889_v21 = vld [vmem:[#allocation5 + $0x28] sm:$0xff]  ;;  %v10888_v25 = vld [vmem:[#allocation5 + $0x20] sm:$0xff] }
0x16e2   : > { %v9797_v31 = vrot.slane %v9769_v22, %v13229_v2  ;;  %v9799_v13 = vcombine.high %v9783_v27, %v9783_v27  ;;  %v9800_v34 = vcombine.high %v9790_v29, %v9790_v29  ;;  %9811 = vst.msk [vmem:[%s13237_s12 + $0x1d] sm:$0x1] %vm943_vm7, %v9790_v29  ;;  %9812 = vst.msk [vmem:[%s13237_s12 + $0x2d] sm:$0x1] %vm943_vm7, %v9798_v30  ;;  %v11039_v30 = vld [vmem:[#allocation5 + $0x38] sm:$0xff] }
0x16e3   : > { %9814 = vst.msk [vmem:[%s13237_s12 + $0x4d] sm:$0x1] %vm943_vm7, %v9783_v27 }
0x16e4   : > { %v9801_v14 = vcombine.high %v9797_v31, %v9797_v31  ;;  %9813 = vst.msk [vmem:[%s13237_s12 + $0x3d] sm:$0x1] %vm943_vm7, %v9800_v34  ;;  %9815 = vst.msk [vmem:[%s13237_s12 + $0x5d] sm:$0x1] %vm943_vm7, %v9797_v31 }
0x16e5   : > { %9816 = vst.msk [vmem:[%s13237_s12 + $0x6d] sm:$0x1] %vm943_vm7, %v9799_v13  ;;  %v11038_v13 = vld [vmem:[#allocation5 + $0x30] sm:$0xff] }
0x16e6   : > { %9817 = vst.msk [vmem:[%s13237_s12 + $0x7d] sm:$0x1] %vm943_vm7, %v9801_v14 }
0x178e   : > { %v10055_v45 = vpop.f32.mrf.mxu0 }
0x178f   : > { %v10129_v53 = vadd.f32 %v10128_v58, %v10055_v45 }
0x1790   : > { %v12562_v42 = vpop.f32.mrf.mxu0 }
0x1792   : > { %v10202_v48 = vpop.f32.mrf.mxu0 }
0x1793   : > { %12580 = vmatmul.mubr.msk.f32.vlgmr.msra.gmra.mxu1 %vm427_vm6, %v10202_v48 }
0x1794   : > { %12588 = vmatpush3.msra.mxu1 %v14074_v26  ;;  %v12574_v44 = vpop.f32.mrf.mxu0  ;;  %12591 = vmatprep.mubr.msk.f32.mxu1 %vm12901_vm0, %v12900_v0  ;;  %v10667_v26 = vld [vmem:[#allocation5 + $0x18] sm:$0xff] }
0x1795   : > { %12589 = vmatprep.subr.mxu1 %v12900_v0  ;;  %12605 = vmatpush3.msra.mxu0 %v10667_v26 }
0x1796   : > { %12590 = vmatpush3.msra.mxu1 %v14077_v28  ;;  %v10352_v11 = vpop.f32.mrf.mxu0  ;;  %v10591_v28 = vld [vmem:[#allocation5 + $0x8] sm:$0xff]  ;;  %12606 = vmatprep.subr.mxu0 %v12900_v0 }
0x1797   : > { %12599 = vmatprep.subr.mxu1 %v12900_v0  ;;  %12592 = vmatmul.mubr.msk.f32.vlgmr.msra.gmra.mxu1 %vm427_vm6, %v10352_v11 }
0x1798   : > { %12600 = vmatpush3.msk.msra.mxu1 %vm274_vm4, %v10514_v20  ;;  %v12586_v49 = vpop.f32.mrf.mxu0  ;;  %12601 = vmatprep.mubr.msk.f32.mxu1 %vm12901_vm0, %v12900_v0 }
0x1799   : > { %12611 = vmatprep.subr.mxu1 %v12900_v0  ;;  %12607 = vmatpush3.msra.mxu0 %v10666_v18 }
0x179a   : > { %v10586_v51 = vpop.f32.mrf.mxu0  ;;  %12618 = vmatprep.subr.mxu0 %v12900_v0 }
0x179b   : > { %12602 = vmatmul.mubr.msk.f32.vlgmr.msra.gmra.mxu1 %vm270_vm5, %v14092_v32 }
0x179c   : > { %12615 = vmatprep.mubr.msk.f32.mxu1 %vm12901_vm0, %v12900_v0  ;;  %12612 = vmatpush3.msra.mxu1 %v10591_v28  ;;  %v12598_v32 = vpop.f32.mrf.mxu0 }
0x179d   : > { %12613 = vmatprep.subr.mxu1 %v12900_v0 }
0x179e   : > { %12614 = vmatpush3.msra.mxu1 %v10590_v50 }
0x179f   : > { %12616 = vmatmul.mubr.msk.f32.vlgmr.msra.gmra.mxu1 %vm427_vm6, %v10586_v51  ;;  %12623 = vmatprep.subr.mxu1 %v12900_v0 }
0x17a0   : > { %12627 = vmatprep.mubr.msk.f32.mxu1 %vm12901_vm0, %v12900_v0  ;;  %12624 = vmatpush3.msra.mxu1 %v10889_v21 }
0x17a1   : > { %12625 = vmatprep.subr.mxu1 %v12900_v0 }
0x17a2   : > { %12626 = vmatpush3.msra.mxu1 %v10888_v25 }
0x17a3   : > { %12635 = vmatprep.subr.mxu1 %v12900_v0 }
0x1853   : > { %v10277_v52 = vpop.f32.mrf.mxu1 }
0x1854   : > { %v10281_v56 = vadd.f32 %v10277_v52, %v10129_v53 }
0x1855   : > { %v12581_v55 = vpop.f32.mrf.mxu1 }
0x1857   : > { %v10427_v46 = vpop.f32.mrf.mxu1 }
0x1858   : > { %v10431_v47 = vadd.f32 %v10427_v46, %v10281_v56 }
0x1859   : > { %v12593_v57 = vpop.f32.mrf.mxu1 }
0x185a   : > { %v10432_v15 = vadd.f32 %v10431_v47, %v13209_v54 }
0x185b   : > { %v10662_v59 = vpop.f32.mrf.mxu1 }
0x185c   : > { %12752 = vtanh.f32 %v10432_v15  ;;  %12609 = vmatmul.mubr.msk.f32.vlgmr.msra.gmra.mxu0 %vm427_vm6, %v10662_v59 }
0x185d   : > { %12619 = vmatpush3.msk.msra.mxu0 %vm274_vm4, %v10514_v20  ;;  %v12603_v62 = vpop.f32.mrf.mxu1  ;;  %12620 = vmatprep.mubr.msk.f32.mxu0 %vm12901_vm0, %v12900_v0 }
0x185e   : > { %12630 = vmatprep.subr.mxu0 %v12900_v0 }
0x185f   : > { %v10810_v19 = vpop.f32.mrf.mxu1 }
0x1860   : > { %12621 = vmatmul.mubr.msk.f32.vlgmr.msra.gmra.mxu0 %vm270_vm5, %v11539_v16 }
0x1861   : > { %12631 = vmatpush3.msk.msra.mxu0 %vm274_vm4, %v10514_v20  ;;  %12632 = vmatprep.mubr.msk.f32.mxu0 %vm12901_vm0, %v12900_v0  ;;  %v12617_v22 = vpop.f32.mrf.mxu1 }
0x1864   : > { %12633 = vmatmul.mubr.msk.f32.vlgmr.msra.gmra.mxu0 %vm270_vm5, %v11543_v33 }
0x1869   : > { %v12753_v63 = vpop.eup %12752 }
0x186a   : > { %v10435_v1 = vcombine.high %v12753_v63, %v12753_v63  ;;  %v10442_v3 = vrot.slane %v12753_v63, %v13229_v2 }
0x186c   : > { %v10449_v36 = vrot.slane %v10435_v1, %v13229_v2  ;;  %v10450_v4 = vcombine.high %v10442_v3, %v10442_v3  ;;  %v10458_v5 = vrot.slane %v10442_v3, %v13229_v2 }
0x186e   : > { %v10451_v7 = vcombine.high %v10449_v36, %v10449_v36  ;;  %v10465_v8 = vrot.slane %v10449_v36, %v13229_v2  ;;  %v10472_v9 = vrot.slane %v10450_v4, %v13229_v2  ;;  %v10480_v10 = vcombine.high %v10458_v5, %v10458_v5  ;;  %10492 = vst.msk [vmem:[%s13237_s12 + $0xe] sm:$0x1] %vm943_vm7, %v10458_v5 }
0x1870   : > { %v10479_v60 = vrot.slane %v10451_v7, %v13229_v2  ;;  %v10481_v61 = vcombine.high %v10465_v8, %v10465_v8  ;;  %v10482_v12 = vcombine.high %v10472_v9, %v10472_v9  ;;  %10493 = vst.msk [vmem:[%s13237_s12 + $0x1e] sm:$0x1] %vm943_vm7, %v10472_v9  ;;  %10494 = vst.msk [vmem:[%s13237_s12 + $0x2e] sm:$0x1] %vm943_vm7, %v10480_v10 }
0x1871   : > { %10496 = vst.msk [vmem:[%s13237_s12 + $0x4e] sm:$0x1] %vm943_vm7, %v10465_v8 }
0x1872   : > { %v10483_v17 = vcombine.high %v10479_v60, %v10479_v60  ;;  %10495 = vst.msk [vmem:[%s13237_s12 + $0x3e] sm:$0x1] %vm943_vm7, %v10482_v12  ;;  %10497 = vst.msk [vmem:[%s13237_s12 + $0x5e] sm:$0x1] %vm943_vm7, %v10479_v60 }
0x1873   : > { %10498 = vst.msk [vmem:[%s13237_s12 + $0x6e] sm:$0x1] %vm943_vm7, %v10481_v61 }
0x1874   : > { %10499 = vst.msk [vmem:[%s13237_s12 + $0x7e] sm:$0x1] %vm943_vm7, %v10483_v17 }
0x191c   : > { %v10737_v27 = vpop.f32.mrf.mxu0 }
0x191d   : > { %v10811_v6 = vadd.f32 %v10810_v19, %v10737_v27 }
0x191e   : > { %v12610_v29 = vpop.f32.mrf.mxu0 }
0x1920   : > { %v10884_v31 = vpop.f32.mrf.mxu0 }
0x1921   : > { %12628 = vmatmul.mubr.msk.f32.vlgmr.msra.gmra.mxu1 %vm427_vm6, %v10884_v31 }
0x1922   : > { %12636 = vmatpush3.msra.mxu1 %v11039_v30  ;;  %v12622_v34 = vpop.f32.mrf.mxu0  ;;  %12639 = vmatprep.mubr.msk.f32.mxu1 %vm12901_vm0, %v12900_v0 }
0x1923   : > { %12637 = vmatprep.subr.mxu1 %v12900_v0 }
0x1924   : > { %12638 = vmatpush3.msra.mxu1 %v11038_v13  ;;  %v11034_v14 = vpop.f32.mrf.mxu0 }
0x1925   : > { %12640 = vmatmul.mubr.msk.f32.vlgmr.msra.gmra.mxu1 %vm427_vm6, %v11034_v14 }
0x1926   : > { %v12634_v58 = vpop.f32.mrf.mxu0 }
0x19e1   : > { %v10959_v35 = vpop.f32.mrf.mxu1 }
0x19e2   : > { %v10963_v38 = vadd.f32 %v10959_v35, %v10811_v6 }
0x19e3   : > { %v12629_v37 = vpop.f32.mrf.mxu1 }
0x19e5   : > { %v11109_v39 = vpop.f32.mrf.mxu1 }
0x19e6   : > { %v11113_v40 = vadd.f32 %v11109_v39, %v10963_v38 }
0x19e7   : > { %v12641_v41 = vpop.f32.mrf.mxu1 }
0x19e8   : > { %v11114_v23 = vadd.f32 %v11113_v40, %v13209_v54 }
0x19ea   : > { %12754 = vtanh.f32 %v11114_v23 }
0x19f7   : > { %v12755_v24 = vpop.eup %12754 }
0x19f8   : > { %v11117_v0 = vcombine.high %v12755_v24, %v12755_v24  ;;  %v11124_v43 = vrot.slane %v12755_v24, %v13229_v2 }
0x19fa   : > { %v11131_v20 = vrot.slane %v11117_v0, %v13229_v2  ;;  %v11132_v45 = vcombine.high %v11124_v43, %v11124_v43  ;;  %v11140_v42 = vrot.slane %v11124_v43, %v13229_v2 }
0x19fc   : > { %v11133_v48 = vcombine.high %v11131_v20, %v11131_v20  ;;  %v11147_v44 = vrot.slane %v11131_v20, %v13229_v2  ;;  %v11154_v54 = vrot.slane %v11132_v45, %v13229_v2  ;;  %v11162_v11 = vcombine.high %v11140_v42, %v11140_v42  ;;  %11174 = vst.msk [vmem:[%s13237_s12 + $0xf] sm:$0x1] %vm943_vm7, %v11140_v42 }
0x19fe   : > { %v11161_v49 = vrot.slane %v11133_v48, %v13229_v2  ;;  %v11163_v26 = vcombine.high %v11147_v44, %v11147_v44  ;;  %v11164_v28 = vcombine.high %v11154_v54, %v11154_v54  ;;  %11175 = vst.msk [vmem:[%s13237_s12 + $0x1f] sm:$0x1] %vm943_vm7, %v11154_v54  ;;  %11176 = vst.msk [vmem:[%s13237_s12 + $0x2f] sm:$0x1] %vm943_vm7, %v11162_v11 }
0x19ff   : > { %11178 = vst.msk [vmem:[%s13237_s12 + $0x4f] sm:$0x1] %vm943_vm7, %v11147_v44 }
0x1a00   : > { %v11165_v2 = vcombine.high %v11161_v49, %v11161_v49  ;;  %11177 = vst.msk [vmem:[%s13237_s12 + $0x3f] sm:$0x1] %vm943_vm7, %v11164_v28  ;;  %11179 = vst.msk [vmem:[%s13237_s12 + $0x5f] sm:$0x1] %vm943_vm7, %v11161_v49 }
0x1a01   : > { %11180 = vst.msk [vmem:[%s13237_s12 + $0x6f] sm:$0x1] %vm943_vm7, %v11163_v26 }
0x1a02   : > { %11181 = vst.msk [vmem:[%s13237_s12 + $0x7f] sm:$0x1] %vm943_vm7, %v11165_v2 }
0x1a03   : > { %12823 = shalt.err (!%p12820_p5)
}
0x1a04   : > { %s12824_s12 = scalar_lea.hbm %s14496_s10, 2048  ;;  %s12828_s6 = scalar_lea.hbm %s14558_s4, 4096 }
0x1a05   : > { %p12825_p7 = scmp.ne.s32.totalorder %s14496_s10, %s12824_s12  ;;  %p12829_p9 = scmp.lt.s32.totalorder %s14496_s10, %s14558_s4 }
0x1a06   : > { %p12830_p11 = scmp.lt.s32.totalorder %s12828_s6, %s12824_s12 }
0x1a07   : > { %p12826_p4 = pnand %p12825_p7, %p13022_p13 }
0x1a08   : > { %p12831_p10 = por %p12830_p11, %p12829_p9 }
0x1a09   : > { %p12827_p6 = pneg %p12826_p4 }
0x1a0b   : > { %p12832_p1 = pnand %p12831_p10, %p12827_p6 }
0x1a0d   : > { %12835 = shalt.err (!%p12832_p1)
}
0x1a0e   : > { %s12905_s25 = smov 128   ;;  %s12906_s27 = smov 8  }
0x1a0f   : > { %12648 = dma.vmem_to_hbm [thread:$0]  (%p13022_p13), %s14498_s7, 2048, %s14496_s10, %s11183_s18, %s12905_s25, %s12905_s25, %s12906_s27  }
0x1a10 PF: > { %s11213_s8 = sand.u32 1, %s12874_s15   ;;  %p14576_p8 = scmp.ne.s32.totalorder %s14566_s26, 0 }
0x1a11   : > { %p14577_p12 = scmp.ge.s32.totalorder %s12894_s20, 2  ;;  %s11214_s9 = scalar_lea.sflag [#allocation4], %s11213_s8 }
0x1a13   : > { %p12659_p0 = pnand %p14577_p12, %p14576_p8 }
0x1a15   : > { %p12660_p2 = pneg %p12659_p0 }
0x1a17   : > { %12869 = dma.done.wait (%p12660_p2), %s11214_s9, 2048  }
0x1a18   : > { %12871 = vsyncadd (%p12660_p2), %s11214_s9, 4294965248  ;;  %s21_s20 = sadd.s32 1, %s12894_s20   ;;  %s14578_s15 = smov %s12878_s16 }
0x1a19   : > { %p18_p3 = scmp.ge.s32.totalorder %s21_s20, 4   ;;  %s14579_s16 = smov %s12882_s17 }
0x1a1a   : > { %s14580_s17 = smov %s13031_s28  ;;  %s14581_s18 = smov %s12890_s19 }
0x1a1b   : > { %s14582_s19 = smov %s14584_s5  ;;  %20 = sbr.rel (!%p18_p3) target bundleno = 9 (0x9), region = 91 }
0x1a20   :  { %11219 = vsyncpa [#allocation3], 1 }
0x1a21   :  { %11221 = vsyncpa [#allocation3 + $0x1], 1 }
0x1a22   :  { %11222 = vsyncpa [#allocation6], 1 }
0x1a23   :  { %11223 = vsyncpa [#allocation4], 1 }
0x1a24   :  { %11225 = vsyncpa [#allocation4 + $0x1], 1 }

</bundles_post_ra>
